<compile_context>
chip_gen: v6e
topology: v6e:2x2x1
jax: 0.10.0
libtpu: 0.0.40
codegen_flags: <defaults>
</compile_context>

<pallas_src>
import functools
import math

import numpy as np
import jax
import jax.numpy as jnp
from jax.experimental import pallas as pl
from jax.experimental.pallas import tpu as pltpu

# -------------------- small synthetic SAM-HQ configuration --------------------
C = 32                 # transformer_dim / prompt embed_dim   (SAM: 256)
H = W = 8              # image-embedding spatial              (SAM: 64)
IMG_SIZE = 128         # image_encoder.img_size = 16 * H      (SAM: 1024)
NUM_HEADS = 4
MLP_DIM = 64
IOU_HIDDEN = 64
MASK_IN_CHANS = 16
NUM_MASK_TOKENS = 5    # 4 SAM mask tokens + 1 HQ token
NUM_POINT_EMB = 4
ATTN_DOWNSAMPLE = 2

HQ_TOKEN_ONLY = False
MULTIMASK_OUTPUT = False
# TODO(synk): use_stability_score / return_extra_metrics branches omitted (defaults are False).

MXU_DTYPE = jnp.bfloat16   # matmul operands; accumulation stays f32


# ------------------------------ in-kernel helpers ------------------------------


def _relu(x):
    return jnp.maximum(x, 0.0)


def _erf(x):
    # Abramowitz & Stegun 7.1.26 (max abs err ~1.5e-7); uses only exp/abs/where.
    # TODO(synk): switch to tanh-GELU if profiling shows the VALU slot binding.
    ax = jnp.abs(x)
    t = 1.0 / (1.0 + 0.3275911 * ax)
    poly = ((((1.061405429 * t - 1.453152027) * t + 1.421413741) * t
             - 0.284496736) * t + 0.254829592) * t
    y = 1.0 - poly * jnp.exp(-ax * ax)
    return jnp.where(x >= 0.0, y, -y)


def _gelu(x):
    # exact (erf-based) GELU, matching nn.GELU() default; kept in f32 (VPU/EUP work)
    return 0.5 * x * (1.0 + _erf(x * (1.0 / math.sqrt(2.0))))


def _ln(x, w, b, eps):
    mu = jnp.mean(x, axis=-1, keepdims=True)
    xc = x - mu
    var = jnp.mean(xc * xc, axis=-1, keepdims=True)
    return xc * jax.lax.rsqrt(var + eps) * w + b


def _bf(x):
    return x.astype(MXU_DTYPE)


def _mm(a, b):
    # MXU matmul: bf16 operands, f32 accumulation
    return jnp.dot(_bf(a), _bf(b), preferred_element_type=jnp.float32)


def _heads_split(x, dh):
    # (N, heads*dh) -> (heads, N, dh) via a stack of static lane slices (done once
    # per projected tensor; no per-dot slicing inside the attention math).
    return jnp.stack([x[:, h * dh:(h + 1) * dh] for h in range(NUM_HEADS)], axis=0)


def _mha(qkv_w, qkv_b, out_w, out_b, q_in, k_in, v_in, *,
         same_qkv=False, same_qk=False, lane_dense=False):
    """Head-batched multi-head attention; single output projection over dint."""
    dint = out_w.shape[0]
    if same_qkv:
        qkv = _mm(q_in, qkv_w) + qkv_b
        qp, kp, vp = qkv[:, :dint], qkv[:, dint:2 * dint], qkv[:, 2 * dint:3 * dint]
    elif same_qk:
        qk = _mm(q_in, qkv_w[:, :2 * dint]) + qkv_b[:, :2 * dint]
        qp, kp = qk[:, :dint], qk[:, dint:]
        vp = _mm(v_in, qkv_w[:, 2 * dint:3 * dint]) + qkv_b[:, 2 * dint:3 * dint]
    else:
        qp = _mm(q_in, qkv_w[:, :dint]) + qkv_b[:, :dint]
        kp = _mm(k_in, qkv_w[:, dint:2 * dint]) + qkv_b[:, dint:2 * dint]
        vp = _mm(v_in, qkv_w[:, 2 * dint:3 * dint]) + qkv_b[:, 2 * dint:3 * dint]

    dh = dint // NUM_HEADS
    qh = _heads_split(qp * (1.0 / math.sqrt(dh)), dh)     # scale folded into q
    kh = _heads_split(kp, dh)
    vh = _heads_split(vp, dh)

    if not lane_dense:
        # standard: key axis on lanes, softmax over last axis (f32)
        s = jnp.einsum('hqd,hkd->hqk', _bf(qh), _bf(kh),
                       preferred_element_type=jnp.float32)
        s = s - jnp.max(s, axis=-1, keepdims=True)
        p = jnp.exp(s)
        p = p * pl.reciprocal(jnp.sum(p, axis=-1, keepdims=True), approx=True)
        ctx = jnp.einsum('hqk,hkd->hqd', _bf(p), _bf(vh),
                         preferred_element_type=jnp.float32)
    else:
        # cross image->token: long query axis stays on lanes, softmax over the
        # (few) token rows runs as a cross-sublane reduction.
        sT = jnp.einsum('hkd,hqd->hkq', _bf(kh), _bf(qh),
                        preferred_element_type=jnp.float32)
        sT = sT - jnp.max(sT, axis=1, keepdims=True)
        pT = jnp.exp(sT)
        pT = pT * pl.reciprocal(jnp.sum(pT, axis=1, keepdims=True), approx=True)
        ctx = jnp.einsum('hkq,hkd->hqd', _bf(pT), _bf(vh),
                         preferred_element_type=jnp.float32)

    # concat(heads) then ONE (Nq, dint) @ (dint, C) output projection
    ctx = jnp.concatenate([ctx[h] for h in range(NUM_HEADS)], axis=-1)
    return _mm(ctx, out_w) + out_b


def _shift2d(x, dh, dw):
    """result[i, j, :] = x[i + dh, j + dw, :], zero outside (3x3 conv tap read)."""
    Hh, Ww, Cc = x.shape
    if dh == -1:
        x = jnp.concatenate([jnp.zeros((1, Ww, Cc), x.dtype), x[:-1]], axis=0)
    elif dh == 1:
        x = jnp.concatenate([x[1:], jnp.zeros((1, Ww, Cc), x.dtype)], axis=0)
    if dw == -1:
        x = jnp.concatenate([jnp.zeros((Hh, 1, Cc), x.dtype), x[:, :-1]], axis=1)
    elif dw == 1:
        x = jnp.concatenate([x[:, 1:], jnp.zeros((Hh, 1, Cc), x.dtype)], axis=1)
    return x


# ------------------------------ BlockSpec helpers ------------------------------


def _const_spec(a):
    nd = a.ndim
    return pl.BlockSpec(tuple(a.shape), lambda *_, _nd=nd: (0,) * _nd)


def _batch_spec(a):
    nd = a.ndim
    return pl.BlockSpec((1,) + tuple(a.shape[1:]),
                        lambda i, *_, _nd=nd: (i,) + (0,) * (_nd - 1))


def _parallel():
    return pltpu.CompilerParams(dimension_semantics=("parallel",))


def _pack_rows(rows):
    """Pack many (1, d_i) bias / LN rows into one (n, max_d) f32 array."""
    width = max(int(r.shape[-1]) for r in rows)
    padded = [jnp.pad(r.reshape(1, -1).astype(jnp.float32),
                      ((0, 0), (0, width - int(r.shape[-1])))) for r in rows]
    return jnp.concatenate(padded, axis=0)


# --------------------------- resize / postprocessing ----------------------------


def _bilinear_matrix(in_size, out_size):
    # F.interpolate(mode='bilinear', align_corners=False) as a dense matrix
    R = np.zeros((out_size, in_size), np.float32)
    scale = in_size / out_size
    for i in range(out_size):
        src = max((i + 0.5) * scale - 0.5, 0.0)
        i0 = min(int(np.floor(src)), in_size - 1)
        i1 = min(i0 + 1, in_size - 1)
        lam = src - i0
        R[i, i0] += 1.0 - lam
        R[i, i1] += lam
    return R


def resize_longest_image_size(orig_im_size, longest_side):
    s = np.asarray(orig_im_size, np.float32)
    scale = np.float32(longest_side) / s.max()
    return np.floor(scale * s + 0.5).astype(np.int64)


def _row_tile(n):
    """Largest divisor of n that is a multiple of 8 and <= 64 (else n)."""
    t = n
    for d in range(8, min(n, 64) + 1, 8):
        if n % d == 0:
            t = d
    return t


# ------------------------------ Pallas kernels ----------------------------------


def _prompt_kernel(pe_ref, lab_ref, nap_ref, ptw_ref,
                   patch_ref, w1_ref, b1_ref, ln1w_ref, ln1b_ref,
                   w2_ref, b2_ref, ln2w_ref, ln2b_ref,
                   w3_ref, b3_ref, nomask_ref, hasmask_ref, img_ref,
                   sparse_ref, src0_ref):
    """Point-label combine + fused mask_downscaling (tap-grouped, no selection
    matrices) + no-mask blend + image-embedding add."""
    # ---- _embed_points (PE encoding already applied; combine with labels) ----
    pe = pe_ref[...]
    lab = lab_ref[...]
    out = pe * (lab != -1.0).astype(jnp.float32)
    out = out + nap_ref[...] * (lab == -1.0).astype(jnp.float32)
    ptw = ptw_ref[...]
    for i in range(NUM_POINT_EMB):
        out = out + ptw[i:i + 1, :] * (lab == float(i)).astype(jnp.float32)
    sparse_ref[...] = out

    # ---- _embed_masks on (H*W, 16) 4x4-patch rows: conv2x2s2 -> LN -> GELU ->
    #      conv2x2s2 -> LN -> GELU -> conv1x1, all tap-grouped in VMEM
    patches = patch_ref[...]                               # (H*W, 16)
    w1 = w1_ref[...]
    w2 = w2_ref[...]
    m4 = w1.shape[1]
    acc2 = None
    for t in range(4):                                     # intermediate pixel within 2x2
        y1t = _mm(patches[:, 4 * t:4 * t + 4], w1) + b1_ref[...]
        y1t = _gelu(_ln(y1t, ln1w_ref[...], ln1b_ref[...], 1e-6))
        part = _mm(y1t, w2[t * m4:(t + 1) * m4, :])
        acc2 = part if acc2 is None else acc2 + part
    y2 = _gelu(_ln(acc2 + b2_ref[...], ln2w_ref[...], ln2b_ref[...], 1e-6))
    y3 = _mm(y2, w3_ref[...]) + b3_ref[...]
    hm = hasmask_ref[...]
    dense = hm * y3 + (1.0 - hm) * nomask_ref[...]
    src0_ref[...] = img_ref[...] + dense


def _two_way_kernel(tok_ref, src_ref, pos_ref, vec_ref, *rest, n_mats):
    """Entire two-way transformer (2 blocks + final attn + final LN) for one prompt
    batch, fully resident in VMEM; biases/LN params come from one packed array."""
    mats = rest[:n_mats]
    hs_ref, keys_ref = rest[n_mats], rest[n_mats + 1]
    vecs = vec_ref[...]                                   # (n_rows, max_width) f32

    def vrow(i, w):
        return vecs[i:i + 1, :w]

    queries = tok_ref[0]
    qpe = queries                                         # query PE = original tokens
    keys = src_ref[...]
    kpe = pos_ref[...]

    mi = 0
    vi = 0

    def attn(q_in, k_in, v_in, same_qkv=False, same_qk=False, lane_dense=False):
        nonlocal mi, vi
        qkv_w = mats[mi][...]
        out_w = mats[mi + 1][...]
        dint = out_w.shape[0]
        qkv_b = vrow(vi, 3 * dint)
        out_b = vrow(vi + 1, C)
        mi += 2
        vi += 2
        return _mha(qkv_w, qkv_b, out_w, out_b, q_in, k_in, v_in,
                    same_qkv=same_qkv, same_qk=same_qk, lane_dense=lane_dense)

    def norm(x):
        nonlocal vi
        w = vrow(vi, C)
        b = vrow(vi + 1, C)
        vi += 2
        return _ln(x, w, b, 1e-5)

    for li in range(2):
        if li == 0:                                       # skip_first_layer_pe
            queries = attn(queries, queries, queries, same_qkv=True)
        else:
            q = queries + qpe
            queries = queries + attn(q, q, queries, same_qk=True)
        queries = norm(queries)

        q = queries + qpe
        k = keys + kpe
        queries = queries + attn(q, k, keys)
        queries = norm(queries)

        w1 = mats[mi][...]
        w2 = mats[mi + 1][...]
        mi += 2
        b1 = vrow(vi, MLP_DIM)
        b2 = vrow(vi + 1, C)
        vi += 2
        h1 = _relu(_mm(queries, w1) + b1)
        queries = norm(queries + _mm(h1, w2) + b2)

        q = queries + qpe
        k = keys + kpe
        keys = keys + attn(k, q, queries, lane_dense=True)
        keys = norm(keys)

    q = queries + qpe
    k = keys + kpe
    queries = queries + attn(q, k, keys)
    queries = norm(queries)

    hs_ref[0] = queries
    keys_ref[0] = keys


def _upscale_kernel(src_ref, w1_ref, b1_ref, lnw_ref, lnb_ref, w2_ref, b2_ref, out_ref):
    """output_upscaling: convT2x2s2 -> LN2d -> GELU -> convT2x2s2 -> GELU.  The
    2x2-of-2x2 tap results are scattered straight into a spatially laid-out output
    block with static-index stores (no gather matrices, no host transpose)."""
    src = src_ref[0]                                      # (H*W, C)
    c4 = lnw_ref.shape[1]
    c8 = w2_ref.shape[1] // 4
    Hs = out_ref.shape[1]
    Ws = out_ref.shape[3]
    lnw = lnw_ref[...]
    lnb = lnb_ref[...]
    w2 = w2_ref[...]
    b2 = b2_ref[...]

    y1 = _mm(src, w1_ref[...]) + b1_ref[...]              # (HW, 4*c4), grouped by tap1
    for t1h in range(2):
        for t1w in range(2):
            t1 = t1h * 2 + t1w
            g = _gelu(_ln(y1[:, t1 * c4:(t1 + 1) * c4], lnw, lnb, 1e-6))
            y2 = _gelu(_mm(g, w2) + b2)                   # (HW, 4*c8), grouped by tap2
            for t2h in range(2):
                for t2w in range(2):
                    t2 = t2h * 2 + t2w
                    a = 2 * t1h + t2h
                    b = 2 * t1w + t2w
                    out_ref[0, :, a, :, b * c8:(b + 1) * c8] = (
                        y2[:, t2 * c8:(t2 + 1) * c8].reshape(Hs, Ws, c8))


def _heads_kernel(hs_ref, up_ref, hq_ref, vec_ref,
                  mf_w1_ref, mf_w2_ref,
                  hw0_ref, hw1_ref, hw2_ref, hb0_ref, hb1_ref, hb2_ref,
                  iw1_ref, iw2_ref, iw3_ref,
                  msam_ref, mhq_ref, iou_ref):
    """embedding_maskfeature (both 3x3 convs via shifted in-VMEM reads) + hq add,
    batched hypernetwork MLPs, IoU head, and both hyper-mask products."""
    vecs = vec_ref[...]

    def vrow(i, w):
        return vecs[i:i + 1, :w]

    C4 = mf_w1_ref.shape[1]
    C8 = mf_w2_ref.shape[1]
    x = up_ref[0]                                         # (4H, 4W, C8) spatial
    Hh, Ww = x.shape[0], x.shape[1]
    HWf = Hh * Ww
    up_flat = x.reshape(HWf, C8)

    # ---- conv1 3x3 (C8 -> C4) + LN2d + GELU, shifted reads instead of im2col ----
    mf_w1 = mf_w1_ref[...]
    acc = jnp.zeros((HWf, C4), jnp.float32)
    for kh in range(3):
        for kw in range(3):
            t = kh * 3 + kw
            xs = _shift2d(x, kh - 1, kw - 1).reshape(HWf, C8)
            acc = acc + _mm(xs, mf_w1[t * C8:(t + 1) * C8, :])
    y = _gelu(_ln(acc + vrow(0, C4), vrow(1, C4), vrow(2, C4), 1e-6))

    # ---- conv2 3x3 (C4 -> C8) + hq residual ----
    mf_w2 = mf_w2_ref[...]
    y3 = y.reshape(Hh, Ww, C4)
    acc2 = jnp.zeros((HWf, C8), jnp.float32)
    for kh in range(3):
        for kw in range(3):
            t = kh * 3 + kw
            ys = _shift2d(y3, kh - 1, kw - 1).reshape(HWf, C4)
            acc2 = acc2 + _mm(ys, mf_w2[t * C4:(t + 1) * C4, :])
    up_hq = acc2 + vrow(3, C8) + hq_ref[0].reshape(HWf, C8)

    # ---- hypernetwork MLPs, batched over the 5 mask tokens (stacked weights) ----
    hs = hs_ref[0]                                        # (Nq, C)
    toks3 = jnp.stack([hs[1 + i:2 + i, :] for i in range(NUM_MASK_TOKENS)], axis=0)
    h = jnp.einsum('tmc,tcd->tmd', _bf(toks3), _bf(hw0_ref[...]),
                   preferred_element_type=jnp.float32) + hb0_ref[...]
    h = _relu(h)
    h = jnp.einsum('tmc,tcd->tmd', _bf(h), _bf(hw1_ref[...]),
                   preferred_element_type=jnp.float32) + hb1_ref[...]
    h = _relu(h)
    h = jnp.einsum('tmc,tcd->tmd', _bf(h), _bf(hw2_ref[...]),
                   preferred_element_type=jnp.float32) + hb2_ref[...]
    hyper = jnp.concatenate([h[i] for i in range(NUM_MASK_TOKENS)], axis=0)  # (5, C8)

    # ---- mask products (lane-dense (tokens, 16HW) outputs) ----
    msam_ref[0] = jax.lax.dot_general(_bf(hyper[:NUM_MASK_TOKENS - 1, :]), _bf(up_flat),
                                      (((1,), (1,)), ((), ())),
                                      preferred_element_type=jnp.float32)
    mhq_ref[0] = jax.lax.dot_general(_bf(hyper[NUM_MASK_TOKENS - 1:, :]), _bf(up_hq),
                                     (((1,), (1,)), ((), ())),
                                     preferred_element_type=jnp.float32)

    # ---- IoU prediction head ----
    t = _relu(_mm(hs[0:1, :], iw1_ref[...]) + vrow(4, IOU_HIDDEN))
    t = _relu(_mm(t, iw2_ref[...]) + vrow(5, IOU_HIDDEN))
    iou_ref[0] = _mm(t, iw3_ref[...]) + vrow(6, NUM_MASK_TOKENS)


def _resize_kernel(x_ref, a_ref, b_ref, o_ref):
    # full mask_postprocessing for one mask and one output-row block: A_blk @ X @ B
    y = _mm(a_ref[...], x_ref[0])
    o_ref[0] = _mm(y, b_ref[...])


# ------------------------------ kernel wrappers ---------------------------------


def _pack_transformer(tp):
    mats, vecs = [], []

    def add_attn(ap):
        mats.extend([ap["qkv_w"], ap["out_w"]])
        vecs.extend([ap["qkv_b"], ap["out_b"]])

    def add_norm(p):
        vecs.extend([p["w"], p["b"]])

    for lp in tp["layers"]:
        add_attn(lp["self_attn"])
        add_norm(lp["norm1"])
        add_attn(lp["cross_t2i"])
        add_norm(lp["norm2"])
        mats.extend([lp["mlp"]["lin1"]["w"], lp["mlp"]["lin2"]["w"]])
        vecs.extend([lp["mlp"]["lin1"]["b"], lp["mlp"]["lin2"]["b"]])
        add_norm(lp["norm3"])
        add_attn(lp["cross_i2t"])
        add_norm(lp["norm4"])
    add_attn(tp["final_attn"])
    add_norm(tp["norm_final"])
    return mats, _pack_rows(vecs)


def two_way_transformer_fused(tparams, tokens, src0, pos):
    B_, Nq, Cd = tokens.shape
    Nk = src0.shape[0]
    mats, vec_pack = _pack_transformer(tparams)
    kernel = functools.partial(_two_way_kernel, n_mats=len(mats))
    hs, keys = pl.pallas_call(
        kernel, grid=(B_,),
        in_specs=[_batch_spec(tokens), _const_spec(src0), _const_spec(pos),
                  _const_spec(vec_pack)] + [_const_spec(m) for m in mats],
        out_specs=[pl.BlockSpec((1, Nq, Cd), lambda i: (i, 0, 0)),
                   pl.BlockSpec((1, Nk, Cd), lambda i: (i, 0, 0))],
        out_shape=[jax.ShapeDtypeStruct((B_, Nq, Cd), jnp.float32),
                   jax.ShapeDtypeStruct((B_, Nk, Cd), jnp.float32)],
        compiler_params=_parallel(),
    )(tokens, src0, pos, vec_pack, *mats)
    return hs, keys


def upscale_fused(up, src_out):
    B_ = src_out.shape[0]
    c8 = up["w2"].shape[1] // 4
    args = (src_out, up["w1"], up["b1"], up["ln"]["w"], up["ln"]["b"], up["w2"], up["b2"])
    y = pl.pallas_call(
        _upscale_kernel, grid=(B_,),
        in_specs=[_batch_spec(src_out)] + [_const_spec(a) for a in args[1:]],
        out_specs=pl.BlockSpec((1, H, 4, W, 4 * c8), lambda i: (i, 0, 0, 0, 0)),
        out_shape=jax.ShapeDtypeStruct((B_, H, 4, W, 4 * c8), jnp.float32),
        compiler_params=_parallel(),
    )(*args)
    # row-major (H, 4, W, 4*C8) is bit-identical to (4H, 4W, C8): free metadata reshape
    return y.reshape(B_, 4 * H, 4 * W, c8)


def heads_fused(hp, mf, hs, up_sam, hq_sp):
    B_ = hs.shape[0]
    HWf = up_sam.shape[1] * up_sam.shape[2]
    vec_pack = _pack_rows([mf["b1"], mf["ln"]["w"], mf["ln"]["b"], mf["b2"],
                           hp["iou"][0]["b"], hp["iou"][1]["b"], hp["iou"][2]["b"]])
    mats = [mf["w1"], mf["w2"],
            hp["hyp_w0"], hp["hyp_w1"], hp["hyp_w2"],
            hp["hyp_b0"], hp["hyp_b1"], hp["hyp_b2"],
            hp["iou"][0]["w"], hp["iou"][1]["w"], hp["iou"][2]["w"]]
    out_shapes = [jax.ShapeDtypeStruct((B_, NUM_MASK_TOKENS - 1, HWf), jnp.float32),
                  jax.ShapeDtypeStruct((B_, 1, HWf), jnp.float32),
                  jax.ShapeDtypeStruct((B_, 1, NUM_MASK_TOKENS), jnp.float32)]
    out_specs = [pl.BlockSpec((1, NUM_MASK_TOKENS - 1, HWf), lambda i: (i, 0, 0)),
                 pl.BlockSpec((1, 1, HWf), lambda i: (i, 0, 0)),
                 pl.BlockSpec((1, 1, NUM_MASK_TOKENS), lambda i: (i, 0, 0))]
    return pl.pallas_call(
        _heads_kernel, grid=(B_,),
        in_specs=[_batch_spec(hs), _batch_spec(up_sam), _const_spec(hq_sp),
                  _const_spec(vec_pack)] + [_const_spec(m) for m in mats],
        out_specs=out_specs, out_shape=out_shapes,
        compiler_params=_parallel(),
    )(hs, up_sam, hq_sp, vec_pack, *mats)


def mask_postprocessing(masks, orig_im_size):
    # TODO(synk): orig_im_size drives data-dependent output shapes; treated as static host ints.
    B_, M_, h0, w0 = masks.shape
    oh, ow = int(orig_im_size[0]), int(orig_im_size[1])
    ph, pw = (int(v) for v in resize_longest_image_size(orig_im_size, IMG_SIZE))
    # interpolate(IMG_SIZE) -> crop -> interpolate(orig) are linear; compose into one
    # left/right matrix pair so postprocessing is a single matmul sandwich.
    R1h = _bilinear_matrix(h0, IMG_SIZE)
    R1w = _bilinear_matrix(w0, IMG_SIZE)
    R2h = _bilinear_matrix(ph, oh)
    R2w = _bilinear_matrix(pw, ow)
    A = jnp.asarray(R2h @ R1h[:ph, :])                  # (oh, h0)
    Bm = jnp.asarray(R1w[:pw, :].T @ R2w.T)             # (w0, ow)
    x = masks.reshape(B_ * M_, h0, w0)
    th = _row_tile(oh)                                  # tile output rows (v5e VMEM / v7x 2nd TC)
    out = pl.pallas_call(
        _resize_kernel, grid=(B_ * M_, oh // th),
        in_specs=[pl.BlockSpec((1, h0, w0), lambda i, r: (i, 0, 0)),
                  pl.BlockSpec((th, h0), lambda i, r: (r, 0)),
                  _const_spec(Bm)],
        out_specs=pl.BlockSpec((1, th, ow), lambda i, r: (i, r, 0)),
        out_shape=jax.ShapeDtypeStruct((B_ * M_, oh, ow), jnp.float32),
        compiler_params=pltpu.CompilerParams(
            dimension_semantics=("parallel", "parallel")),
    )(x, A, Bm)
    return out.reshape(B_, M_, oh, ow)


# ------------------------------- JAX glue ----------------------------------------


def pe_encode(coords01, gauss):
    # TODO(synk): K=2 Fourier projection + sin/cos kept as plain-JAX glue (tiny).
    t = jnp.dot(2.0 * coords01 - 1.0, gauss) * (2.0 * np.pi)
    return jnp.concatenate([jnp.sin(t), jnp.cos(t)], axis=-1)


# ------------------------------ top level forward --------------------------------


def sam_onnx_forward(params, image_embeddings, interm_embeddings, hq_features,
                     point_coords, point_labels, mask_input, has_mask_input, orig_im_size):
    assert interm_embeddings is None, "interm_embeddings is deprecated"
    B_, npts, _ = point_coords.shape
    C8 = C // 8

    # ---- glue: positional encodings for points and the dense grid ----
    coords = (point_coords.reshape(-1, 2) + 0.5) / float(IMG_SIZE)
    pe_pts = pe_encode(coords, params["pe_gaussian"])                       # (P, C)
    ys = (jnp.arange(H, dtype=jnp.float32) + 0.5) / H
    xs = (jnp.arange(W, dtype=jnp.float32) + 0.5) / W
    grid01 = jnp.stack([jnp.broadcast_to(xs[None, :], (H, W)),
                        jnp.broadcast_to(ys[:, None], (H, W))], axis=-1).reshape(H * W, 2)
    pos = pe_encode(grid01, params["pe_gaussian"])                          # (H*W, C)

    # ---- glue: small input relayouts (raw inputs only; no activation im2col) ----
    m = mask_input.reshape(4 * H, 4 * W)
    patches16 = (m.reshape(H, 2, 2, W, 2, 2)
                  .transpose(0, 3, 1, 4, 2, 5)
                  .reshape(H * W, 16))                                      # 4x4 patch rows
    img_seq = jnp.transpose(image_embeddings, (0, 2, 3, 1)).reshape(H * W, C)
    hq_sp = jnp.transpose(hq_features, (0, 2, 3, 1))                        # (1, 4H, 4W, C8)
    labels = point_labels.reshape(-1, 1).astype(jnp.float32)
    hm = has_mask_input.reshape(1, 1).astype(jnp.float32)

    # ---- Pallas #1: prompt encoder (points + fused mask_downscaling) ----
    md = params["md"]
    args = (pe_pts, labels, params["not_a_point_embed"], params["point_embeddings"],
            patches16, md["w1"], md["b1"], md["ln1"]["w"], md["ln1"]["b"],
            md["w2"], md["b2"], md["ln2"]["w"], md["ln2"]["b"],
            md["w3"], md["b3"], params["no_mask_embed"], hm, img_seq)
    sparse, src0 = pl.pallas_call(
        _prompt_kernel, grid=(1,),
        in_specs=[_const_spec(a) for a in args],
        out_specs=[pl.BlockSpec(tuple(pe_pts.shape), lambda i: (0, 0)),
                   pl.BlockSpec((H * W, C), lambda i: (0, 0))],
        out_shape=[jax.ShapeDtypeStruct(tuple(pe_pts.shape), jnp.float32),
                   jax.ShapeDtypeStruct((H * W, C), jnp.float32)],
    )(*args)

    # ---- glue: decoder tokens ----
    output_tokens = jnp.concatenate(
        [params["iou_token"], params["mask_tokens"], params["hf_token"]], axis=0)
    ntok = output_tokens.shape[0]
    tokens = jnp.concatenate(
        [jnp.broadcast_to(output_tokens[None], (B_, ntok, C)),
         sparse.reshape(B_, npts, C)], axis=1)

    # ---- Pallas #2: fused two-way transformer ----
    hs, src_out = two_way_transformer_fused(params["transformer"], tokens, src0, pos)

    # ---- Pallas #3: fused output_upscaling (spatial layout emitted in-kernel) ----
    up_sam = upscale_fused(params["up"], src_out)                           # (B, 4H, 4W, C8)

    # ---- Pallas #4: fused embedding_maskfeature convs + hq add + heads ----
    msam, mhq, iou3 = heads_fused(params["heads"], params["mf"], hs, up_sam, hq_sp)
    iou_pred = iou3[:, 0, :]                                                # (B, 5)
    masks_sam = msam.reshape(B_, NUM_MASK_TOKENS - 1, 4 * H, 4 * W)
    masks_hq = mhq.reshape(B_, 1, 4 * H, 4 * W)

    if MULTIMASK_OUTPUT:
        lq_masks = masks_sam[:, 1:NUM_MASK_TOKENS - 1]
        lq_scores = iou_pred[:, 1:NUM_MASK_TOKENS - 1]
    else:
        lq_masks = masks_sam[:, 0:1]
        lq_scores = iou_pred[:, 0:1]
    hq_masks = masks_hq
    hq_scores = iou_pred[:, NUM_MASK_TOKENS - 1:NUM_MASK_TOKENS]

    masks, scores = hq_masks, hq_scores
    if not HQ_TOKEN_ONLY:
        if MULTIMASK_OUTPUT:
            max_idx = jnp.argmax(lq_scores, axis=1)
            lq_scores = jnp.max(lq_scores, axis=1, keepdims=True)
            lq_masks_sam = jnp.take_along_axis(lq_masks, max_idx[:, None, None, None], axis=1)
        else:
            lq_masks_sam = lq_masks
        masks = jnp.concatenate([lq_masks_sam, masks], axis=1)
        scores = jnp.concatenate([lq_scores, scores], axis=1)

    # ---- Pallas #5: fused + row-tiled mask_postprocessing ----
    upscaled_masks = mask_postprocessing(masks, orig_im_size)
    return upscaled_masks, scores, masks


# ------------------------------ parameter init -----------------------------------


def init_params(key):
    keys = iter(jax.random.split(key, 512))
    nk = lambda: next(keys)

    def mat(din, dout, scale=0.08):
        return jax.random.normal(nk(), (din, dout), jnp.float32) * scale

    def vec(d, scale=0.01):
        return jax.random.normal(nk(), (1, d), jnp.float32) * scale

    def lnp(d):
        return {"w": jnp.ones((1, d), jnp.float32), "b": jnp.zeros((1, d), jnp.float32)}

    def attnp(dim, downsample=1):
        internal = dim // downsample
        # q/k/v projections packed column-wise: [Wq | Wk | Wv]
        return {"qkv_w": mat(dim, 3 * internal), "qkv_b": vec(3 * internal),
                "out_w": mat(internal, dim), "out_b": vec(dim)}

    def lin(din, dout):
        return {"w": mat(din, dout), "b": vec(dout)}

    layers = []
    for _ in range(2):
        layers.append({
            "self_attn": attnp(C, 1), "norm1": lnp(C),
            "cross_t2i": attnp(C, ATTN_DOWNSAMPLE), "norm2": lnp(C),
            "mlp": {"lin1": lin(C, MLP_DIM), "lin2": lin(MLP_DIM, C)}, "norm3": lnp(C),
            "cross_i2t": attnp(C, ATTN_DOWNSAMPLE), "norm4": lnp(C),
        })

    c4, c8, m4 = C // 4, C // 8, MASK_IN_CHANS // 4
    # ConvTranspose2d biases are per-output-channel -> tied across the 4 taps.
    upb1 = jax.random.normal(nk(), (1, c4), jnp.float32) * 0.01
    upb2 = jax.random.normal(nk(), (1, c8), jnp.float32) * 0.01

    def hyp_stack(din, dout):
        # weights/biases for the 4 SAM hyper MLPs + hf MLP, stacked for batched dots
        return (jax.random.normal(nk(), (NUM_MASK_TOKENS, din, dout), jnp.float32) * 0.08,
                jax.random.normal(nk(), (NUM_MASK_TOKENS, 1, dout), jnp.float32) * 0.01)

    hw0, hb0 = hyp_stack(C, C)
    hw1, hb1 = hyp_stack(C, C)
    hw2, hb2 = hyp_stack(C, c8)

    return {
        # prompt encoder
        "pe_gaussian": jax.random.normal(nk(), (2, C // 2), jnp.float32),
        "point_embeddings": jax.random.normal(nk(), (NUM_POINT_EMB, C), jnp.float32) * 0.5,
        "not_a_point_embed": jax.random.normal(nk(), (1, C), jnp.float32) * 0.5,
        "no_mask_embed": jax.random.normal(nk(), (1, C), jnp.float32) * 0.5,
        # mask_downscaling: Conv2x2s2(1->4)/LN/GELU/Conv2x2s2(4->16)/LN/GELU/Conv1x1(16->C)
        # conv weights stored directly in (kh,kw,ci)->co matmul layout.
        "md": {"w1": mat(4, m4), "b1": vec(m4), "ln1": lnp(m4),
               "w2": mat(4 * m4, MASK_IN_CHANS), "b2": vec(MASK_IN_CHANS),
               "ln2": lnp(MASK_IN_CHANS), "w3": mat(MASK_IN_CHANS, C), "b3": vec(C)},
        # mask decoder HQ tokens
        "iou_token": jax.random.normal(nk(), (1, C), jnp.float32) * 0.5,
        "mask_tokens": jax.random.normal(nk(), (NUM_MASK_TOKENS - 1, C), jnp.float32) * 0.5,
        "hf_token": jax.random.normal(nk(), (1, C), jnp.float32) * 0.5,
        "transformer": {"layers": layers, "final_attn": attnp(C, ATTN_DOWNSAMPLE),
                        "norm_final": lnp(C)},
        # output_upscaling: ConvT2x2s2(C->C/4)/LN2d/GELU/ConvT2x2s2(C/4->C/8)/GELU
        # convT weights stored as ci -> (kh,kw,co) (tap-major) matmul layout.
        "up": {"w1": mat(C, 4 * c4), "b1": jnp.tile(upb1, (1, 4)), "ln": lnp(c4),
               "w2": mat(c4, 4 * c8), "b2": jnp.tile(upb2, (1, 4))},
        # embedding_maskfeature: Conv3x3(C/8->C/4)/LN2d/GELU/Conv3x3(C/4->C/8)
        "mf": {"w1": mat(9 * c8, c4), "b1": vec(c4), "ln": lnp(c4),
               "w2": mat(9 * c4, c8), "b2": vec(c8)},
        # hypernetwork MLPs (stacked), IoU prediction head
        "heads": {"hyp_w0": hw0, "hyp_w1": hw1, "hyp_w2": hw2,
                  "hyp_b0": hb0, "hyp_b1": hb1, "hyp_b2": hb2,
                  "iou": [lin(C, IOU_HIDDEN), lin(IOU_HIDDEN, IOU_HIDDEN),
                          lin(IOU_HIDDEN, NUM_MASK_TOKENS)]},
    }


# ------------------------------------ main ----------------------------------------

if __name__ == "__main__":
    key = jax.random.PRNGKey(0)
    pkey, ikey = jax.random.split(key)
    params = init_params(pkey)

    ks = jax.random.split(ikey, 4)
    Bp, npts = 2, 3
    image_embeddings = jax.random.normal(ks[0], (1, C, H, W), jnp.float32)
    hq_features = jax.random.normal(ks[1], (1, C // 8, 4 * H, 4 * W), jnp.float32)
    point_coords = jax.random.uniform(ks[2], (Bp, npts, 2), jnp.float32, 0.0, float(IMG_SIZE))
    point_labels = jnp.array([[1.0, 0.0, -1.0], [1.0, 2.0, -1.0]], jnp.float32)
    mask_input = jax.random.normal(ks[3], (1, 1, 4 * H, 4 * W), jnp.float32)
    has_mask_input = jnp.ones((1,), jnp.float32)
    orig_im_size = (120, 90)          # static host value (see TODO in mask_postprocessing)

    upscaled_masks, scores, masks = sam_onnx_forward(
        params, image_embeddings, None, hq_features, point_coords, point_labels,
        mask_input, has_mask_input, orig_im_size)
    jax.block_until_ready((upscaled_masks, scores, masks))

    assert upscaled_masks.shape == (Bp, 2, orig_im_size[0], orig_im_size[1])
    assert scores.shape == (Bp, 2)
    assert masks.shape == (Bp, 2, 4 * H, 4 * W)
    print("KERNEL_OK")
</pallas_src>

<mosaic_0001>
module attributes {stable_mosaic.version = 11 : i64} {
  func.func @_prompt_kernel(%arg0: i32, %arg1: memref<6x32xf32, #tpu.memory_space<vmem>>, %arg2: memref<6x1xf32, #tpu.memory_space<vmem>>, %arg3: memref<1x32xf32, #tpu.memory_space<vmem>>, %arg4: memref<4x32xf32, #tpu.memory_space<vmem>>, %arg5: memref<64x16xf32, #tpu.memory_space<vmem>>, %arg6: memref<4x4xf32, #tpu.memory_space<vmem>>, %arg7: memref<1x4xf32, #tpu.memory_space<vmem>>, %arg8: memref<1x4xf32, #tpu.memory_space<vmem>>, %arg9: memref<1x4xf32, #tpu.memory_space<vmem>>, %arg10: memref<16x16xf32, #tpu.memory_space<vmem>>, %arg11: memref<1x16xf32, #tpu.memory_space<vmem>>, %arg12: memref<1x16xf32, #tpu.memory_space<vmem>>, %arg13: memref<1x16xf32, #tpu.memory_space<vmem>>, %arg14: memref<16x32xf32, #tpu.memory_space<vmem>>, %arg15: memref<1x32xf32, #tpu.memory_space<vmem>>, %arg16: memref<1x32xf32, #tpu.memory_space<vmem>>, %arg17: memref<1x1xf32, #tpu.memory_space<vmem>>, %arg18: memref<64x32xf32, #tpu.memory_space<vmem>>, %arg19: memref<6x32xf32, #tpu.memory_space<vmem>>, %arg20: memref<64x32xf32, #tpu.memory_space<vmem>>) attributes {dimension_semantics = [#tpu.dimension_semantics<arbitrary>], iteration_bounds = array<i64: 1>, scalar_prefetch = 0 : i64, scratch_operands = 0 : i64, tpu.core_type = #tpu.core_type<tc>, window_params = [{pipeline_mode = #tpu.pipeline_mode<synchronous>, transform_indices = @transform_0, window_bounds = array<i64: 6, 32>}, {pipeline_mode = #tpu.pipeline_mode<synchronous>, transform_indices = @transform_1, window_bounds = array<i64: 6, 1>}, {pipeline_mode = #tpu.pipeline_mode<synchronous>, transform_indices = @transform_2, window_bounds = array<i64: 1, 32>}, {pipeline_mode = #tpu.pipeline_mode<synchronous>, transform_indices = @transform_3, window_bounds = array<i64: 4, 32>}, {pipeline_mode = #tpu.pipeline_mode<synchronous>, transform_indices = @transform_4, window_bounds = array<i64: 64, 16>}, {pipeline_mode = #tpu.pipeline_mode<synchronous>, transform_indices = @transform_5, window_bounds = array<i64: 4, 4>}, {pipeline_mode = #tpu.pipeline_mode<synchronous>, transform_indices = @transform_6, window_bounds = array<i64: 1, 4>}, {pipeline_mode = #tpu.pipeline_mode<synchronous>, transform_indices = @transform_7, window_bounds = array<i64: 1, 4>}, {pipeline_mode = #tpu.pipeline_mode<synchronous>, transform_indices = @transform_8, window_bounds = array<i64: 1, 4>}, {pipeline_mode = #tpu.pipeline_mode<synchronous>, transform_indices = @transform_9, window_bounds = array<i64: 16, 16>}, {pipeline_mode = #tpu.pipeline_mode<synchronous>, transform_indices = @transform_10, window_bounds = array<i64: 1, 16>}, {pipeline_mode = #tpu.pipeline_mode<synchronous>, transform_indices = @transform_11, window_bounds = array<i64: 1, 16>}, {pipeline_mode = #tpu.pipeline_mode<synchronous>, transform_indices = @transform_12, window_bounds = array<i64: 1, 16>}, {pipeline_mode = #tpu.pipeline_mode<synchronous>, transform_indices = @transform_13, window_bounds = array<i64: 16, 32>}, {pipeline_mode = #tpu.pipeline_mode<synchronous>, transform_indices = @transform_14, window_bounds = array<i64: 1, 32>}, {pipeline_mode = #tpu.pipeline_mode<synchronous>, transform_indices = @transform_15, window_bounds = array<i64: 1, 32>}, {pipeline_mode = #tpu.pipeline_mode<synchronous>, transform_indices = @transform_16, window_bounds = array<i64: 1, 1>}, {pipeline_mode = #tpu.pipeline_mode<synchronous>, transform_indices = @transform_17, window_bounds = array<i64: 64, 32>}, {pipeline_mode = #tpu.pipeline_mode<synchronous>, transform_indices = @transform_18, window_bounds = array<i64: 6, 32>}, {pipeline_mode = #tpu.pipeline_mode<synchronous>, transform_indices = @transform_19, window_bounds = array<i64: 64, 32>}]} {
    %c0 = arith.constant 0 : index
    %c0_0 = arith.constant 0 : index
    %0 = vector.load %arg1[%c0, %c0_0] : memref<6x32xf32, #tpu.memory_space<vmem>>, vector<6x32xf32>
    %c0_1 = arith.constant 0 : index
    %c0_2 = arith.constant 0 : index
    %1 = vector.load %arg2[%c0_1, %c0_2] : memref<6x1xf32, #tpu.memory_space<vmem>>, vector<6x1xf32>
    %cst = arith.constant -1.000000e+00 : f32
    %2 = vector.broadcast %cst : f32 to vector<6x1xf32>
    %3 = arith.cmpf one, %1, %2 : vector<6x1xf32>
    %4 = arith.extui %3 : vector<6x1xi1> to vector<6x1xi32>
    %5 = arith.sitofp %4 : vector<6x1xi32> to vector<6x1xf32>
    %6 = vector.broadcast %5 : vector<6x1xf32> to vector<6x32xf32>
    %7 = arith.mulf %0, %6 : vector<6x32xf32>
    %c0_3 = arith.constant 0 : index
    %c0_4 = arith.constant 0 : index
    %8 = vector.load %arg3[%c0_3, %c0_4] : memref<1x32xf32, #tpu.memory_space<vmem>>, vector<1x32xf32>
    %cst_5 = arith.constant -1.000000e+00 : f32
    %9 = vector.broadcast %cst_5 : f32 to vector<6x1xf32>
    %10 = arith.cmpf oeq, %1, %9 : vector<6x1xf32>
    %11 = arith.extui %10 : vector<6x1xi1> to vector<6x1xi32>
    %12 = arith.sitofp %11 : vector<6x1xi32> to vector<6x1xf32>
    %13 = vector.broadcast %8 : vector<1x32xf32> to vector<6x32xf32>
    %14 = vector.broadcast %12 : vector<6x1xf32> to vector<6x32xf32>
    %15 = arith.mulf %13, %14 : vector<6x32xf32>
    %16 = arith.addf %7, %15 : vector<6x32xf32>
    %c0_6 = arith.constant 0 : index
    %c0_7 = arith.constant 0 : index
    %17 = vector.load %arg4[%c0_6, %c0_7] : memref<4x32xf32, #tpu.memory_space<vmem>>, vector<4x32xf32>
    %18 = vector.extract_strided_slice %17 {offsets = [0, 0], sizes = [1, 32], strides = [1, 1]} : vector<4x32xf32> to vector<1x32xf32>
    %cst_8 = arith.constant 0.000000e+00 : f32
    %19 = vector.broadcast %cst_8 : f32 to vector<6x1xf32>
    %20 = arith.cmpf oeq, %1, %19 : vector<6x1xf32>
    %21 = arith.extui %20 : vector<6x1xi1> to vector<6x1xi32>
    %22 = arith.sitofp %21 : vector<6x1xi32> to vector<6x1xf32>
    %23 = vector.broadcast %18 : vector<1x32xf32> to vector<6x32xf32>
    %24 = vector.broadcast %22 : vector<6x1xf32> to vector<6x32xf32>
    %25 = arith.mulf %23, %24 : vector<6x32xf32>
    %26 = arith.addf %16, %25 : vector<6x32xf32>
    %27 = vector.extract_strided_slice %17 {offsets = [1, 0], sizes = [1, 32], strides = [1, 1]} : vector<4x32xf32> to vector<1x32xf32>
    %cst_9 = arith.constant 1.000000e+00 : f32
    %28 = vector.broadcast %cst_9 : f32 to vector<6x1xf32>
    %29 = arith.cmpf oeq, %1, %28 : vector<6x1xf32>
    %30 = arith.extui %29 : vector<6x1xi1> to vector<6x1xi32>
    %31 = arith.sitofp %30 : vector<6x1xi32> to vector<6x1xf32>
    %32 = vector.broadcast %27 : vector<1x32xf32> to vector<6x32xf32>
    %33 = vector.broadcast %31 : vector<6x1xf32> to vector<6x32xf32>
    %34 = arith.mulf %32, %33 : vector<6x32xf32>
    %35 = arith.addf %26, %34 : vector<6x32xf32>
    %36 = vector.extract_strided_slice %17 {offsets = [2, 0], sizes = [1, 32], strides = [1, 1]} : vector<4x32xf32> to vector<1x32xf32>
    %cst_10 = arith.constant 2.000000e+00 : f32
    %37 = vector.broadcast %cst_10 : f32 to vector<6x1xf32>
    %38 = arith.cmpf oeq, %1, %37 : vector<6x1xf32>
    %39 = arith.extui %38 : vector<6x1xi1> to vector<6x1xi32>
    %40 = arith.sitofp %39 : vector<6x1xi32> to vector<6x1xf32>
    %41 = vector.broadcast %36 : vector<1x32xf32> to vector<6x32xf32>
    %42 = vector.broadcast %40 : vector<6x1xf32> to vector<6x32xf32>
    %43 = arith.mulf %41, %42 : vector<6x32xf32>
    %44 = arith.addf %35, %43 : vector<6x32xf32>
    %45 = vector.extract_strided_slice %17 {offsets = [3, 0], sizes = [1, 32], strides = [1, 1]} : vector<4x32xf32> to vector<1x32xf32>
    %cst_11 = arith.constant 3.000000e+00 : f32
    %46 = vector.broadcast %cst_11 : f32 to vector<6x1xf32>
    %47 = arith.cmpf oeq, %1, %46 : vector<6x1xf32>
    %48 = arith.extui %47 : vector<6x1xi1> to vector<6x1xi32>
    %49 = arith.sitofp %48 : vector<6x1xi32> to vector<6x1xf32>
    %50 = vector.broadcast %45 : vector<1x32xf32> to vector<6x32xf32>
    %51 = vector.broadcast %49 : vector<6x1xf32> to vector<6x32xf32>
    %52 = arith.mulf %50, %51 : vector<6x32xf32>
    %53 = arith.addf %44, %52 : vector<6x32xf32>
    %c0_12 = arith.constant 0 : index
    %c0_13 = arith.constant 0 : index
    %54 = vector.load %arg19[%c0_12, %c0_13] : memref<6x32xf32, #tpu.memory_space<vmem>>, vector<6x32xf32>
    tpu.vector_store %arg19[%c0_12, %c0_13], %53 {strides = array<i32>} : memref<6x32xf32, #tpu.memory_space<vmem>>, vector<6x32xf32>,
    %c0_14 = arith.constant 0 : index
    %c0_15 = arith.constant 0 : index
    %55 = vector.load %arg5[%c0_14, %c0_15] : memref<64x16xf32, #tpu.memory_space<vmem>>, vector<64x16xf32>
    %c0_16 = arith.constant 0 : index
    %c0_17 = arith.constant 0 : index
    %56 = vector.load %arg6[%c0_16, %c0_17] : memref<4x4xf32, #tpu.memory_space<vmem>>, vector<4x4xf32>
    %c0_18 = arith.constant 0 : index
    %c0_19 = arith.constant 0 : index
    %57 = vector.load %arg10[%c0_18, %c0_19] : memref<16x16xf32, #tpu.memory_space<vmem>>, vector<16x16xf32>
    %58 = vector.extract_strided_slice %55 {offsets = [0, 0], sizes = [64, 4], strides = [1, 1]} : vector<64x16xf32> to vector<64x4xf32>
    %59 = arith.truncf %58 : vector<64x4xf32> to vector<64x4xbf16>
    %60 = arith.truncf %56 : vector<4x4xf32> to vector<4x4xbf16>
    %cst_20 = arith.constant dense<0.000000e+00> : vector<64x4xf32>
    %61 = tpu.matmul %59, %60, %cst_20 {dimension_numbers = #tpu.dot_dimension_numbers<[1], [0], [0], [1], [0, 0, 1, 1], [], []>} : vector<64x4xbf16>, vector<4x4xbf16>, vector<64x4xf32> -> vector<64x4xf32>
    %c0_21 = arith.constant 0 : index
    %c0_22 = arith.constant 0 : index
    %62 = vector.load %arg7[%c0_21, %c0_22] : memref<1x4xf32, #tpu.memory_space<vmem>>, vector<1x4xf32>
    %63 = vector.broadcast %62 : vector<1x4xf32> to vector<64x4xf32>
    %64 = arith.addf %61, %63 : vector<64x4xf32>
    %c0_23 = arith.constant 0 : index
    %c0_24 = arith.constant 0 : index
    %65 = vector.load %arg8[%c0_23, %c0_24] : memref<1x4xf32, #tpu.memory_space<vmem>>, vector<1x4xf32>
    %c0_25 = arith.constant 0 : index
    %c0_26 = arith.constant 0 : index
    %66 = vector.load %arg9[%c0_25, %c0_26] : memref<1x4xf32, #tpu.memory_space<vmem>>, vector<1x4xf32>
    %cst_27 = arith.constant dense<0.000000e+00> : vector<64xf32>
    %67 = vector.multi_reduction <add>, %64, %cst_27 [1] : vector<64x4xf32> to vector<64xf32>
    %68 = vector.shape_cast %67 : vector<64xf32> to vector<64x1xf32>
    %cst_28 = arith.constant 4.000000e+00 : f32
    %69 = vector.broadcast %cst_28 : f32 to vector<64x1xf32>
    %70 = arith.divf %68, %69 : vector<64x1xf32>
    %71 = vector.broadcast %70 : vector<64x1xf32> to vector<64x4xf32>
    %72 = arith.subf %64, %71 : vector<64x4xf32>
    %73 = arith.mulf %72, %72 : vector<64x4xf32>
    %cst_29 = arith.constant dense<0.000000e+00> : vector<64xf32>
    %74 = vector.multi_reduction <add>, %73, %cst_29 [1] : vector<64x4xf32> to vector<64xf32>
    %75 = vector.shape_cast %74 : vector<64xf32> to vector<64x1xf32>
    %cst_30 = arith.constant 4.000000e+00 : f32
    %76 = vector.broadcast %cst_30 : f32 to vector<64x1xf32>
    %77 = arith.divf %75, %76 : vector<64x1xf32>
    %cst_31 = arith.constant 9.99999997E-7 : f32
    %78 = vector.broadcast %cst_31 : f32 to vector<64x1xf32>
    %79 = arith.addf %77, %78 : vector<64x1xf32>
    %80 = math.rsqrt %79 : vector<64x1xf32>
    %81 = vector.broadcast %80 : vector<64x1xf32> to vector<64x4xf32>
    %82 = arith.mulf %72, %81 : vector<64x4xf32>
    %83 = vector.broadcast %65 : vector<1x4xf32> to vector<64x4xf32>
    %84 = arith.mulf %82, %83 : vector<64x4xf32>
    %85 = vector.broadcast %66 : vector<1x4xf32> to vector<64x4xf32>
    %86 = arith.addf %84, %85 : vector<64x4xf32>
    %cst_32 = arith.constant 5.000000e-01 : f32
    %87 = vector.broadcast %cst_32 : f32 to vector<64x4xf32>
    %88 = arith.mulf %87, %86 : vector<64x4xf32>
    %cst_33 = arith.constant 0.707106769 : f32
    %89 = vector.broadcast %cst_33 : f32 to vector<64x4xf32>
    %90 = arith.mulf %86, %89 : vector<64x4xf32>
    %91 = math.absf %90 : vector<64x4xf32>
    %cst_34 = arith.constant 0.327591091 : f32
    %92 = vector.broadcast %cst_34 : f32 to vector<64x4xf32>
    %93 = arith.mulf %92, %91 : vector<64x4xf32>
    %cst_35 = arith.constant 1.000000e+00 : f32
    %94 = vector.broadcast %cst_35 : f32 to vector<64x4xf32>
    %95 = arith.addf %94, %93 : vector<64x4xf32>
    %cst_36 = arith.constant 1.000000e+00 : f32
    %96 = vector.broadcast %cst_36 : f32 to vector<64x4xf32>
    %97 = arith.divf %96, %95 : vector<64x4xf32>
    %cst_37 = arith.constant 1.06140542 : f32
    %98 = vector.broadcast %cst_37 : f32 to vector<64x4xf32>
    %99 = arith.mulf %98, %97 : vector<64x4xf32>
    %cst_38 = arith.constant 1.45315206 : f32
    %100 = vector.broadcast %cst_38 : f32 to vector<64x4xf32>
    %101 = arith.subf %99, %100 : vector<64x4xf32>
    %102 = arith.mulf %101, %97 : vector<64x4xf32>
    %cst_39 = arith.constant 1.42141378 : f32
    %103 = vector.broadcast %cst_39 : f32 to vector<64x4xf32>
    %104 = arith.addf %102, %103 : vector<64x4xf32>
    %105 = arith.mulf %104, %97 : vector<64x4xf32>
    %cst_40 = arith.constant 0.284496725 : f32
    %106 = vector.broadcast %cst_40 : f32 to vector<64x4xf32>
    %107 = arith.subf %105, %106 : vector<64x4xf32>
    %108 = arith.mulf %107, %97 : vector<64x4xf32>
    %cst_41 = arith.constant 0.254829586 : f32
    %109 = vector.broadcast %cst_41 : f32 to vector<64x4xf32>
    %110 = arith.addf %108, %109 : vector<64x4xf32>
    %111 = arith.mulf %110, %97 : vector<64x4xf32>
    %cst_42 = arith.constant 0.000000e+00 : f32
    %112 = vector.broadcast %cst_42 : f32 to vector<64x4xf32>
    %113 = arith.subf %112, %91 : vector<64x4xf32>
    %114 = arith.mulf %113, %91 : vector<64x4xf32>
    %115 = math.exp %114 : vector<64x4xf32>
    %116 = arith.mulf %111, %115 : vector<64x4xf32>
    %cst_43 = arith.constant 1.000000e+00 : f32
    %117 = vector.broadcast %cst_43 : f32 to vector<64x4xf32>
    %118 = arith.subf %117, %116 : vector<64x4xf32>
    %cst_44 = arith.constant 0.000000e+00 : f32
    %119 = vector.broadcast %cst_44 : f32 to vector<64x4xf32>
    %120 = arith.cmpf oge, %90, %119 : vector<64x4xf32>
    %cst_45 = arith.constant 0.000000e+00 : f32
    %121 = vector.broadcast %cst_45 : f32 to vector<64x4xf32>
    %122 = arith.subf %121, %118 : vector<64x4xf32>
    %123 = arith.select %120, %118, %122 : vector<64x4xi1>, vector<64x4xf32>
    %cst_46 = arith.constant 1.000000e+00 : f32
    %124 = vector.broadcast %cst_46 : f32 to vector<64x4xf32>
    %125 = arith.addf %124, %123 : vector<64x4xf32>
    %126 = arith.mulf %88, %125 : vector<64x4xf32>
    %127 = vector.extract_strided_slice %57 {offsets = [0, 0], sizes = [4, 16], strides = [1, 1]} : vector<16x16xf32> to vector<4x16xf32>
    %128 = arith.truncf %126 : vector<64x4xf32> to vector<64x4xbf16>
    %129 = arith.truncf %127 : vector<4x16xf32> to vector<4x16xbf16>
    %cst_47 = arith.constant dense<0.000000e+00> : vector<64x16xf32>
    %130 = tpu.matmul %128, %129, %cst_47 {dimension_numbers = #tpu.dot_dimension_numbers<[1], [0], [0], [1], [0, 0, 1, 1], [], []>} : vector<64x4xbf16>, vector<4x16xbf16>, vector<64x16xf32> -> vector<64x16xf32>
    %131 = vector.extract_strided_slice %55 {offsets = [0, 4], sizes = [64, 4], strides = [1, 1]} : vector<64x16xf32> to vector<64x4xf32>
    %132 = arith.truncf %131 : vector<64x4xf32> to vector<64x4xbf16>
    %133 = arith.truncf %56 : vector<4x4xf32> to vector<4x4xbf16>
    %cst_48 = arith.constant dense<0.000000e+00> : vector<64x4xf32>
    %134 = tpu.matmul %132, %133, %cst_48 {dimension_numbers = #tpu.dot_dimension_numbers<[1], [0], [0], [1], [0, 0, 1, 1], [], []>} : vector<64x4xbf16>, vector<4x4xbf16>, vector<64x4xf32> -> vector<64x4xf32>
    %c0_49 = arith.constant 0 : index
    %c0_50 = arith.constant 0 : index
    %135 = vector.load %arg7[%c0_49, %c0_50] : memref<1x4xf32, #tpu.memory_space<vmem>>, vector<1x4xf32>
    %136 = vector.broadcast %135 : vector<1x4xf32> to vector<64x4xf32>
    %137 = arith.addf %134, %136 : vector<64x4xf32>
    %c0_51 = arith.constant 0 : index
    %c0_52 = arith.constant 0 : index
    %138 = vector.load %arg8[%c0_51, %c0_52] : memref<1x4xf32, #tpu.memory_space<vmem>>, vector<1x4xf32>
    %c0_53 = arith.constant 0 : index
    %c0_54 = arith.constant 0 : index
    %139 = vector.load %arg9[%c0_53, %c0_54] : memref<1x4xf32, #tpu.memory_space<vmem>>, vector<1x4xf32>
    %cst_55 = arith.constant dense<0.000000e+00> : vector<64xf32>
    %140 = vector.multi_reduction <add>, %137, %cst_55 [1] : vector<64x4xf32> to vector<64xf32>
    %141 = vector.shape_cast %140 : vector<64xf32> to vector<64x1xf32>
    %cst_56 = arith.constant 4.000000e+00 : f32
    %142 = vector.broadcast %cst_56 : f32 to vector<64x1xf32>
    %143 = arith.divf %141, %142 : vector<64x1xf32>
    %144 = vector.broadcast %143 : vector<64x1xf32> to vector<64x4xf32>
    %145 = arith.subf %137, %144 : vector<64x4xf32>
    %146 = arith.mulf %145, %145 : vector<64x4xf32>
    %cst_57 = arith.constant dense<0.000000e+00> : vector<64xf32>
    %147 = vector.multi_reduction <add>, %146, %cst_57 [1] : vector<64x4xf32> to vector<64xf32>
    %148 = vector.shape_cast %147 : vector<64xf32> to vector<64x1xf32>
    %cst_58 = arith.constant 4.000000e+00 : f32
    %149 = vector.broadcast %cst_58 : f32 to vector<64x1xf32>
    %150 = arith.divf %148, %149 : vector<64x1xf32>
    %cst_59 = arith.constant 9.99999997E-7 : f32
    %151 = vector.broadcast %cst_59 : f32 to vector<64x1xf32>
    %152 = arith.addf %150, %151 : vector<64x1xf32>
    %153 = math.rsqrt %152 : vector<64x1xf32>
    %154 = vector.broadcast %153 : vector<64x1xf32> to vector<64x4xf32>
    %155 = arith.mulf %145, %154 : vector<64x4xf32>
    %156 = vector.broadcast %138 : vector<1x4xf32> to vector<64x4xf32>
    %157 = arith.mulf %155, %156 : vector<64x4xf32>
    %158 = vector.broadcast %139 : vector<1x4xf32> to vector<64x4xf32>
    %159 = arith.addf %157, %158 : vector<64x4xf32>
    %cst_60 = arith.constant 5.000000e-01 : f32
    %160 = vector.broadcast %cst_60 : f32 to vector<64x4xf32>
    %161 = arith.mulf %160, %159 : vector<64x4xf32>
    %cst_61 = arith.constant 0.707106769 : f32
    %162 = vector.broadcast %cst_61 : f32 to vector<64x4xf32>
    %163 = arith.mulf %159, %162 : vector<64x4xf32>
    %164 = math.absf %163 : vector<64x4xf32>
    %cst_62 = arith.constant 0.327591091 : f32
    %165 = vector.broadcast %cst_62 : f32 to vector<64x4xf32>
    %166 = arith.mulf %165, %164 : vector<64x4xf32>
    %cst_63 = arith.constant 1.000000e+00 : f32
    %167 = vector.broadcast %cst_63 : f32 to vector<64x4xf32>
    %168 = arith.addf %167, %166 : vector<64x4xf32>
    %cst_64 = arith.constant 1.000000e+00 : f32
    %169 = vector.broadcast %cst_64 : f32 to vector<64x4xf32>
    %170 = arith.divf %169, %168 : vector<64x4xf32>
    %cst_65 = arith.constant 1.06140542 : f32
    %171 = vector.broadcast %cst_65 : f32 to vector<64x4xf32>
    %172 = arith.mulf %171, %170 : vector<64x4xf32>
    %cst_66 = arith.constant 1.45315206 : f32
    %173 = vector.broadcast %cst_66 : f32 to vector<64x4xf32>
    %174 = arith.subf %172, %173 : vector<64x4xf32>
    %175 = arith.mulf %174, %170 : vector<64x4xf32>
    %cst_67 = arith.constant 1.42141378 : f32
    %176 = vector.broadcast %cst_67 : f32 to vector<64x4xf32>
    %177 = arith.addf %175, %176 : vector<64x4xf32>
    %178 = arith.mulf %177, %170 : vector<64x4xf32>
    %cst_68 = arith.constant 0.284496725 : f32
    %179 = vector.broadcast %cst_68 : f32 to vector<64x4xf32>
    %180 = arith.subf %178, %179 : vector<64x4xf32>
    %181 = arith.mulf %180, %170 : vector<64x4xf32>
    %cst_69 = arith.constant 0.254829586 : f32
    %182 = vector.broadcast %cst_69 : f32 to vector<64x4xf32>
    %183 = arith.addf %181, %182 : vector<64x4xf32>
    %184 = arith.mulf %183, %170 : vector<64x4xf32>
    %cst_70 = arith.constant 0.000000e+00 : f32
    %185 = vector.broadcast %cst_70 : f32 to vector<64x4xf32>
    %186 = arith.subf %185, %164 : vector<64x4xf32>
    %187 = arith.mulf %186, %164 : vector<64x4xf32>
    %188 = math.exp %187 : vector<64x4xf32>
    %189 = arith.mulf %184, %188 : vector<64x4xf32>
    %cst_71 = arith.constant 1.000000e+00 : f32
    %190 = vector.broadcast %cst_71 : f32 to vector<64x4xf32>
    %191 = arith.subf %190, %189 : vector<64x4xf32>
    %cst_72 = arith.constant 0.000000e+00 : f32
    %192 = vector.broadcast %cst_72 : f32 to vector<64x4xf32>
    %193 = arith.cmpf oge, %163, %192 : vector<64x4xf32>
    %cst_73 = arith.constant 0.000000e+00 : f32
    %194 = vector.broadcast %cst_73 : f32 to vector<64x4xf32>
    %195 = arith.subf %194, %191 : vector<64x4xf32>
    %196 = arith.select %193, %191, %195 : vector<64x4xi1>, vector<64x4xf32>
    %cst_74 = arith.constant 1.000000e+00 : f32
    %197 = vector.broadcast %cst_74 : f32 to vector<64x4xf32>
    %198 = arith.addf %197, %196 : vector<64x4xf32>
    %199 = arith.mulf %161, %198 : vector<64x4xf32>
    %200 = vector.extract_strided_slice %57 {offsets = [4, 0], sizes = [4, 16], strides = [1, 1]} : vector<16x16xf32> to vector<4x16xf32>
    %201 = arith.truncf %199 : vector<64x4xf32> to vector<64x4xbf16>
    %202 = arith.truncf %200 : vector<4x16xf32> to vector<4x16xbf16>
    %cst_75 = arith.constant dense<0.000000e+00> : vector<64x16xf32>
    %203 = tpu.matmul %201, %202, %cst_75 {dimension_numbers = #tpu.dot_dimension_numbers<[1], [0], [0], [1], [0, 0, 1, 1], [], []>} : vector<64x4xbf16>, vector<4x16xbf16>, vector<64x16xf32> -> vector<64x16xf32>
    %204 = arith.addf %130, %203 : vector<64x16xf32>
    %205 = vector.extract_strided_slice %55 {offsets = [0, 8], sizes = [64, 4], strides = [1, 1]} : vector<64x16xf32> to vector<64x4xf32>
    %206 = arith.truncf %205 : vector<64x4xf32> to vector<64x4xbf16>
    %207 = arith.truncf %56 : vector<4x4xf32> to vector<4x4xbf16>
    %cst_76 = arith.constant dense<0.000000e+00> : vector<64x4xf32>
    %208 = tpu.matmul %206, %207, %cst_76 {dimension_numbers = #tpu.dot_dimension_numbers<[1], [0], [0], [1], [0, 0, 1, 1], [], []>} : vector<64x4xbf16>, vector<4x4xbf16>, vector<64x4xf32> -> vector<64x4xf32>
    %c0_77 = arith.constant 0 : index
    %c0_78 = arith.constant 0 : index
    %209 = vector.load %arg7[%c0_77, %c0_78] : memref<1x4xf32, #tpu.memory_space<vmem>>, vector<1x4xf32>
    %210 = vector.broadcast %209 : vector<1x4xf32> to vector<64x4xf32>
    %211 = arith.addf %208, %210 : vector<64x4xf32>
    %c0_79 = arith.constant 0 : index
    %c0_80 = arith.constant 0 : index
    %212 = vector.load %arg8[%c0_79, %c0_80] : memref<1x4xf32, #tpu.memory_space<vmem>>, vector<1x4xf32>
    %c0_81 = arith.constant 0 : index
    %c0_82 = arith.constant 0 : index
    %213 = vector.load %arg9[%c0_81, %c0_82] : memref<1x4xf32, #tpu.memory_space<vmem>>, vector<1x4xf32>
    %cst_83 = arith.constant dense<0.000000e+00> : vector<64xf32>
    %214 = vector.multi_reduction <add>, %211, %cst_83 [1] : vector<64x4xf32> to vector<64xf32>
    %215 = vector.shape_cast %214 : vector<64xf32> to vector<64x1xf32>
    %cst_84 = arith.constant 4.000000e+00 : f32
    %216 = vector.broadcast %cst_84 : f32 to vector<64x1xf32>
    %217 = arith.divf %215, %216 : vector<64x1xf32>
    %218 = vector.broadcast %217 : vector<64x1xf32> to vector<64x4xf32>
    %219 = arith.subf %211, %218 : vector<64x4xf32>
    %220 = arith.mulf %219, %219 : vector<64x4xf32>
    %cst_85 = arith.constant dense<0.000000e+00> : vector<64xf32>
    %221 = vector.multi_reduction <add>, %220, %cst_85 [1] : vector<64x4xf32> to vector<64xf32>
    %222 = vector.shape_cast %221 : vector<64xf32> to vector<64x1xf32>
    %cst_86 = arith.constant 4.000000e+00 : f32
    %223 = vector.broadcast %cst_86 : f32 to vector<64x1xf32>
    %224 = arith.divf %222, %223 : vector<64x1xf32>
    %cst_87 = arith.constant 9.99999997E-7 : f32
    %225 = vector.broadcast %cst_87 : f32 to vector<64x1xf32>
    %226 = arith.addf %224, %225 : vector<64x1xf32>
    %227 = math.rsqrt %226 : vector<64x1xf32>
    %228 = vector.broadcast %227 : vector<64x1xf32> to vector<64x4xf32>
    %229 = arith.mulf %219, %228 : vector<64x4xf32>
    %230 = vector.broadcast %212 : vector<1x4xf32> to vector<64x4xf32>
    %231 = arith.mulf %229, %230 : vector<64x4xf32>
    %232 = vector.broadcast %213 : vector<1x4xf32> to vector<64x4xf32>
    %233 = arith.addf %231, %232 : vector<64x4xf32>
    %cst_88 = arith.constant 5.000000e-01 : f32
    %234 = vector.broadcast %cst_88 : f32 to vector<64x4xf32>
    %235 = arith.mulf %234, %233 : vector<64x4xf32>
    %cst_89 = arith.constant 0.707106769 : f32
    %236 = vector.broadcast %cst_89 : f32 to vector<64x4xf32>
    %237 = arith.mulf %233, %236 : vector<64x4xf32>
    %238 = math.absf %237 : vector<64x4xf32>
    %cst_90 = arith.constant 0.327591091 : f32
    %239 = vector.broadcast %cst_90 : f32 to vector<64x4xf32>
    %240 = arith.mulf %239, %238 : vector<64x4xf32>
    %cst_91 = arith.constant 1.000000e+00 : f32
    %241 = vector.broadcast %cst_91 : f32 to vector<64x4xf32>
    %242 = arith.addf %241, %240 : vector<64x4xf32>
    %cst_92 = arith.constant 1.000000e+00 : f32
    %243 = vector.broadcast %cst_92 : f32 to vector<64x4xf32>
    %244 = arith.divf %243, %242 : vector<64x4xf32>
    %cst_93 = arith.constant 1.06140542 : f32
    %245 = vector.broadcast %cst_93 : f32 to vector<64x4xf32>
    %246 = arith.mulf %245, %244 : vector<64x4xf32>
    %cst_94 = arith.constant 1.45315206 : f32
    %247 = vector.broadcast %cst_94 : f32 to vector<64x4xf32>
    %248 = arith.subf %246, %247 : vector<64x4xf32>
    %249 = arith.mulf %248, %244 : vector<64x4xf32>
    %cst_95 = arith.constant 1.42141378 : f32
    %250 = vector.broadcast %cst_95 : f32 to vector<64x4xf32>
    %251 = arith.addf %249, %250 : vector<64x4xf32>
    %252 = arith.mulf %251, %244 : vector<64x4xf32>
    %cst_96 = arith.constant 0.284496725 : f32
    %253 = vector.broadcast %cst_96 : f32 to vector<64x4xf32>
    %254 = arith.subf %252, %253 : vector<64x4xf32>
    %255 = arith.mulf %254, %244 : vector<64x4xf32>
    %cst_97 = arith.constant 0.254829586 : f32
    %256 = vector.broadcast %cst_97 : f32 to vector<64x4xf32>
    %257 = arith.addf %255, %256 : vector<64x4xf32>
    %258 = arith.mulf %257, %244 : vector<64x4xf32>
    %cst_98 = arith.constant 0.000000e+00 : f32
    %259 = vector.broadcast %cst_98 : f32 to vector<64x4xf32>
    %260 = arith.subf %259, %238 : vector<64x4xf32>
    %261 = arith.mulf %260, %238 : vector<64x4xf32>
    %262 = math.exp %261 : vector<64x4xf32>
    %263 = arith.mulf %258, %262 : vector<64x4xf32>
    %cst_99 = arith.constant 1.000000e+00 : f32
    %264 = vector.broadcast %cst_99 : f32 to vector<64x4xf32>
    %265 = arith.subf %264, %263 : vector<64x4xf32>
    %cst_100 = arith.constant 0.000000e+00 : f32
    %266 = vector.broadcast %cst_100 : f32 to vector<64x4xf32>
    %267 = arith.cmpf oge, %237, %266 : vector<64x4xf32>
    %cst_101 = arith.constant 0.000000e+00 : f32
    %268 = vector.broadcast %cst_101 : f32 to vector<64x4xf32>
    %269 = arith.subf %268, %265 : vector<64x4xf32>
    %270 = arith.select %267, %265, %269 : vector<64x4xi1>, vector<64x4xf32>
    %cst_102 = arith.constant 1.000000e+00 : f32
    %271 = vector.broadcast %cst_102 : f32 to vector<64x4xf32>
    %272 = arith.addf %271, %270 : vector<64x4xf32>
    %273 = arith.mulf %235, %272 : vector<64x4xf32>
    %274 = vector.extract_strided_slice %57 {offsets = [8, 0], sizes = [4, 16], strides = [1, 1]} : vector<16x16xf32> to vector<4x16xf32>
    %275 = arith.truncf %273 : vector<64x4xf32> to vector<64x4xbf16>
    %276 = arith.truncf %274 : vector<4x16xf32> to vector<4x16xbf16>
    %cst_103 = arith.constant dense<0.000000e+00> : vector<64x16xf32>
    %277 = tpu.matmul %275, %276, %cst_103 {dimension_numbers = #tpu.dot_dimension_numbers<[1], [0], [0], [1], [0, 0, 1, 1], [], []>} : vector<64x4xbf16>, vector<4x16xbf16>, vector<64x16xf32> -> vector<64x16xf32>
    %278 = arith.addf %204, %277 : vector<64x16xf32>
    %279 = vector.extract_strided_slice %55 {offsets = [0, 12], sizes = [64, 4], strides = [1, 1]} : vector<64x16xf32> to vector<64x4xf32>
    %280 = arith.truncf %279 : vector<64x4xf32> to vector<64x4xbf16>
    %281 = arith.truncf %56 : vector<4x4xf32> to vector<4x4xbf16>
    %cst_104 = arith.constant dense<0.000000e+00> : vector<64x4xf32>
    %282 = tpu.matmul %280, %281, %cst_104 {dimension_numbers = #tpu.dot_dimension_numbers<[1], [0], [0], [1], [0, 0, 1, 1], [], []>} : vector<64x4xbf16>, vector<4x4xbf16>, vector<64x4xf32> -> vector<64x4xf32>
    %c0_105 = arith.constant 0 : index
    %c0_106 = arith.constant 0 : index
    %283 = vector.load %arg7[%c0_105, %c0_106] : memref<1x4xf32, #tpu.memory_space<vmem>>, vector<1x4xf32>
    %284 = vector.broadcast %283 : vector<1x4xf32> to vector<64x4xf32>
    %285 = arith.addf %282, %284 : vector<64x4xf32>
    %c0_107 = arith.constant 0 : index
    %c0_108 = arith.constant 0 : index
    %286 = vector.load %arg8[%c0_107, %c0_108] : memref<1x4xf32, #tpu.memory_space<vmem>>, vector<1x4xf32>
    %c0_109 = arith.constant 0 : index
    %c0_110 = arith.constant 0 : index
    %287 = vector.load %arg9[%c0_109, %c0_110] : memref<1x4xf32, #tpu.memory_space<vmem>>, vector<1x4xf32>
    %cst_111 = arith.constant dense<0.000000e+00> : vector<64xf32>
    %288 = vector.multi_reduction <add>, %285, %cst_111 [1] : vector<64x4xf32> to vector<64xf32>
    %289 = vector.shape_cast %288 : vector<64xf32> to vector<64x1xf32>
    %cst_112 = arith.constant 4.000000e+00 : f32
    %290 = vector.broadcast %cst_112 : f32 to vector<64x1xf32>
    %291 = arith.divf %289, %290 : vector<64x1xf32>
    %292 = vector.broadcast %291 : vector<64x1xf32> to vector<64x4xf32>
    %293 = arith.subf %285, %292 : vector<64x4xf32>
    %294 = arith.mulf %293, %293 : vector<64x4xf32>
    %cst_113 = arith.constant dense<0.000000e+00> : vector<64xf32>
    %295 = vector.multi_reduction <add>, %294, %cst_113 [1] : vector<64x4xf32> to vector<64xf32>
    %296 = vector.shape_cast %295 : vector<64xf32> to vector<64x1xf32>
    %cst_114 = arith.constant 4.000000e+00 : f32
    %297 = vector.broadcast %cst_114 : f32 to vector<64x1xf32>
    %298 = arith.divf %296, %297 : vector<64x1xf32>
    %cst_115 = arith.constant 9.99999997E-7 : f32
    %299 = vector.broadcast %cst_115 : f32 to vector<64x1xf32>
    %300 = arith.addf %298, %299 : vector<64x1xf32>
    %301 = math.rsqrt %300 : vector<64x1xf32>
    %302 = vector.broadcast %301 : vector<64x1xf32> to vector<64x4xf32>
    %303 = arith.mulf %293, %302 : vector<64x4xf32>
    %304 = vector.broadcast %286 : vector<1x4xf32> to vector<64x4xf32>
    %305 = arith.mulf %303, %304 : vector<64x4xf32>
    %306 = vector.broadcast %287 : vector<1x4xf32> to vector<64x4xf32>
    %307 = arith.addf %305, %306 : vector<64x4xf32>
    %cst_116 = arith.constant 5.000000e-01 : f32
    %308 = vector.broadcast %cst_116 : f32 to vector<64x4xf32>
    %309 = arith.mulf %308, %307 : vector<64x4xf32>
    %cst_117 = arith.constant 0.707106769 : f32
    %310 = vector.broadcast %cst_117 : f32 to vector<64x4xf32>
    %311 = arith.mulf %307, %310 : vector<64x4xf32>
    %312 = math.absf %311 : vector<64x4xf32>
    %cst_118 = arith.constant 0.327591091 : f32
    %313 = vector.broadcast %cst_118 : f32 to vector<64x4xf32>
    %314 = arith.mulf %313, %312 : vector<64x4xf32>
    %cst_119 = arith.constant 1.000000e+00 : f32
    %315 = vector.broadcast %cst_119 : f32 to vector<64x4xf32>
    %316 = arith.addf %315, %314 : vector<64x4xf32>
    %cst_120 = arith.constant 1.000000e+00 : f32
    %317 = vector.broadcast %cst_120 : f32 to vector<64x4xf32>
    %318 = arith.divf %317, %316 : vector<64x4xf32>
    %cst_121 = arith.constant 1.06140542 : f32
    %319 = vector.broadcast %cst_121 : f32 to vector<64x4xf32>
    %320 = arith.mulf %319, %318 : vector<64x4xf32>
    %cst_122 = arith.constant 1.45315206 : f32
    %321 = vector.broadcast %cst_122 : f32 to vector<64x4xf32>
    %322 = arith.subf %320, %321 : vector<64x4xf32>
    %323 = arith.mulf %322, %318 : vector<64x4xf32>
    %cst_123 = arith.constant 1.42141378 : f32
    %324 = vector.broadcast %cst_123 : f32 to vector<64x4xf32>
    %325 = arith.addf %323, %324 : vector<64x4xf32>
    %326 = arith.mulf %325, %318 : vector<64x4xf32>
    %cst_124 = arith.constant 0.284496725 : f32
    %327 = vector.broadcast %cst_124 : f32 to vector<64x4xf32>
    %328 = arith.subf %326, %327 : vector<64x4xf32>
    %329 = arith.mulf %328, %318 : vector<64x4xf32>
    %cst_125 = arith.constant 0.254829586 : f32
    %330 = vector.broadcast %cst_125 : f32 to vector<64x4xf32>
    %331 = arith.addf %329, %330 : vector<64x4xf32>
    %332 = arith.mulf %331, %318 : vector<64x4xf32>
    %cst_126 = arith.constant 0.000000e+00 : f32
    %333 = vector.broadcast %cst_126 : f32 to vector<64x4xf32>
    %334 = arith.subf %333, %312 : vector<64x4xf32>
    %335 = arith.mulf %334, %312 : vector<64x4xf32>
    %336 = math.exp %335 : vector<64x4xf32>
    %337 = arith.mulf %332, %336 : vector<64x4xf32>
    %cst_127 = arith.constant 1.000000e+00 : f32
    %338 = vector.broadcast %cst_127 : f32 to vector<64x4xf32>
    %339 = arith.subf %338, %337 : vector<64x4xf32>
    %cst_128 = arith.constant 0.000000e+00 : f32
    %340 = vector.broadcast %cst_128 : f32 to vector<64x4xf32>
    %341 = arith.cmpf oge, %311, %340 : vector<64x4xf32>
    %cst_129 = arith.constant 0.000000e+00 : f32
    %342 = vector.broadcast %cst_129 : f32 to vector<64x4xf32>
    %343 = arith.subf %342, %339 : vector<64x4xf32>
    %344 = arith.select %341, %339, %343 : vector<64x4xi1>, vector<64x4xf32>
    %cst_130 = arith.constant 1.000000e+00 : f32
    %345 = vector.broadcast %cst_130 : f32 to vector<64x4xf32>
    %346 = arith.addf %345, %344 : vector<64x4xf32>
    %347 = arith.mulf %309, %346 : vector<64x4xf32>
    %348 = vector.extract_strided_slice %57 {offsets = [12, 0], sizes = [4, 16], strides = [1, 1]} : vector<16x16xf32> to vector<4x16xf32>
    %349 = arith.truncf %347 : vector<64x4xf32> to vector<64x4xbf16>
    %350 = arith.truncf %348 : vector<4x16xf32> to vector<4x16xbf16>
    %cst_131 = arith.constant dense<0.000000e+00> : vector<64x16xf32>
    %351 = tpu.matmul %349, %350, %cst_131 {dimension_numbers = #tpu.dot_dimension_numbers<[1], [0], [0], [1], [0, 0, 1, 1], [], []>} : vector<64x4xbf16>, vector<4x16xbf16>, vector<64x16xf32> -> vector<64x16xf32>
    %352 = arith.addf %278, %351 : vector<64x16xf32>
    %c0_132 = arith.constant 0 : index
    %c0_133 = arith.constant 0 : index
    %353 = vector.load %arg11[%c0_132, %c0_133] : memref<1x16xf32, #tpu.memory_space<vmem>>, vector<1x16xf32>
    %354 = vector.broadcast %353 : vector<1x16xf32> to vector<64x16xf32>
    %355 = arith.addf %352, %354 : vector<64x16xf32>
    %c0_134 = arith.constant 0 : index
    %c0_135 = arith.constant 0 : index
    %356 = vector.load %arg12[%c0_134, %c0_135] : memref<1x16xf32, #tpu.memory_space<vmem>>, vector<1x16xf32>
    %c0_136 = arith.constant 0 : index
    %c0_137 = arith.constant 0 : index
    %357 = vector.load %arg13[%c0_136, %c0_137] : memref<1x16xf32, #tpu.memory_space<vmem>>, vector<1x16xf32>
    %cst_138 = arith.constant dense<0.000000e+00> : vector<64xf32>
    %358 = vector.multi_reduction <add>, %355, %cst_138 [1] : vector<64x16xf32> to vector<64xf32>
    %359 = vector.shape_cast %358 : vector<64xf32> to vector<64x1xf32>
    %cst_139 = arith.constant 1.600000e+01 : f32
    %360 = vector.broadcast %cst_139 : f32 to vector<64x1xf32>
    %361 = arith.divf %359, %360 : vector<64x1xf32>
    %362 = vector.broadcast %361 : vector<64x1xf32> to vector<64x16xf32>
    %363 = arith.subf %355, %362 : vector<64x16xf32>
    %364 = arith.mulf %363, %363 : vector<64x16xf32>
    %cst_140 = arith.constant dense<0.000000e+00> : vector<64xf32>
    %365 = vector.multi_reduction <add>, %364, %cst_140 [1] : vector<64x16xf32> to vector<64xf32>
    %366 = vector.shape_cast %365 : vector<64xf32> to vector<64x1xf32>
    %cst_141 = arith.constant 1.600000e+01 : f32
    %367 = vector.broadcast %cst_141 : f32 to vector<64x1xf32>
    %368 = arith.divf %366, %367 : vector<64x1xf32>
    %cst_142 = arith.constant 9.99999997E-7 : f32
    %369 = vector.broadcast %cst_142 : f32 to vector<64x1xf32>
    %370 = arith.addf %368, %369 : vector<64x1xf32>
    %371 = math.rsqrt %370 : vector<64x1xf32>
    %372 = vector.broadcast %371 : vector<64x1xf32> to vector<64x16xf32>
    %373 = arith.mulf %363, %372 : vector<64x16xf32>
    %374 = vector.broadcast %356 : vector<1x16xf32> to vector<64x16xf32>
    %375 = arith.mulf %373, %374 : vector<64x16xf32>
    %376 = vector.broadcast %357 : vector<1x16xf32> to vector<64x16xf32>
    %377 = arith.addf %375, %376 : vector<64x16xf32>
    %cst_143 = arith.constant 5.000000e-01 : f32
    %378 = vector.broadcast %cst_143 : f32 to vector<64x16xf32>
    %379 = arith.mulf %378, %377 : vector<64x16xf32>
    %cst_144 = arith.constant 0.707106769 : f32
    %380 = vector.broadcast %cst_144 : f32 to vector<64x16xf32>
    %381 = arith.mulf %377, %380 : vector<64x16xf32>
    %382 = math.absf %381 : vector<64x16xf32>
    %cst_145 = arith.constant 0.327591091 : f32
    %383 = vector.broadcast %cst_145 : f32 to vector<64x16xf32>
    %384 = arith.mulf %383, %382 : vector<64x16xf32>
    %cst_146 = arith.constant 1.000000e+00 : f32
    %385 = vector.broadcast %cst_146 : f32 to vector<64x16xf32>
    %386 = arith.addf %385, %384 : vector<64x16xf32>
    %cst_147 = arith.constant 1.000000e+00 : f32
    %387 = vector.broadcast %cst_147 : f32 to vector<64x16xf32>
    %388 = arith.divf %387, %386 : vector<64x16xf32>
    %cst_148 = arith.constant 1.06140542 : f32
    %389 = vector.broadcast %cst_148 : f32 to vector<64x16xf32>
    %390 = arith.mulf %389, %388 : vector<64x16xf32>
    %cst_149 = arith.constant 1.45315206 : f32
    %391 = vector.broadcast %cst_149 : f32 to vector<64x16xf32>
    %392 = arith.subf %390, %391 : vector<64x16xf32>
    %393 = arith.mulf %392, %388 : vector<64x16xf32>
    %cst_150 = arith.constant 1.42141378 : f32
    %394 = vector.broadcast %cst_150 : f32 to vector<64x16xf32>
    %395 = arith.addf %393, %394 : vector<64x16xf32>
    %396 = arith.mulf %395, %388 : vector<64x16xf32>
    %cst_151 = arith.constant 0.284496725 : f32
    %397 = vector.broadcast %cst_151 : f32 to vector<64x16xf32>
    %398 = arith.subf %396, %397 : vector<64x16xf32>
    %399 = arith.mulf %398, %388 : vector<64x16xf32>
    %cst_152 = arith.constant 0.254829586 : f32
    %400 = vector.broadcast %cst_152 : f32 to vector<64x16xf32>
    %401 = arith.addf %399, %400 : vector<64x16xf32>
    %402 = arith.mulf %401, %388 : vector<64x16xf32>
    %cst_153 = arith.constant 0.000000e+00 : f32
    %403 = vector.broadcast %cst_153 : f32 to vector<64x16xf32>
    %404 = arith.subf %403, %382 : vector<64x16xf32>
    %405 = arith.mulf %404, %382 : vector<64x16xf32>
    %406 = math.exp %405 : vector<64x16xf32>
    %407 = arith.mulf %402, %406 : vector<64x16xf32>
    %cst_154 = arith.constant 1.000000e+00 : f32
    %408 = vector.broadcast %cst_154 : f32 to vector<64x16xf32>
    %409 = arith.subf %408, %407 : vector<64x16xf32>
    %cst_155 = arith.constant 0.000000e+00 : f32
    %410 = vector.broadcast %cst_155 : f32 to vector<64x16xf32>
    %411 = arith.cmpf oge, %381, %410 : vector<64x16xf32>
    %cst_156 = arith.constant 0.000000e+00 : f32
    %412 = vector.broadcast %cst_156 : f32 to vector<64x16xf32>
    %413 = arith.subf %412, %409 : vector<64x16xf32>
    %414 = arith.select %411, %409, %413 : vector<64x16xi1>, vector<64x16xf32>
    %cst_157 = arith.constant 1.000000e+00 : f32
    %415 = vector.broadcast %cst_157 : f32 to vector<64x16xf32>
    %416 = arith.addf %415, %414 : vector<64x16xf32>
    %417 = arith.mulf %379, %416 : vector<64x16xf32>
    %c0_158 = arith.constant 0 : index
    %c0_159 = arith.constant 0 : index
    %418 = vector.load %arg14[%c0_158, %c0_159] : memref<16x32xf32, #tpu.memory_space<vmem>>, vector<16x32xf32>
    %419 = arith.truncf %417 : vector<64x16xf32> to vector<64x16xbf16>
    %420 = arith.truncf %418 : vector<16x32xf32> to vector<16x32xbf16>
    %cst_160 = arith.constant dense<0.000000e+00> : vector<64x32xf32>
    %421 = tpu.matmul %419, %420, %cst_160 {dimension_numbers = #tpu.dot_dimension_numbers<[1], [0], [0], [1], [0, 0, 1, 1], [], []>} : vector<64x16xbf16>, vector<16x32xbf16>, vector<64x32xf32> -> vector<64x32xf32>
    %c0_161 = arith.constant 0 : index
    %c0_162 = arith.constant 0 : index
    %422 = vector.load %arg15[%c0_161, %c0_162] : memref<1x32xf32, #tpu.memory_space<vmem>>, vector<1x32xf32>
    %423 = vector.broadcast %422 : vector<1x32xf32> to vector<64x32xf32>
    %424 = arith.addf %421, %423 : vector<64x32xf32>
    %c0_163 = arith.constant 0 : index
    %c0_164 = arith.constant 0 : index
    %425 = vector.load %arg17[%c0_163, %c0_164] : memref<1x1xf32, #tpu.memory_space<vmem>>, vector<1x1xf32>
    %426 = vector.broadcast %425 : vector<1x1xf32> to vector<64x32xf32>
    %427 = arith.mulf %426, %424 : vector<64x32xf32>
    %cst_165 = arith.constant 1.000000e+00 : f32
    %428 = vector.broadcast %cst_165 : f32 to vector<1x1xf32>
    %429 = arith.subf %428, %425 : vector<1x1xf32>
    %c0_166 = arith.constant 0 : index
    %c0_167 = arith.constant 0 : index
    %430 = vector.load %arg16[%c0_166, %c0_167] : memref<1x32xf32, #tpu.memory_space<vmem>>, vector<1x32xf32>
    %431 = vector.broadcast %429 : vector<1x1xf32> to vector<1x32xf32>
    %432 = arith.mulf %431, %430 : vector<1x32xf32>
    %433 = vector.broadcast %432 : vector<1x32xf32> to vector<64x32xf32>
    %434 = arith.addf %427, %433 : vector<64x32xf32>
    %c0_168 = arith.constant 0 : index
    %c0_169 = arith.constant 0 : index
    %435 = vector.load %arg18[%c0_168, %c0_169] : memref<64x32xf32, #tpu.memory_space<vmem>>, vector<64x32xf32>
    %436 = arith.addf %435, %434 : vector<64x32xf32>
    %c0_170 = arith.constant 0 : index
    %c0_171 = arith.constant 0 : index
    %437 = vector.load %arg20[%c0_170, %c0_171] : memref<64x32xf32, #tpu.memory_space<vmem>>, vector<64x32xf32>
    tpu.vector_store %arg20[%c0_170, %c0_171], %436 {strides = array<i32>} : memref<64x32xf32, #tpu.memory_space<vmem>>, vector<64x32xf32>,
    return
  }
  func.func @transform_0(%arg0: i32) -> (i32, i32) {
    %c0_i32 = arith.constant 0 : i32
    %c0_i32_0 = arith.constant 0 : i32
    %c0_i32_1 = arith.constant 0 : i32
    return %c0_i32, %c0_i32_0 : i32, i32
  }
  func.func @transform_1(%arg0: i32) -> (i32, i32) {
    %c0_i32 = arith.constant 0 : i32
    %c0_i32_0 = arith.constant 0 : i32
    %c0_i32_1 = arith.constant 0 : i32
    return %c0_i32, %c0_i32_0 : i32, i32
  }
  func.func @transform_2(%arg0: i32) -> (i32, i32) {
    %c0_i32 = arith.constant 0 : i32
    %c0_i32_0 = arith.constant 0 : i32
    %c0_i32_1 = arith.constant 0 : i32
    return %c0_i32, %c0_i32_0 : i32, i32
  }
  func.func @transform_3(%arg0: i32) -> (i32, i32) {
    %c0_i32 = arith.constant 0 : i32
    %c0_i32_0 = arith.constant 0 : i32
    %c0_i32_1 = arith.constant 0 : i32
    return %c0_i32, %c0_i32_0 : i32, i32
  }
  func.func @transform_4(%arg0: i32) -> (i32, i32) {
    %c0_i32 = arith.constant 0 : i32
    %c0_i32_0 = arith.constant 0 : i32
    %c0_i32_1 = arith.constant 0 : i32
    return %c0_i32, %c0_i32_0 : i32, i32
  }
  func.func @transform_5(%arg0: i32) -> (i32, i32) {
    %c0_i32 = arith.constant 0 : i32
    %c0_i32_0 = arith.constant 0 : i32
    %c0_i32_1 = arith.constant 0 : i32
    return %c0_i32, %c0_i32_0 : i32, i32
  }
  func.func @transform_6(%arg0: i32) -> (i32, i32) {
    %c0_i32 = arith.constant 0 : i32
    %c0_i32_0 = arith.constant 0 : i32
    %c0_i32_1 = arith.constant 0 : i32
    return %c0_i32, %c0_i32_0 : i32, i32
  }
  func.func @transform_7(%arg0: i32) -> (i32, i32) {
    %c0_i32 = arith.constant 0 : i32
    %c0_i32_0 = arith.constant 0 : i32
    %c0_i32_1 = arith.constant 0 : i32
    return %c0_i32, %c0_i32_0 : i32, i32
  }
  func.func @transform_8(%arg0: i32) -> (i32, i32) {
    %c0_i32 = arith.constant 0 : i32
    %c0_i32_0 = arith.constant 0 : i32
    %c0_i32_1 = arith.constant 0 : i32
    return %c0_i32, %c0_i32_0 : i32, i32
  }
  func.func @transform_9(%arg0: i32) -> (i32, i32) {
    %c0_i32 = arith.constant 0 : i32
    %c0_i32_0 = arith.constant 0 : i32
    %c0_i32_1 = arith.constant 0 : i32
    return %c0_i32, %c0_i32_0 : i32, i32
  }
  func.func @transform_10(%arg0: i32) -> (i32, i32) {
    %c0_i32 = arith.constant 0 : i32
    %c0_i32_0 = arith.constant 0 : i32
    %c0_i32_1 = arith.constant 0 : i32
    return %c0_i32, %c0_i32_0 : i32, i32
  }
  func.func @transform_11(%arg0: i32) -> (i32, i32) {
    %c0_i32 = arith.constant 0 : i32
    %c0_i32_0 = arith.constant 0 : i32
    %c0_i32_1 = arith.constant 0 : i32
    return %c0_i32, %c0_i32_0 : i32, i32
  }
  func.func @transform_12(%arg0: i32) -> (i32, i32) {
    %c0_i32 = arith.constant 0 : i32
    %c0_i32_0 = arith.constant 0 : i32
    %c0_i32_1 = arith.constant 0 : i32
    return %c0_i32, %c0_i32_0 : i32, i32
  }
  func.func @transform_13(%arg0: i32) -> (i32, i32) {
    %c0_i32 = arith.constant 0 : i32
    %c0_i32_0 = arith.constant 0 : i32
    %c0_i32_1 = arith.constant 0 : i32
    return %c0_i32, %c0_i32_0 : i32, i32
  }
  func.func @transform_14(%arg0: i32) -> (i32, i32) {
    %c0_i32 = arith.constant 0 : i32
    %c0_i32_0 = arith.constant 0 : i32
    %c0_i32_1 = arith.constant 0 : i32
    return %c0_i32, %c0_i32_0 : i32, i32
  }
  func.func @transform_15(%arg0: i32) -> (i32, i32) {
    %c0_i32 = arith.constant 0 : i32
    %c0_i32_0 = arith.constant 0 : i32
    %c0_i32_1 = arith.constant 0 : i32
    return %c0_i32, %c0_i32_0 : i32, i32
  }
  func.func @transform_16(%arg0: i32) -> (i32, i32) {
    %c0_i32 = arith.constant 0 : i32
    %c0_i32_0 = arith.constant 0 : i32
    %c0_i32_1 = arith.constant 0 : i32
    return %c0_i32, %c0_i32_0 : i32, i32
  }
  func.func @transform_17(%arg0: i32) -> (i32, i32) {
    %c0_i32 = arith.constant 0 : i32
    %c0_i32_0 = arith.constant 0 : i32
    %c0_i32_1 = arith.constant 0 : i32
    return %c0_i32, %c0_i32_0 : i32, i32
  }
  func.func @transform_18(%arg0: i32) -> (i32, i32) {
    %c0_i32 = arith.constant 0 : i32
    %c0_i32_0 = arith.constant 0 : i32
    %c0_i32_1 = arith.constant 0 : i32
    return %c0_i32, %c0_i32_0 : i32, i32
  }
  func.func @transform_19(%arg0: i32) -> (i32, i32) {
    %c0_i32 = arith.constant 0 : i32
    %c0_i32_0 = arith.constant 0 : i32
    %c0_i32_1 = arith.constant 0 : i32
    return %c0_i32, %c0_i32_0 : i32, i32
  }
}

</mosaic_0001>

<bundles_post_ra>
// kernel: tpu_custom_call.1
= control target key start
LH: loop header
LB: loop body
LE: loop exit
PB: predicated region body
PF: predicated region fallthrough
CT: control target
= control target key end

     0   :  { %s4844_s0 = inlined_call_operand.vmem [shape: f32[6,32], index: 0, kind: input, shape index: {}]   ;;  %s4845_s1 = inlined_call_operand.vmem [shape: f32[6,1], index: 1, kind: input, shape index: {}]   ;;  %s4846_s2 = inlined_call_operand.vmem [shape: f32[1,32], index: 2, kind: input, shape index: {}]   ;;  %s4847_s3 = inlined_call_operand.vmem [shape: f32[4,32], index: 3, kind: input, shape index: {}]   ;;  %s4848_s4 = inlined_call_operand.vmem [shape: f32[64,16], index: 4, kind: input, shape index: {}]   ;;  %s4849_s5 = inlined_call_operand.vmem [shape: f32[4,4], index: 5, kind: input, shape index: {}]   ;;  %s4850_s6 = inlined_call_operand.vmem [shape: f32[1,4], index: 6, kind: input, shape index: {}]   ;;  %s4851_s7 = inlined_call_operand.vmem [shape: f32[1,4], index: 7, kind: input, shape index: {}]   ;;  %s4852_s8 = inlined_call_operand.vmem [shape: f32[1,4], index: 8, kind: input, shape index: {}]   ;;  %s4853_s9 = inlined_call_operand.vmem [shape: f32[16,16], index: 9, kind: input, shape index: {}]   ;;  %s4854_s10 = inlined_call_operand.vmem [shape: f32[1,16], index: 10, kind: input, shape index: {}]   ;;  %s4855_s11 = inlined_call_operand.vmem [shape: f32[1,16], index: 11, kind: input, shape index: {}]   ;;  %s4856_s12 = inlined_call_operand.vmem [shape: f32[1,16], index: 12, kind: input, shape index: {}]   ;;  %s4857_s13 = inlined_call_operand.vmem [shape: f32[16,32], index: 13, kind: input, shape index: {}]   ;;  %s4858_s14 = inlined_call_operand.vmem [shape: f32[1,32], index: 14, kind: input, shape index: {}]   ;;  %s4859_s15 = inlined_call_operand.vmem [shape: f32[1,32], index: 15, kind: input, shape index: {}]   ;;  %s4860_s16 = inlined_call_operand.<no memory space> [shape: f32[1,1], index: 16, kind: input, shape index: {}]   ;;  %s4861_s17 = inlined_call_operand.vmem [shape: f32[64,32], index: 17, kind: input, shape index: {}]   ;;  %s4862_s18 = inlined_call_operand.hbm [shape: f32[6,32], index: 18, kind: output, shape index: {0}]   ;;  %s4863_s19 = inlined_call_operand.vmem [shape: f32[64,32], index: 19, kind: output, shape index: {1}]  }
   0x1   :  { %4865 = sst [smem:[#allocation15_spill]] %s4844_s0  ;;  %v25_v0 = vstv %s4860_s16 }
   0x2   :  { %4866 = sst [smem:[#allocation16_spill]] %s4845_s1  ;;  %26 = vst [vmem:[#allocation2] sm:$0x1] %v25_v0 }
   0x3   :  { %4867 = sst [smem:[#allocation17_spill]] %s4846_s2 }
   0x4   :  { %4868 = sst [smem:[#allocation18_spill]] %s4847_s3 }
   0x5   :  { %v152_v1 = vld [vmem:[%s4848_s4] sm:$0xff]  ;;  %v153_v2 = vld [vmem:[%s4848_s4 + $0x8] sm:$0xff]  ;;  %v154_v3 = vld [vmem:[%s4848_s4 + $0x10] sm:$0xff]  ;;  %vm175_vm0 = vcmask 31744   ;;  %vm188_vm1 = vcmask 1041408   ;;  %s3339_s1 = smov 124  }
   0x6   :  { %v3457_v4 = vpack.c.bf16 %v153_v2, %v152_v1  ;;  %v155_v5 = vld [vmem:[%s4848_s4 + $0x18] sm:$0xff]  ;;  %v156_v6 = vld [vmem:[%s4848_s4 + $0x20] sm:$0xff]  ;;  %v157_v7 = vld [vmem:[%s4848_s4 + $0x28] sm:$0xff] }
   0x7   :  { %v3468_v8 = vpack.c.bf16 %v157_v7, %v156_v6  ;;  %v158_v9 = vld [vmem:[%s4848_s4 + $0x30] sm:$0xff]  ;;  %v159_v10 = vld [vmem:[%s4848_s4 + $0x38] sm:$0xff]  ;;  %v160_v11 = vld [vmem:[%s4849_s5] sm:$0xf]  ;;  %v3480_v12 = vpack.c.bf16 %v155_v5, %v154_v3 }
   0x8   :  { %617 = vrot.lane.b32.xlu0 %v3457_v4, %s3339_s1  ;;  %v3482_v13 = vpack.c.bf16 %v160_v11, %v160_v11  ;;  %2955 = vmatprep.mubr.msk.bf16.mxu0 %vm175_vm0, %v3457_v4 }
   0x9   :  { %27 = vsyncpa [#allocation4], 0  ;;  %621 = vrot.lane.b32.xlu1 %v3468_v8, %s3339_s1  ;;  %v3487_v14 = vpack.c.bf16 %v159_v10, %v158_v9  ;;  %2959 = vmatprep.mubr.msk.bf16.mxu1 %vm175_vm0, %v3468_v8  ;;  %v3525_v25 = vld [vmem:[%s4850_s6] ss:$0 sm:$0xff]  ;;  %s3340_s22 = smov 120   ;;  %s3341_s2 = smov 116  }
   0xa   :  { %3046 = vmatprep.subr.msk.bf16.mxu1 %vm188_vm1, %v3482_v13  ;;  %v3495_v15 = vsel %vm188_vm1, %v3482_v13, 0  ;;  %3045 = vmatprep.subr.msk.bf16.mxu0 %vm188_vm1, %v3482_v13  ;;  %s4887_s16 = sld [smem:[#allocation16_spill]] }
   0xb   :  { %3044 = vmatpush3.bf16.msra.mxu1 %v3495_v15  ;;  %2954 = vmatpush3.bf16.msra.mxu0 %v3495_v15  ;;  %s4888_s28 = sld [smem:[#allocation17_spill]] }
   0xc   :  { %619 = vrot.lane.b32.xlu0 %v3480_v12, %s3339_s1  ;;  %3047 = vmatprep.subr.msk.bf16.mxu1 %vm188_vm1, %v3482_v13  ;;  %s4889_s0 = sld [smem:[#allocation15_spill]] }
   0xd   :  { %623 = vrot.lane.b32.xlu1 %v3487_v14, %s3339_s1  ;;  %s4890_s21 = sld [smem:[#allocation18_spill]] }
   0xe   :  { %2960 = vmatmul.mubr.msk.bf16.vlgmr.msra.gmra.mxu1 %vm175_vm0, %v3487_v14  ;;  %2956 = vmatmul.mubr.msk.bf16.vlgmr.msra.gmra.mxu0 %vm175_vm0, %v3480_v12 }
   0xf   :  { %2964 = vmatpush3.bf16.msra.mxu1 %v3495_v15 }
  0x7a   :  { %v618_v16 = vpop.permute.xlu0 %617 }
  0x7b   :  { %2965 = vmatprep.mubr.msk.bf16.mxu1 %vm175_vm0, %v618_v16  ;;  %v622_v17 = vpop.permute.xlu1 %621 }
  0x7e   :  { %v620_v18 = vpop.permute.xlu0 %619 }
  0x7f   :  { %2966 = vmatmul.mubr.msk.bf16.vlgmr.msra.gmra.mxu1 %vm175_vm0, %v620_v18  ;;  %v624_v19 = vpop.permute.xlu1 %623 }
  0x80   :  { %2969 = vmatprep.mubr.msk.bf16.mxu1 %vm175_vm0, %v622_v17 }
  0x87   :  { %2970 = vmatmul.mubr.msk.bf16.gmra.mxu1 %vm175_vm0, %v624_v19 }
  0xce   :  { %v3514_v20 = vpop.f32.mrf.mxu1 }
  0xd0   :  { %v3516_v21 = vpop.f32.mrf.mxu1 }
  0xd2   :  { %v3518_v22 = vpop.f32.mrf.mxu1 }
  0xd4   :  { %v3520_v23 = vpop.f32.mrf.mxu1 }
 0x13f   :  { %v2967_v24 = vpop.f32.mrf.mxu1 }
 0x140   :  { %v680_v29 = vadd.f32 %v2967_v24, %v3525_v25 }
 0x141   :  { %v671_v26 = vpop.f32.mrf.mxu1 }
 0x142   :  { %v672_v27 = vadd.f32 %v3525_v25, %v671_v26  ;;  %v708_v36 = vsel %vm175_vm0, %v680_v29, 0.0 }
 0x143   :  { %v2968_v28 = vpop.f32.mrf.mxu1 }
 0x144   :  { %v702_v30 = vsel %vm175_vm0, %v672_v27, 0.0  ;;  %v683_v34 = vadd.f32 %v2968_v28, %v3525_v25 }
 0x145   :  { %v674_v31 = vpop.f32.mrf.mxu1  ;;  %703 = vadd.xlane.f32.xlu0 %v702_v30 }
 0x146   :  { %v675_v32 = vadd.f32 %v3525_v25, %v674_v31  ;;  %v711_v42 = vsel %vm175_vm0, %v683_v34, 0.0 }
 0x147   :  { %v2971_v33 = vpop.f32.mrf.mxu1 }
 0x148   :  { %v705_v35 = vsel %vm175_vm0, %v675_v32, 0.0  ;;  %v696_v40 = vadd.f32 %v2971_v33, %v3525_v25 }
 0x149   :  { %v687_v37 = vpop.f32.mrf.mxu1  ;;  %706 = vadd.xlane.f32.xlu1 %v705_v35  ;;  %709 = vadd.xlane.f32.xlu0 %v708_v36  ;;  %v161_v36 = vld [vmem:[%s4853_s9] sm:$0xff] }
 0x14a   :  { %v688_v38 = vadd.f32 %v3525_v25, %v687_v37  ;;  %v720_v46 = vsel %vm175_vm0, %v696_v40, 0.0  ;;  %v3593_v37 = vpack.c.bf16 %v161_v36, %v161_v36 }
 0x14b   :  { %v2972_v39 = vpop.f32.mrf.mxu1 }
 0x14c   :  { %v714_v41 = vsel %vm175_vm0, %v688_v38, 0.0  ;;  %v699_v45 = vadd.f32 %v2972_v39, %v3525_v25  ;;  %3049 = vmatprep.subr.msk.bf16.mxu1 %vm188_vm1, %v3593_v37 }
 0x14d   :  { %v690_v43 = vpop.f32.mrf.mxu1  ;;  %715 = vadd.xlane.f32.xlu1 %v714_v41  ;;  %712 = vadd.xlane.f32.xlu0 %v711_v42 }
 0x14e   :  { %v691_v44 = vadd.f32 %v3525_v25, %v690_v43  ;;  %v723_v48 = vsel %vm175_vm0, %v699_v45, 0.0 }
 0x150   :  { %v717_v47 = vsel %vm175_vm0, %v691_v44, 0.0 }
 0x151   :  { %721 = vadd.xlane.f32.xlu1 %v720_v46  ;;  %718 = vadd.xlane.f32.xlu0 %v717_v47  ;;  %v3620_v46 = vadd.f32 %v3525_v25, %v3516_v21  ;;  %v3636_v21 = vadd.f32 %v3518_v22, %v3525_v25 }
 0x155   :  { %724 = vadd.xlane.f32.xlu0 %v723_v48  ;;  %v3626_v48 = vadd.f32 %v3514_v20, %v3525_v25 }
 0x1ce   :  { %v704_v49 = vpop.xlane.xlu0 %703 }
 0x1cf   :  { %v726_v50 = vmul.f32 0.25, %v704_v49  ;;  %v3630_v49 = vadd.f32 %v3525_v25, %v3520_v23 }
 0x1d1   :  { %v3543_v51 = vsub.f32 %v672_v27, %v726_v50  ;;  %v271_v50 = vsel %vm175_vm0, %v3620_v46, 0.0  ;;  %v274_v20 = vsel %vm175_vm0, %v3630_v49, 0.0 }
 0x1d2   :  { %v707_v52 = vpop.xlane.xlu1 %706  ;;  %v710_v53 = vpop.xlane.xlu0 %709 }
 0x1d3   :  { %v727_v54 = vmul.f32 0.25, %v707_v52  ;;  %v728_v55 = vmul.f32 0.25, %v710_v53  ;;  %v742_v56 = vmul.f32 %v3543_v51, %v3543_v51  ;;  %v277_v52 = vsel %vm175_vm0, %v3626_v48, 0.0 }
 0x1d4   :  { %v280_v53 = vsel %vm175_vm0, %v3636_v21, 0.0 }
 0x1d5   :  { %v3547_v57 = vsub.f32 %v675_v32, %v727_v54  ;;  %v3549_v58 = vsub.f32 %v680_v29, %v728_v55  ;;  %v750_v59 = vsel %vm175_vm0, %v742_v56, 0.0 }
 0x1d6   :  { %v716_v60 = vpop.xlane.xlu1 %715  ;;  %751 = vadd.xlane.f32.xlu1 %v750_v59  ;;  %v713_v61 = vpop.xlane.xlu0 %712 }
 0x1d7   :  { %v730_v62 = vmul.f32 0.25, %v716_v60  ;;  %v729_v63 = vmul.f32 0.25, %v713_v61  ;;  %v743_v0 = vmul.f32 %v3547_v57, %v3547_v57  ;;  %v744_v1 = vmul.f32 %v3549_v58, %v3549_v58 }
 0x1d9   :  { %v3556_v2 = vsub.f32 %v688_v38, %v730_v62  ;;  %v3558_v3 = vsub.f32 %v683_v34, %v729_v63  ;;  %v753_v5 = vsel %vm175_vm0, %v743_v0, 0.0  ;;  %v756_v6 = vsel %vm175_vm0, %v744_v1, 0.0 }
 0x1da   :  { %v722_v7 = vpop.xlane.xlu1 %721  ;;  %754 = vadd.xlane.f32.xlu0 %v753_v5  ;;  %757 = vadd.xlane.f32.xlu1 %v756_v6  ;;  %v719_v9 = vpop.xlane.xlu0 %718  ;;  %v1043_v38 = vrot.slane %v3593_v37, 2 }
 0x1db   :  { %v732_v10 = vmul.f32 0.25, %v722_v7  ;;  %v731_v11 = vmul.f32 0.25, %v719_v9  ;;  %v746_v16 = vmul.f32 %v3556_v2, %v3556_v2  ;;  %v745_v17 = vmul.f32 %v3558_v3, %v3558_v3 }
 0x1dc   :  { %3048 = vmatprep.subr.msk.bf16.mxu0 %vm188_vm1, %v1043_v38  ;;  %v1057_v23 = vsel %vm188_vm1, %v1043_v38, 0 }
 0x1dd   :  { %v3566_v18 = vsub.f32 %v696_v40, %v732_v10  ;;  %v3568_v19 = vsub.f32 %v691_v44, %v731_v11  ;;  %v762_v24 = vsel %vm175_vm0, %v746_v16, 0.0  ;;  %v759_v26 = vsel %vm175_vm0, %v745_v17, 0.0  ;;  %2974 = vmatpush3.bf16.msra.mxu0 %v1057_v23 }
 0x1de   :  { %763 = vadd.xlane.f32.xlu1 %v762_v24  ;;  %760 = vadd.xlane.f32.xlu0 %v759_v26  ;;  %v725_v27 = vpop.xlane.xlu0 %724 }
 0x1df   :  { %v733_v28 = vmul.f32 0.25, %v725_v27  ;;  %v748_v29 = vmul.f32 %v3566_v18, %v3566_v18  ;;  %v747_v30 = vmul.f32 %v3568_v19, %v3568_v19  ;;  %3050 = vmatprep.subr.msk.bf16.mxu0 %vm188_vm1, %v3482_v13 }
 0x1e1   :  { %v3576_v31 = vsub.f32 %v699_v45, %v733_v28  ;;  %v768_v32 = vsel %vm175_vm0, %v748_v29, 0.0  ;;  %v765_v33 = vsel %vm175_vm0, %v747_v30, 0.0  ;;  %v2790_v30 = vld [vmem:[%s4851_s7] ss:$0 sm:$0xff] }
 0x1e2   :  { %769 = vadd.xlane.f32.xlu1 %v768_v32  ;;  %766 = vadd.xlane.f32.xlu0 %v765_v33 }
 0x1e3   :  { %v749_v34 = vmul.f32 %v3576_v31, %v3576_v31 }
 0x1e5   :  { %v771_v35 = vsel %vm175_vm0, %v749_v34, 0.0  ;;  %v2791_v34 = vld [vmem:[%s4852_s8] ss:$0 sm:$0xff] }
 0x1e6   :  { %772 = vadd.xlane.f32.xlu0 %v771_v35 }
 0x1f3   :  { %1204 = vrot.lane.b32.xlu1 %v3457_v4, %s3340_s22 }
 0x1f7   :  { %1208 = vrot.lane.b32.xlu1 %v3468_v8, %s3340_s22 }
 0x1fb   :  { %1210 = vrot.lane.b32.xlu1 %v3487_v14, %s3340_s22 }
 0x1fc   :  { %1206 = vrot.lane.b32.xlu0 %v3480_v12, %s3340_s22 }
 0x1ff   :  { %1720 = vrot.lane.b32.xlu1 %v3480_v12, %s3341_s2  ;;  %v2957_v12 = vpop.f32.mrf.mxu0 }
 0x200   :  { %1718 = vrot.lane.b32.xlu0 %v3457_v4, %s3341_s2 }
 0x201   :  { %v226_v39 = vpop.f32.mrf.mxu0 }
 0x202   :  { %v3601_v40 = vadd.f32 %v3525_v25, %v226_v39 }
 0x203   :  { %1724 = vrot.lane.b32.xlu1 %v3487_v14, %s3341_s2  ;;  %v2958_v4 = vpop.f32.mrf.mxu0  ;;  %v3604_v14 = vadd.f32 %v2957_v12, %v3525_v25 }
 0x204   :  { %1722 = vrot.lane.b32.xlu0 %v3468_v8, %s3341_s2  ;;  %v259_v8 = vsel %vm175_vm0, %v3601_v40, 0.0  ;;  %v3612_v43 = vadd.f32 %v2958_v4, %v3525_v25 }
 0x205   :  { %v229_v41 = vpop.f32.mrf.mxu0  ;;  %v265_v45 = vsel %vm175_vm0, %v3604_v14, 0.0 }
 0x206   :  { %v3607_v42 = vadd.f32 %v3525_v25, %v229_v41  ;;  %v268_v47 = vsel %vm175_vm0, %v3612_v43, 0.0 }
 0x208   :  { %v262_v44 = vsel %vm175_vm0, %v3607_v42, 0.0 }
 0x223   :  { %260 = vadd.xlane.f32.xlu0 %v259_v8 }
 0x227   :  { %263 = vadd.xlane.f32.xlu1 %v262_v44  ;;  %266 = vadd.xlane.f32.xlu0 %v265_v45 }
 0x22b   :  { %272 = vadd.xlane.f32.xlu1 %v271_v50  ;;  %269 = vadd.xlane.f32.xlu0 %v268_v47 }
 0x22f   :  { %278 = vadd.xlane.f32.xlu1 %v277_v52  ;;  %275 = vadd.xlane.f32.xlu0 %v274_v20 }
 0x233   :  { %281 = vadd.xlane.f32.xlu0 %v280_v53 }
 0x25f   :  { %v752_v22 = vpop.xlane.xlu1 %751 }
 0x260   :  { %v774_v54 = vmul.f32 0.25, %v752_v22 }
 0x262   :  { %v782_v55 = vadd.f32 1e-06, %v774_v54 }
 0x263   :  { %v758_v56 = vpop.xlane.xlu1 %757  ;;  %v755_v59 = vpop.xlane.xlu0 %754 }
 0x264   :  { %3072 = vrsqrt.f32 %v782_v55  ;;  %v776_v60 = vmul.f32 0.25, %v758_v56  ;;  %v775_v61 = vmul.f32 0.25, %v755_v59 }
 0x266   :  { %v784_v62 = vadd.f32 1e-06, %v776_v60  ;;  %v783_v63 = vadd.f32 1e-06, %v775_v61 }
 0x267   :  { %v764_v0 = vpop.xlane.xlu1 %763  ;;  %v761_v1 = vpop.xlane.xlu0 %760 }
 0x268   :  { %3074 = vrsqrt.f32 %v784_v62  ;;  %v778_v5 = vmul.f32 0.25, %v764_v0  ;;  %v777_v6 = vmul.f32 0.25, %v761_v1 }
 0x269   :  { %3076 = vrsqrt.f32 %v783_v63 }
 0x26a   :  { %v786_v7 = vadd.f32 1e-06, %v778_v5  ;;  %v785_v9 = vadd.f32 1e-06, %v777_v6 }
 0x26b   :  { %v770_v10 = vpop.xlane.xlu1 %769  ;;  %v767_v11 = vpop.xlane.xlu0 %766 }
 0x26c   :  { %v780_v16 = vmul.f32 0.25, %v770_v10  ;;  %v779_v17 = vmul.f32 0.25, %v767_v11  ;;  %3078 = vrsqrt.f32 %v785_v9 }
 0x26d   :  { %3080 = vrsqrt.f32 %v786_v7 }
 0x26e   :  { %v788_v24 = vadd.f32 1e-06, %v780_v16  ;;  %v787_v26 = vadd.f32 1e-06, %v779_v17 }
 0x26f   :  { %v773_v27 = vpop.xlane.xlu0 %772 }
 0x270   :  { %v781_v28 = vmul.f32 0.25, %v773_v27  ;;  %3082 = vrsqrt.f32 %v787_v26 }
 0x271   :  { %v3073_v29 = vpop.eup %3072  ;;  %3084 = vrsqrt.f32 %v788_v24 }
 0x272   :  { %v798_v32 = vmul.f32 %v3073_v29, %v3543_v51  ;;  %v789_v33 = vadd.f32 1e-06, %v781_v28 }
 0x274   :  { %3086 = vrsqrt.f32 %v789_v33  ;;  %v806_v35 = vmul.f32 %v2790_v30, %v798_v32 }
 0x275   :  { %v3075_v36 = vpop.eup %3074 }
 0x276   :  { %v3077_v38 = vpop.eup %3076  ;;  %v800_v12 = vmul.f32 %v3075_v36, %v3549_v58  ;;  %v3655_v39 = vadd.f32 %v2791_v34, %v806_v35 }
 0x277   :  { %v799_v4 = vmul.f32 %v3077_v38, %v3547_v57 }
 0x278   :  { %v808_v41 = vmul.f32 %v2790_v30, %v800_v12  ;;  %v3659_v8 = vmul.f32 0.70710677, %v3655_v39 }
 0x279   :  { %v807_v51 = vmul.f32 %v2790_v30, %v799_v4  ;;  %v3079_v44 = vpop.eup %3078 }
 0x27a   :  { %v838_v45 = vand.u32 2147483647, %v3659_v8  ;;  %v3662_v47 = vadd.f32 %v2791_v34, %v808_v41  ;;  %v3081_v50 = vpop.eup %3080  ;;  %v801_v52 = vmul.f32 %v3079_v44, %v3558_v3  ;;  %vm998_vm2 = vcmp.ge.f32.partialorder %v3659_v8, 0.0 }
 0x27b   :  { %v3665_v20 = vadd.f32 %v2791_v34, %v807_v51  ;;  %v802_v54 = vmul.f32 %v3081_v50, %v3556_v2 }
 0x27c   :  { %v846_v58 = vmul.f32 0.3275911, %v838_v45  ;;  %v3668_v23 = vmul.f32 0.70710677, %v3662_v47  ;;  %v809_v57 = vmul.f32 %v2790_v30, %v801_v52  ;;  %v950_v10 = vsub.f32 0.0, %v838_v45 }
 0x27d   :  { %v3671_v53 = vmul.f32 0.70710677, %v3665_v20  ;;  %v3083_v22 = vpop.eup %3082  ;;  %v810_v6 = vmul.f32 %v2790_v30, %v802_v54 }
 0x27e   :  { %v854_v55 = vadd.f32 1.0, %v846_v58  ;;  %v840_v56 = vand.u32 2147483647, %v3668_v23  ;;  %v3085_v59 = vpop.eup %3084  ;;  %v3676_v3 = vadd.f32 %v2791_v34, %v809_v57  ;;  %v803_v61 = vmul.f32 %v3083_v22, %v3568_v19 }
 0x27f   :  { %v839_v60 = vand.u32 2147483647, %v3671_v53  ;;  %v804_v5 = vmul.f32 %v3085_v59, %v3566_v18  ;;  %v3685_v24 = vadd.f32 %v2791_v34, %v810_v6  ;;  %v958_v28 = vmul.f32 %v950_v10, %v838_v45 }
 0x280   :  { %3088 = vrcp.f32 %v854_v55  ;;  %v848_v62 = vmul.f32 0.3275911, %v840_v56  ;;  %v3680_v1 = vmul.f32 0.70710677, %v3676_v3  ;;  %v811_v16 = vmul.f32 %v2790_v30, %v803_v61 }
 0x281   :  { %v3087_v63 = vpop.eup %3086  ;;  %v847_v0 = vmul.f32 0.3275911, %v839_v60  ;;  %v952_v17 = vsub.f32 0.0, %v840_v56  ;;  %v812_v27 = vmul.f32 %v2790_v30, %v804_v5  ;;  %v3690_v32 = vmul.f32 0.70710677, %v3685_v24 }
 0x282   :  { %v856_v2 = vadd.f32 1.0, %v848_v62  ;;  %v805_v7 = vmul.f32 %v3087_v63, %v3576_v31  ;;  %v841_v11 = vand.u32 2147483647, %v3680_v1  ;;  %v3687_v26 = vadd.f32 %v2791_v34, %v811_v16 }
 0x283   :  { %v855_v9 = vadd.f32 1.0, %v847_v0  ;;  %v951_v33 = vsub.f32 0.0, %v839_v60  ;;  %v3695_v35 = vadd.f32 %v2791_v34, %v812_v27  ;;  %v960_v38 = vmul.f32 %v952_v17, %v840_v56 }
 0x284   :  { %3090 = vrcp.f32 %v856_v2  ;;  %v849_v19 = vmul.f32 0.3275911, %v841_v11  ;;  %v813_v29 = vmul.f32 %v2790_v30, %v805_v7  ;;  %v3693_v31 = vmul.f32 0.70710677, %v3687_v26 }
 0x285   :  { %3092 = vrcp.f32 %v855_v9  ;;  %v842_v12 = vand.u32 2147483647, %v3690_v32  ;;  %v966_v41 = vmul.f32 1.442695, %v958_v28  ;;  %v3702_v30 = vmul.f32 0.70710677, %v3695_v35 }
 0x286   :  { %v857_v18 = vadd.f32 1.0, %v849_v19  ;;  %v3697_v36 = vadd.f32 %v2791_v34, %v813_v29  ;;  %v843_v4 = vand.u32 2147483647, %v3693_v31  ;;  %v959_v50 = vmul.f32 %v951_v33, %v839_v60 }
 0x287   :  { %v850_v51 = vmul.f32 0.3275911, %v842_v12  ;;  %v844_v34 = vand.u32 2147483647, %v3702_v30  ;;  %v970_v57 = vmul.f32 1.442695, %v960_v38 }
 0x288   :  { %3094 = vrcp.f32 %v857_v18  ;;  %v851_v44 = vmul.f32 0.3275911, %v843_v4  ;;  %v3707_v52 = vmul.f32 0.70710677, %v3697_v36  ;;  %v953_v55 = vsub.f32 0.0, %v841_v11 }
 0x289   :  { %v858_v22 = vadd.f32 1.0, %v850_v51  ;;  %3096 = vpow2.f32 %v966_v41  ;;  %v852_v59 = vmul.f32 0.3275911, %v844_v34  ;;  %v968_v60 = vmul.f32 1.442695, %v959_v50 }
 0x28a   :  { %v859_v54 = vadd.f32 1.0, %v851_v44  ;;  %v845_v56 = vand.u32 2147483647, %v3707_v52  ;;  %v954_v7 = vsub.f32 0.0, %v842_v12  ;;  %v961_v10 = vmul.f32 %v953_v55, %v841_v11 }
 0x28b   :  { %3098 = vrcp.f32 %v858_v22  ;;  %v860_v0 = vadd.f32 1.0, %v852_v59  ;;  %v955_v16 = vsub.f32 0.0, %v843_v4  ;;  %v956_v18 = vsub.f32 0.0, %v844_v34 }
 0x28c   :  { %3100 = vrcp.f32 %v859_v54  ;;  %v853_v63 = vmul.f32 0.3275911, %v845_v56  ;;  %v962_v41 = vmul.f32 %v954_v7, %v842_v12  ;;  %v972_v44 = vmul.f32 1.442695, %v961_v10 }
 0x28d   :  { %v3704_v45 = vpop.eup %3088  ;;  %3102 = vpow2.f32 %v970_v57  ;;  %v963_v50 = vmul.f32 %v955_v16, %v843_v4  ;;  %v957_v22 = vsub.f32 0.0, %v845_v56  ;;  %v964_v59 = vmul.f32 %v956_v18, %v844_v34 }
 0x28e   :  { %v878_v58 = vmul.f32 1.0614054, %v3704_v45  ;;  %v861_v19 = vadd.f32 1.0, %v853_v63  ;;  %3104 = vrcp.f32 %v860_v0  ;;  %v974_v12 = vmul.f32 1.442695, %v962_v41 }
 0x28f   :  { %v976_v4 = vmul.f32 1.442695, %v963_v50  ;;  %v3733_v7 = vmul.f32 0.5, %v3665_v20  ;;  %v965_v10 = vmul.f32 %v957_v22, %v845_v56  ;;  %vm1000_vm3 = vcmp.ge.f32.partialorder %v3668_v23, 0.0 }
 0x290   :  { %v2812_v61 = vadd.f32 -1.4531521, %v878_v58  ;;  %3106 = vrcp.f32 %v861_v19  ;;  %vm999_vm4 = vcmp.ge.f32.partialorder %v3671_v53, 0.0  ;;  %vm1001_vm5 = vcmp.ge.f32.partialorder %v3680_v1, 0.0 }
 0x291   :  { %v3712_v62 = vpop.eup %3090  ;;  %3108 = vpow2.f32 %v968_v60  ;;  %v980_v50 = vmul.f32 1.442695, %v965_v10  ;;  %vm1002_vm6 = vcmp.ge.f32.partialorder %v3690_v32, 0.0  ;;  %vm1003_vm7 = vcmp.ge.f32.partialorder %v3693_v31, 0.0 }
 0x292   :  { %v3714_v5 = vpop.eup %3092  ;;  %v894_v2 = vmul.f32 %v3704_v45, %v2812_v61  ;;  %v880_v6 = vmul.f32 1.0614054, %v3712_v62  ;;  %v3726_v61 = vmul.f32 0.5, %v3655_v39  ;;  %3110 = vpow2.f32 %v972_v44 }
 0x293   :  { %v879_v9 = vmul.f32 1.0614054, %v3714_v5  ;;  %3112 = vpow2.f32 %v974_v12  ;;  %vm1004_vm8 = vcmp.ge.f32.partialorder %v3702_v30, 0.0  ;;  %vm1005_vm9 = vcmp.ge.f32.partialorder %v3707_v52, 0.0  ;;  %v1207_v30 = vpop.permute.xlu0 %1206 }
 0x294   :  { %v902_v17 = vadd.f32 1.4214138, %v894_v2  ;;  %v2814_v27 = vadd.f32 -1.4531521, %v880_v6  ;;  %3114 = vpow2.f32 %v976_v4 }
 0x295   :  { %v2813_v28 = vadd.f32 -1.4531521, %v879_v9  ;;  %v3719_v29 = vpop.eup %3094 }
 0x296   :  { %v910_v33 = vmul.f32 %v3704_v45, %v902_v17  ;;  %v896_v38 = vmul.f32 %v3712_v62, %v2814_v27  ;;  %v881_v11 = vmul.f32 1.0614054, %v3719_v29  ;;  %v3097_v6 = vpop.eup %3096  ;;  %v978_v17 = vmul.f32 1.442695, %v964_v59 }
 0x297   :  { %v895_v51 = vmul.f32 %v3714_v5, %v2813_v28 }
 0x298   :  { %v2820_v58 = vadd.f32 -0.28449672, %v910_v33  ;;  %v904_v57 = vadd.f32 1.4214138, %v896_v38  ;;  %v2815_v55 = vadd.f32 -1.4531521, %v881_v11  ;;  %v3735_v39 = vpop.eup %3098  ;;  %3116 = vpow2.f32 %v978_v17 }
 0x299   :  { %v903_v54 = vadd.f32 1.4214138, %v895_v51  ;;  %v3738_v27 = vpop.eup %3100  ;;  %v882_v33 = vmul.f32 1.0614054, %v3735_v39  ;;  %3118 = vpow2.f32 %v980_v50 }
 0x29a   :  { %v926_v60 = vmul.f32 %v3704_v45, %v2820_v58  ;;  %v912_v63 = vmul.f32 %v3712_v62, %v904_v57  ;;  %v897_v2 = vmul.f32 %v3719_v29, %v2815_v55  ;;  %v3103_v20 = vpop.eup %3102  ;;  %v883_v41 = vmul.f32 1.0614054, %v3738_v27 }
 0x29b   :  { %v911_v0 = vmul.f32 %v3714_v5, %v903_v54  ;;  %v2816_v44 = vadd.f32 -1.4531521, %v882_v33  ;;  %v3746_v58 = vpop.eup %3104 }
 0x29c   :  { %v934_v9 = vadd.f32 0.2548296, %v926_v60  ;;  %v2822_v34 = vadd.f32 -0.28449672, %v912_v63  ;;  %v905_v19 = vadd.f32 1.4214138, %v897_v2 }
 0x29d   :  { %v2821_v16 = vadd.f32 -0.28449672, %v911_v0  ;;  %v2817_v22 = vadd.f32 -1.4531521, %v883_v41  ;;  %v3749_v54 = vpop.eup %3106  ;;  %v898_v60 = vmul.f32 %v3735_v39, %v2816_v44  ;;  %v884_v63 = vmul.f32 1.0614054, %v3746_v58 }
 0x29e   :  { %v942_v28 = vmul.f32 %v3704_v45, %v934_v9  ;;  %v928_v18 = vmul.f32 %v3712_v62, %v2822_v34  ;;  %v913_v56 = vmul.f32 %v3719_v29, %v905_v19  ;;  %v3109_v12 = vpop.eup %3108 }
 0x29f   :  { %v927_v38 = vmul.f32 %v3714_v5, %v2821_v16  ;;  %v899_v4 = vmul.f32 %v3738_v27, %v2817_v22  ;;  %v906_v10 = vadd.f32 1.4214138, %v898_v60  ;;  %v2818_v16 = vadd.f32 -1.4531521, %v884_v63 }
 0x2a0   :  { %v982_v51 = vmul.f32 %v3097_v6, %v942_v28  ;;  %v936_v11 = vadd.f32 0.2548296, %v928_v18  ;;  %v2823_v57 = vadd.f32 -0.28449672, %v913_v56  ;;  %v885_v6 = vmul.f32 1.0614054, %v3749_v54 }
 0x2a1   :  { %v935_v45 = vadd.f32 0.2548296, %v927_v38  ;;  %v900_v38 = vmul.f32 %v3746_v58, %v2818_v16 }
 0x2a2   :  { %v990_v55 = vsub.f32 1.0, %v982_v51  ;;  %v944_v59 = vmul.f32 %v3712_v62, %v936_v11  ;;  %v929_v2 = vmul.f32 %v3719_v29, %v2823_v57  ;;  %v907_v62 = vadd.f32 1.4214138, %v899_v4 }
 0x2a3   :  { %v943_v0 = vmul.f32 %v3714_v5, %v935_v45  ;;  %v2819_v28 = vadd.f32 -1.4531521, %v885_v6  ;;  %v914_v5 = vmul.f32 %v3735_v39, %v906_v10  ;;  %v908_v57 = vadd.f32 1.4214138, %v900_v38 }
 0x2a4   :  { %v1006_v9 = vsub.f32 0.0, %v990_v55  ;;  %v984_v34 = vmul.f32 %v3103_v20, %v944_v59  ;;  %v937_v17 = vadd.f32 0.2548296, %v929_v2  ;;  %v915_v51 = vmul.f32 %v3738_v27, %v907_v62  ;;  %v3111_v20 = vpop.eup %3110 }
 0x2a5   :  { %v983_v19 = vmul.f32 %v3109_v12, %v943_v0  ;;  %v2824_v44 = vadd.f32 -0.28449672, %v914_v5  ;;  %v901_v45 = vmul.f32 %v3749_v54, %v2819_v28  ;;  %v3113_v0 = vpop.eup %3112  ;;  %v824_v38 = vmul.f32 0.5, %v3662_v47 }
 0x2a6   :  { %v1014_v18 = vsel %vm998_vm2, %v990_v55, %v1006_v9  ;;  %v992_v33 = vsub.f32 1.0, %v984_v34  ;;  %v945_v41 = vmul.f32 %v3719_v29, %v937_v17  ;;  %v2825_v59 = vadd.f32 -0.28449672, %v915_v51  ;;  %v3115_v6 = vpop.eup %3114 }
 0x2a7   :  { %v991_v56 = vsub.f32 1.0, %v983_v19  ;;  %v1022_v8 = vadd.f32 1.0, %v1014_v18  ;;  %v930_v63 = vmul.f32 %v3735_v39, %v2824_v44  ;;  %v909_v12 = vadd.f32 1.4214138, %v901_v45  ;;  %v3117_v28 = vpop.eup %3116 }
 0x2a8   :  { %v1008_v11 = vsub.f32 0.0, %v992_v33  ;;  %v985_v55 = vmul.f32 %v3111_v20, %v945_v41  ;;  %v916_v29 = vmul.f32 %v3746_v58, %v908_v57  ;;  %v931_v4 = vmul.f32 %v3738_v27, %v2825_v59  ;;  %v3119_v1 = vpop.eup %3118 }
 0x2a9   :  { %v1007_v22 = vsub.f32 0.0, %v991_v56  ;;  %v938_v34 = vadd.f32 0.2548296, %v930_v63  ;;  %v917_v23 = vmul.f32 %v3749_v54, %v909_v12  ;;  %v1030_v16 = vmul.f32 %v1022_v8, %v3726_v61 }
 0x2aa   :  { %v1016_v60 = vsel %vm1000_vm3, %v992_v33, %v1008_v11  ;;  %v993_v2 = vsub.f32 1.0, %v985_v55  ;;  %v2826_v10 = vadd.f32 -0.28449672, %v916_v29  ;;  %v939_v62 = vadd.f32 0.2548296, %v931_v4 }
 0x2ab   :  { %v1015_v50 = vsel %vm999_vm4, %v991_v56, %v1007_v22  ;;  %v1024_v17 = vadd.f32 1.0, %v1016_v60  ;;  %v946_v18 = vmul.f32 %v3735_v39, %v938_v34  ;;  %v2827_v33 = vadd.f32 -0.28449672, %v917_v23 }
 0x2ac   :  { %v1023_v9 = vadd.f32 1.0, %v1015_v50  ;;  %v1009_v19 = vsub.f32 0.0, %v993_v2  ;;  %v932_v5 = vmul.f32 %v3746_v58, %v2826_v10  ;;  %v825_v56 = vmul.f32 0.5, %v3676_v3 }
 0x2ad   :  { %v947_v61 = vmul.f32 %v3738_v27, %v939_v62  ;;  %v986_v11 = vmul.f32 %v3113_v0, %v946_v18  ;;  %v933_v44 = vmul.f32 %v3749_v54, %v2827_v33  ;;  %v1032_v39 = vmul.f32 %v1024_v17, %v824_v38 }
 0x2ae   :  { %v1031_v53 = vmul.f32 %v1023_v9, %v3733_v7  ;;  %v1017_v41 = vsel %vm1001_vm5, %v993_v2, %v1009_v19  ;;  %v940_v45 = vadd.f32 0.2548296, %v932_v5  ;;  %v826_v0 = vmul.f32 0.5, %v3685_v24 }
 0x2af   :  { %v1025_v20 = vadd.f32 1.0, %v1017_v41  ;;  %v987_v7 = vmul.f32 %v3115_v6, %v947_v61  ;;  %v994_v22 = vsub.f32 1.0, %v986_v11  ;;  %v941_v47 = vadd.f32 0.2548296, %v933_v44 }
 0x2b0   :  { %v1038_v51 = vpack.c.bf16 %v1031_v53, %v1030_v16  ;;  %v948_v3 = vmul.f32 %v3746_v58, %v940_v45  ;;  %v827_v2 = vmul.f32 0.5, %v3687_v26  ;;  %v828_v16 = vmul.f32 0.5, %v3695_v35  ;;  %v1205_v53 = vpop.permute.xlu1 %1204 }
 0x2b1   :  { %v1033_v57 = vmul.f32 %v1025_v20, %v825_v56  ;;  %v995_v8 = vsub.f32 1.0, %v987_v7  ;;  %v1010_v59 = vsub.f32 0.0, %v994_v22  ;;  %v949_v27 = vmul.f32 %v3749_v54, %v941_v47 }
 0x2b2   :  { %2975 = vmatprep.mubr.msk.bf16.mxu0 %vm175_vm0, %v1038_v51  ;;  %v988_v63 = vmul.f32 %v3117_v28, %v948_v3  ;;  %v829_v26 = vmul.f32 0.5, %v3697_v36  ;;  %v1719_v36 = vpop.permute.xlu0 %1718 }
 0x2b3   :  { %v1039_v55 = vpack.c.bf16 %v1033_v57, %v1032_v39  ;;  %v1011_v60 = vsub.f32 0.0, %v995_v8  ;;  %v1018_v12 = vsel %vm1002_vm6, %v994_v22, %v1010_v59  ;;  %v989_v29 = vmul.f32 %v3119_v1, %v949_v27 }
 0x2b4   :  { %v1026_v50 = vadd.f32 1.0, %v1018_v12  ;;  %v996_v54 = vsub.f32 1.0, %v988_v63  ;;  %v1209_v52 = vpop.permute.xlu1 %1208 }
 0x2b5   :  { %2976 = vmatmul.mubr.msk.bf16.vlgmr.msra.gmra.mxu0 %vm175_vm0, %v1039_v55  ;;  %v1019_v58 = vsel %vm1003_vm7, %v995_v8, %v1011_v60  ;;  %v997_v6 = vsub.f32 1.0, %v989_v29 }
 0x2b6   :  { %2994 = vmatpush3.bf16.msra.mxu0 %v3495_v15  ;;  %v1027_v4 = vadd.f32 1.0, %v1019_v58  ;;  %v1034_v32 = vmul.f32 %v1026_v50, %v826_v0  ;;  %v1012_v34 = vsub.f32 0.0, %v996_v54  ;;  %v1723_v33 = vpop.permute.xlu0 %1722 }
 0x2b7   :  { %3052 = vmatprep.subr.msk.bf16.mxu0 %vm188_vm1, %v3482_v13  ;;  %v1013_v31 = vsub.f32 0.0, %v997_v6 }
 0x2b8   :  { %v1035_v9 = vmul.f32 %v1027_v4, %v827_v2  ;;  %v1020_v24 = vsel %vm1004_vm8, %v996_v54, %v1012_v34  ;;  %v1211_v35 = vpop.permute.xlu1 %1210 }
 0x2b9   :  { %v1021_v10 = vsel %vm1005_vm9, %v997_v6, %v1013_v31  ;;  %v1028_v19 = vadd.f32 1.0, %v1020_v24 }
 0x2ba   :  { %v1040_v23 = vpack.c.bf16 %v1035_v9, %v1034_v32  ;;  %v1029_v17 = vadd.f32 1.0, %v1021_v10  ;;  %v261_v58 = vpop.xlane.xlu0 %260 }
 0x2bb   :  { %v1036_v13 = vmul.f32 %v1028_v19, %v828_v16 }
 0x2bc   :  { %2979 = vmatprep.mubr.msk.bf16.mxu0 %vm175_vm0, %v1040_v23  ;;  %v1037_v62 = vmul.f32 %v1029_v17, %v829_v26  ;;  %v1721_v18 = vpop.permute.xlu1 %1720 }
 0x2be   :  { %v1041_v28 = vpack.c.bf16 %v1037_v62, %v1036_v13  ;;  %v267_v31 = vpop.xlane.xlu0 %266  ;;  %v284_v62 = vmul.f32 0.25, %v261_v58 }
 0x2c0   :  { %2980 = vmatmul.mubr.msk.bf16.gmra.mxu0 %vm175_vm0, %v1041_v28  ;;  %v1725_v5 = vpop.permute.xlu1 %1724 }
 0x2c1   :  { %2995 = vmatprep.mubr.msk.bf16.mxu0 %vm175_vm0, %v1205_v53 }
 0x2c4   :  { %v264_v24 = vpop.xlane.xlu1 %263 }
 0x2c8   :  { %2996 = vmatmul.mubr.msk.bf16.vlgmr.msra.gmra.mxu0 %vm175_vm0, %v1207_v30 }
 0x2c9   :  { %3014 = vmatpush3.bf16.msra.mxu0 %v3495_v15  ;;  %2999 = vmatprep.mubr.msk.bf16.mxu0 %vm175_vm0, %v1209_v52  ;;  %v270_v52 = vpop.xlane.xlu0 %269 }
 0x2d0   :  { %3000 = vmatmul.mubr.msk.bf16.gmra.mxu0 %vm175_vm0, %v1211_v35 }
 0x2d1   :  { %3015 = vmatprep.mubr.msk.bf16.mxu0 %vm175_vm0, %v1719_v36  ;;  %v273_v36 = vpop.xlane.xlu1 %272 }
 0x2d8   :  { %3016 = vmatmul.mubr.msk.bf16.vlgmr.msra.gmra.mxu0 %vm175_vm0, %v1721_v18 }
 0x2d9   :  { %3019 = vmatprep.mubr.msk.bf16.mxu0 %vm175_vm0, %v1723_v33  ;;  %v285_v33 = vmul.f32 0.25, %v264_v24 }
 0x2e0   :  { %3020 = vmatmul.mubr.msk.bf16.gmra.mxu0 %vm175_vm0, %v1725_v5  ;;  %v286_v5 = vmul.f32 0.25, %v267_v31 }
 0x375   :  { %v3811_v38 = vpop.f32.mrf.mxu0 }
 0x376   :  { %4869 = vst [vmem:[#allocation6_spill] sm:$0xff] %v3811_v38 }
 0x377   :  { %v3813_v15 = vpop.f32.mrf.mxu0 }
 0x378   :  { %4870 = vst [vmem:[#allocation7_spill] sm:$0xff] %v3813_v15 }
 0x379   :  { %v3815_v56 = vpop.f32.mrf.mxu0 }
 0x37a   :  { %4871 = vst [vmem:[#allocation8_spill] sm:$0xff] %v3815_v56 }
 0x37b   :  { %v3817_v41 = vpop.f32.mrf.mxu0 }
 0x37c   :  { %4872 = vst [vmem:[#allocation9_spill] sm:$0xff] %v3817_v41 }
 0x380   :  { %v3819_v61 = vpop.f32.mrf.mxu0 }
 0x381   :  { %4873 = vst [vmem:[#allocation10_spill] sm:$0xff] %v3819_v61 }
 0x382   :  { %v3821_v51 = vpop.f32.mrf.mxu0 }
 0x383   :  { %4874 = vst [vmem:[#allocation11_spill] sm:$0xff] %v3821_v51 }
 0x384   :  { %v3823_v20 = vpop.f32.mrf.mxu0 }
 0x385   :  { %4875 = vst [vmem:[#allocation12_spill] sm:$0xff] %v3823_v20 }
 0x386   :  { %v3825_v11 = vpop.f32.mrf.mxu0 }
 0x387   :  { %4876 = vst [vmem:[#allocation13_spill] sm:$0xff] %v3825_v11 }
 0x388   :  { %v2997_v44 = vpop.f32.mrf.mxu0 }
 0x389   :  { %v3831_v57 = vadd.f32 %v2997_v44, %v3525_v25 }
 0x38a   :  { %v1258_v7 = vpop.f32.mrf.mxu0 }
 0x38b   :  { %v3828_v45 = vadd.f32 %v3525_v25, %v1258_v7  ;;  %v1295_v55 = vsel %vm175_vm0, %v3831_v57, 0.0  ;;  %v3889_v7 = vsub.f32 %v3601_v40, %v284_v62  ;;  %v3904_v40 = vsub.f32 %v3607_v42, %v285_v33 }
 0x38c   :  { %v2998_v39 = vpop.f32.mrf.mxu0 }
 0x38d   :  { %v1289_v22 = vsel %vm175_vm0, %v3828_v45, 0.0  ;;  %v3839_v1 = vadd.f32 %v2998_v39, %v3525_v25  ;;  %v301_v24 = vmul.f32 %v3904_v40, %v3904_v40 }
 0x38e   :  { %v1261_v47 = vpop.f32.mrf.mxu0  ;;  %1290 = vadd.xlane.f32.xlu1 %v1289_v22 }
 0x38f   :  { %v3836_v8 = vadd.f32 %v3525_v25, %v1261_v47  ;;  %v1298_v0 = vsel %vm175_vm0, %v3839_v1, 0.0  ;;  %v311_v62 = vsel %vm175_vm0, %v301_v24, 0.0 }
 0x390   :  { %v3001_v3 = vpop.f32.mrf.mxu0 }
 0x391   :  { %v1292_v59 = vsel %vm175_vm0, %v3836_v8, 0.0  ;;  %v3849_v12 = vadd.f32 %v3001_v3, %v3525_v25 }
 0x392   :  { %v1274_v27 = vpop.f32.mrf.mxu0  ;;  %1296 = vadd.xlane.f32.xlu1 %v1295_v55  ;;  %1293 = vadd.xlane.f32.xlu0 %v1292_v59  ;;  %v3312_v55 = vld [vmem:[%s4850_s6] ss:$0 sm:$0xff] }
 0x393   :  { %v3846_v60 = vadd.f32 %v3525_v25, %v1274_v27  ;;  %v1307_v6 = vsel %vm175_vm0, %v3849_v12, 0.0  ;;  %v288_v27 = vmul.f32 0.25, %v273_v36 }
 0x394   :  { %v3002_v63 = vpop.f32.mrf.mxu0 }
 0x395   :  { %v1301_v29 = vsel %vm175_vm0, %v3846_v60, 0.0  ;;  %v3859_v54 = vadd.f32 %v3002_v63, %v3525_v25  ;;  %v287_v63 = vmul.f32 0.25, %v270_v52 }
 0x396   :  { %v1277_v50 = vpop.f32.mrf.mxu0  ;;  %1302 = vadd.xlane.f32.xlu1 %v1301_v29  ;;  %1299 = vadd.xlane.f32.xlu0 %v1298_v0  ;;  %v276_v29 = vpop.xlane.xlu0 %275 }
 0x397   :  { %v3856_v2 = vadd.f32 %v3525_v25, %v1277_v50  ;;  %v1310_v26 = vsel %vm175_vm0, %v3859_v54, 0.0  ;;  %v279_v0 = vpop.xlane.xlu1 %278  ;;  %v3921_v42 = vsub.f32 %v3612_v43, %v287_v63 }
 0x398   :  { %v3017_v4 = vpop.f32.mrf.mxu0 }
 0x399   :  { %v1304_v32 = vsel %vm175_vm0, %v3856_v2, 0.0  ;;  %v3869_v10 = vadd.f32 %v3017_v4, %v3525_v25 }
 0x39a   :  { %v1772_v9 = vpop.f32.mrf.mxu0  ;;  %1308 = vadd.xlane.f32.xlu1 %v1307_v6  ;;  %1305 = vadd.xlane.f32.xlu0 %v1304_v32  ;;  %v300_v6 = vmul.f32 %v3889_v7, %v3889_v7  ;;  %v290_v32 = vmul.f32 0.25, %v279_v0 }
 0x39b   :  { %v3866_v34 = vadd.f32 %v3525_v25, %v1772_v9  ;;  %v1809_v53 = vsel %vm175_vm0, %v3869_v10, 0.0  ;;  %v289_v9 = vmul.f32 0.25, %v276_v29 }
 0x39c   :  { %v3018_v23 = vpop.f32.mrf.mxu0 }
 0x39d   :  { %v1803_v16 = vsel %vm175_vm0, %v3866_v34, 0.0  ;;  %v3879_v28 = vadd.f32 %v3018_v23, %v3525_v25  ;;  %v308_v23 = vsel %vm175_vm0, %v300_v6, 0.0  ;;  %v3934_v43 = vsub.f32 %v3630_v49, %v289_v9 }
 0x39e   :  { %v1775_v19 = vpop.f32.mrf.mxu0  ;;  %1804 = vadd.xlane.f32.xlu1 %v1803_v16  ;;  %1311 = vadd.xlane.f32.xlu0 %v1310_v26  ;;  %v282_v26 = vpop.xlane.xlu0 %281 }
 0x39f   :  { %v3876_v17 = vadd.f32 %v3525_v25, %v1775_v19  ;;  %v1812_v47 = vsel %vm175_vm0, %v3879_v28, 0.0  ;;  %v305_v36 = vmul.f32 %v3934_v43, %v3934_v43 }
 0x3a0   :  { %v3021_v13 = vpop.f32.mrf.mxu0 }
 0x3a1   :  { %v1806_v30 = vsel %vm175_vm0, %v3876_v17, 0.0  ;;  %v3892_v39 = vadd.f32 %v3021_v13, %v3525_v25  ;;  %v291_v13 = vmul.f32 0.25, %v282_v26 }
 0x3a2   :  { %v1788_v35 = vpop.f32.mrf.mxu0  ;;  %1810 = vadd.xlane.f32.xlu1 %v1809_v53  ;;  %1807 = vadd.xlane.f32.xlu0 %v1806_v30  ;;  %v303_v30 = vmul.f32 %v3921_v42, %v3921_v42 }
 0x3a3   :  { %v3886_v18 = vadd.f32 %v3525_v25, %v1788_v35  ;;  %v3907_v25 = vsub.f32 %v3604_v14, %v286_v5  ;;  %v1821_v50 = vsel %vm175_vm0, %v3892_v39, 0.0  ;;  %v3918_v14 = vsub.f32 %v3620_v46, %v288_v27 }
 0x3a4   :  { %v3022_v44 = vpop.f32.mrf.mxu0  ;;  %v3931_v46 = vsub.f32 %v3626_v48, %v290_v32  ;;  %v3944_v48 = vsub.f32 %v3636_v21, %v291_v13  ;;  %v317_v49 = vsel %vm175_vm0, %v303_v30, 0.0  ;;  %v323_v5 = vsel %vm175_vm0, %v305_v36, 0.0 }
 0x3a5   :  { %v1815_v22 = vsel %vm175_vm0, %v3886_v18, 0.0  ;;  %v3909_v58 = vadd.f32 %v3312_v55, %v3022_v44  ;;  %v302_v16 = vmul.f32 %v3907_v25, %v3907_v25  ;;  %v304_v19 = vmul.f32 %v3918_v14, %v3918_v14 }
 0x3a6   :  { %v1791_v3 = vpop.f32.mrf.mxu0  ;;  %1816 = vadd.xlane.f32.xlu1 %v1815_v22  ;;  %1813 = vadd.xlane.f32.xlu0 %v1812_v47  ;;  %v306_v35 = vmul.f32 %v3931_v46, %v3931_v46  ;;  %v307_v44 = vmul.f32 %v3944_v48, %v3944_v48  ;;  %v1137_v22 = vsel %vm188_vm1, %v3593_v37, 0 }
 0x3a7   :  { %v3901_v59 = vadd.f32 %v3312_v55, %v1791_v3  ;;  %v1824_v31 = vsel %vm175_vm0, %v3909_v58, 0.0  ;;  %v314_v53 = vsel %vm175_vm0, %v302_v16, 0.0  ;;  %v320_v52 = vsel %vm175_vm0, %v304_v19, 0.0  ;;  %2984 = vmatpush3.bf16.msra.mxu1 %v1137_v22 }
 0x3a8   :  { %v326_v33 = vsel %vm175_vm0, %v306_v35, 0.0  ;;  %v329_v21 = vsel %vm175_vm0, %v307_v44, 0.0 }
 0x3a9   :  { %v1818_v4 = vsel %vm175_vm0, %v3901_v59, 0.0 }
 0x3aa   :  { %1822 = vadd.xlane.f32.xlu1 %v1821_v50  ;;  %1819 = vadd.xlane.f32.xlu0 %v1818_v4 }
 0x3ae   :  { %1825 = vadd.xlane.f32.xlu0 %v1824_v31  ;;  %309 = vadd.xlane.f32.xlu1 %v308_v23 }
 0x3b2   :  { %312 = vadd.xlane.f32.xlu0 %v311_v62  ;;  %315 = vadd.xlane.f32.xlu1 %v314_v53 }
 0x3b6   :  { %321 = vadd.xlane.f32.xlu1 %v320_v52  ;;  %318 = vadd.xlane.f32.xlu0 %v317_v49 }
 0x3ba   :  { %327 = vadd.xlane.f32.xlu1 %v326_v33  ;;  %324 = vadd.xlane.f32.xlu0 %v323_v5 }
 0x3be   :  { %330 = vadd.xlane.f32.xlu0 %v329_v21 }
 0x417   :  { %v1291_v47 = vpop.xlane.xlu1 %1290 }
 0x418   :  { %v1313_v3 = vmul.f32 0.25, %v1291_v47 }
 0x41a   :  { %v3959_v55 = vsub.f32 %v3828_v45, %v1313_v3 }
 0x41b   :  { %v1297_v27 = vpop.xlane.xlu1 %1296  ;;  %v1294_v63 = vpop.xlane.xlu0 %1293 }
 0x41c   :  { %v1315_v29 = vmul.f32 0.25, %v1297_v27  ;;  %v1314_v0 = vmul.f32 0.25, %v1294_v63  ;;  %v1329_v50 = vmul.f32 %v3959_v55, %v3959_v55 }
 0x41e   :  { %v3964_v4 = vsub.f32 %v3831_v57, %v1315_v29  ;;  %v3967_v6 = vsub.f32 %v3836_v8, %v1314_v0  ;;  %v1337_v37 = vsel %vm175_vm0, %v1329_v50, 0.0 }
 0x41f   :  { %v1303_v32 = vpop.xlane.xlu1 %1302  ;;  %1338 = vadd.xlane.f32.xlu1 %v1337_v37  ;;  %v1300_v9 = vpop.xlane.xlu0 %1299 }
 0x420   :  { %v1317_v45 = vmul.f32 0.25, %v1303_v32  ;;  %v1316_v31 = vmul.f32 0.25, %v1300_v9  ;;  %v1331_v23 = vmul.f32 %v3964_v4, %v3964_v4  ;;  %v1330_v24 = vmul.f32 %v3967_v6, %v3967_v6 }
 0x422   :  { %v3975_v16 = vsub.f32 %v3846_v60, %v1317_v45  ;;  %v3978_v57 = vsub.f32 %v3839_v1, %v1316_v31  ;;  %v1343_v8 = vsel %vm175_vm0, %v1331_v23, 0.0  ;;  %v1340_v26 = vsel %vm175_vm0, %v1330_v24, 0.0 }
 0x423   :  { %v1309_v19 = vpop.xlane.xlu1 %1308  ;;  %1344 = vadd.xlane.f32.xlu1 %v1343_v8  ;;  %1341 = vadd.xlane.f32.xlu0 %v1340_v26  ;;  %v1306_v13 = vpop.xlane.xlu0 %1305 }
 0x424   :  { %v1319_v62 = vmul.f32 0.25, %v1309_v19  ;;  %v1318_v53 = vmul.f32 0.25, %v1306_v13  ;;  %v1333_v30 = vmul.f32 %v3975_v16, %v3975_v16  ;;  %v1332_v60 = vmul.f32 %v3978_v57, %v3978_v57 }
 0x426   :  { %v3987_v52 = vsub.f32 %v3849_v12, %v1319_v62  ;;  %v3990_v1 = vsub.f32 %v3856_v2, %v1318_v53  ;;  %v1349_v49 = vsel %vm175_vm0, %v1333_v30, 0.0  ;;  %v1346_v35 = vsel %vm175_vm0, %v1332_v60, 0.0 }
 0x427   :  { %v1805_v36 = vpop.xlane.xlu1 %1804  ;;  %1350 = vadd.xlane.f32.xlu1 %v1349_v49  ;;  %1347 = vadd.xlane.f32.xlu0 %v1346_v35  ;;  %v1312_v33 = vpop.xlane.xlu0 %1311 }
 0x428   :  { %v1827_v5 = vmul.f32 0.25, %v1805_v36  ;;  %v1320_v44 = vmul.f32 0.25, %v1312_v33  ;;  %v1335_v21 = vmul.f32 %v3987_v52, %v3987_v52  ;;  %v1334_v12 = vmul.f32 %v3990_v1, %v3990_v1 }
 0x42a   :  { %v3999_v22 = vsub.f32 %v3866_v34, %v1827_v5  ;;  %v4002_v2 = vsub.f32 %v3859_v54, %v1320_v44  ;;  %v1355_v47 = vsel %vm175_vm0, %v1335_v21, 0.0  ;;  %v1352_v3 = vsel %vm175_vm0, %v1334_v12, 0.0 }
 0x42b   :  { %v1811_v27 = vpop.xlane.xlu1 %1810  ;;  %1356 = vadd.xlane.f32.xlu1 %v1355_v47  ;;  %1353 = vadd.xlane.f32.xlu0 %v1352_v3  ;;  %v1808_v63 = vpop.xlane.xlu0 %1807 }
 0x42c   :  { %v1829_v29 = vmul.f32 0.25, %v1811_v27  ;;  %v1828_v0 = vmul.f32 0.25, %v1808_v63  ;;  %v1843_v50 = vmul.f32 %v3999_v22, %v3999_v22  ;;  %v1336_v34 = vmul.f32 %v4002_v2, %v4002_v2 }
 0x42e   :  { %v4011_v37 = vsub.f32 %v3869_v10, %v1829_v29  ;;  %v4014_v54 = vsub.f32 %v3876_v17, %v1828_v0  ;;  %v1851_v32 = vsel %vm175_vm0, %v1843_v50, 0.0  ;;  %v1358_v9 = vsel %vm175_vm0, %v1336_v34, 0.0 }
 0x42f   :  { %v1817_v45 = vpop.xlane.xlu1 %1816  ;;  %1852 = vadd.xlane.f32.xlu1 %v1851_v32  ;;  %1359 = vadd.xlane.f32.xlu0 %v1358_v9  ;;  %v1814_v31 = vpop.xlane.xlu0 %1813 }
 0x430   :  { %v1831_v23 = vmul.f32 0.25, %v1817_v45  ;;  %v1830_v24 = vmul.f32 0.25, %v1814_v31  ;;  %v1845_v8 = vmul.f32 %v4011_v37, %v4011_v37  ;;  %v1844_v10 = vmul.f32 %v4014_v54, %v4014_v54 }
 0x432   :  { %v4023_v26 = vsub.f32 %v3886_v18, %v1831_v23  ;;  %v4026_v17 = vsub.f32 %v3879_v28, %v1830_v24  ;;  %v1857_v19 = vsel %vm175_vm0, %v1845_v8, 0.0  ;;  %v1854_v13 = vsel %vm175_vm0, %v1844_v10, 0.0 }
 0x433   :  { %v1823_v62 = vpop.xlane.xlu1 %1822  ;;  %1858 = vadd.xlane.f32.xlu1 %v1857_v19  ;;  %1855 = vadd.xlane.f32.xlu0 %v1854_v13  ;;  %v1820_v53 = vpop.xlane.xlu0 %1819 }
 0x434   :  { %v1833_v30 = vmul.f32 0.25, %v1823_v62  ;;  %v1832_v60 = vmul.f32 0.25, %v1820_v53  ;;  %v1847_v49 = vmul.f32 %v4023_v26, %v4023_v26  ;;  %v1846_v18 = vmul.f32 %v4026_v17, %v4026_v17 }
 0x436   :  { %v4035_v35 = vsub.f32 %v3892_v39, %v1833_v30  ;;  %v4038_v28 = vsub.f32 %v3901_v59, %v1832_v60  ;;  %v1863_v36 = vsel %vm175_vm0, %v1847_v49, 0.0  ;;  %v1860_v33 = vsel %vm175_vm0, %v1846_v18, 0.0 }
 0x437   :  { %v310_v5 = vpop.xlane.xlu1 %309  ;;  %1864 = vadd.xlane.f32.xlu1 %v1863_v36  ;;  %1861 = vadd.xlane.f32.xlu0 %v1860_v33  ;;  %v1826_v44 = vpop.xlane.xlu0 %1825 }
 0x438   :  { %v332_v21 = vmul.f32 0.25, %v310_v5  ;;  %v1834_v12 = vmul.f32 0.25, %v1826_v44  ;;  %v1849_v47 = vmul.f32 %v4035_v35, %v4035_v35  ;;  %v1848_v39 = vmul.f32 %v4038_v28, %v4038_v28 }
 0x43a   :  { %v340_v3 = vadd.f32 1e-06, %v332_v21  ;;  %v4047_v59 = vsub.f32 %v3909_v58, %v1834_v12  ;;  %v1869_v27 = vsel %vm175_vm0, %v1849_v47, 0.0  ;;  %v1866_v63 = vsel %vm175_vm0, %v1848_v39, 0.0  ;;  %v4058_v21 = vld [vmem:[%s4851_s7] ss:$0 sm:$0xff] }
 0x43b   :  { %1870 = vadd.xlane.f32.xlu1 %v1869_v27  ;;  %v316_v29 = vpop.xlane.xlu1 %315  ;;  %1867 = vadd.xlane.f32.xlu0 %v1866_v63  ;;  %v313_v0 = vpop.xlane.xlu0 %312  ;;  %v4065_v27 = vld [vmem:[%s4852_s8] ss:$0 sm:$0xff] }
 0x43c   :  { %4877 = vst [vmem:[#allocation14_spill] sm:$0xff] %v4047_v59  ;;  %3120 = vrsqrt.f32 %v340_v3  ;;  %v334_v50 = vmul.f32 0.25, %v316_v29  ;;  %v333_v34 = vmul.f32 0.25, %v313_v0  ;;  %v1850_v32 = vmul.f32 %v4047_v59, %v4047_v59 }
 0x43e   :  { %v342_v9 = vadd.f32 1e-06, %v334_v50  ;;  %v341_v45 = vadd.f32 1e-06, %v333_v34  ;;  %v1872_v31 = vsel %vm175_vm0, %v1850_v32, 0.0 }
 0x43f   :  { %v322_v58 = vpop.xlane.xlu1 %321  ;;  %1873 = vadd.xlane.f32.xlu0 %v1872_v31  ;;  %v319_v23 = vpop.xlane.xlu0 %318 }
 0x440   :  { %3122 = vrsqrt.f32 %v342_v9  ;;  %v336_v24 = vmul.f32 0.25, %v322_v58  ;;  %v335_v8 = vmul.f32 0.25, %v319_v23 }
 0x441   :  { %3124 = vrsqrt.f32 %v341_v45 }
 0x442   :  { %v344_v10 = vadd.f32 1e-06, %v336_v24  ;;  %v343_v19 = vadd.f32 1e-06, %v335_v8 }
 0x443   :  { %v328_v13 = vpop.xlane.xlu1 %327  ;;  %v325_v62 = vpop.xlane.xlu0 %324 }
 0x444   :  { %3126 = vrsqrt.f32 %v344_v10  ;;  %v338_v53 = vmul.f32 0.25, %v328_v13  ;;  %v337_v30 = vmul.f32 0.25, %v325_v62 }
 0x445   :  { %3128 = vrsqrt.f32 %v343_v19 }
 0x446   :  { %v345_v60 = vadd.f32 1e-06, %v337_v30  ;;  %v346_v49 = vadd.f32 1e-06, %v338_v53 }
 0x447   :  { %v331_v18 = vpop.xlane.xlu0 %330 }
 0x448   :  { %v339_v36 = vmul.f32 0.25, %v331_v18  ;;  %3130 = vrsqrt.f32 %v345_v60 }
 0x449   :  { %v3121_v33 = vpop.eup %3120  ;;  %3132 = vrsqrt.f32 %v346_v49 }
 0x44a   :  { %v356_v5 = vmul.f32 %v3121_v33, %v3889_v7  ;;  %v347_v44 = vadd.f32 1e-06, %v339_v36 }
 0x44c   :  { %v370_v12 = vmul.f32 %v4058_v21, %v356_v5  ;;  %3134 = vrsqrt.f32 %v347_v44 }
 0x44d   :  { %v3123_v47 = vpop.eup %3122 }
 0x44e   :  { %v3125_v39 = vpop.eup %3124  ;;  %v358_v3 = vmul.f32 %v3123_v47, %v3907_v25  ;;  %v4068_v7 = vadd.f32 %v4065_v27, %v370_v12 }
 0x44f   :  { %v357_v63 = vmul.f32 %v3125_v39, %v3904_v40 }
 0x450   :  { %v372_v29 = vmul.f32 %v4058_v21, %v358_v3  ;;  %v4073_v0 = vmul.f32 0.70710677, %v4068_v7 }
 0x451   :  { %v3127_v50 = vpop.eup %3126  ;;  %v371_v34 = vmul.f32 %v4058_v21, %v357_v63 }
 0x452   :  { %v3129_v32 = vpop.eup %3128  ;;  %v4077_v25 = vadd.f32 %v4065_v27, %v372_v29  ;;  %v408_v9 = vand.u32 2147483647, %v4073_v0  ;;  %v360_v58 = vmul.f32 %v3127_v50, %v3918_v14  ;;  %vm568_vm10 = vcmp.ge.f32.partialorder %v4073_v0, 0.0 }
 0x453   :  { %v359_v45 = vmul.f32 %v3129_v32, %v3921_v42  ;;  %v4082_v31 = vadd.f32 %v4065_v27, %v371_v34 }
 0x454   :  { %v4085_v40 = vmul.f32 0.70710677, %v4077_v25  ;;  %v416_v23 = vmul.f32 0.3275911, %v408_v9  ;;  %v374_v14 = vmul.f32 %v4058_v21, %v360_v58  ;;  %v520_v47 = vsub.f32 0.0, %v408_v9 }
 0x455   :  { %v373_v24 = vmul.f32 %v4058_v21, %v359_v45  ;;  %v4090_v8 = vmul.f32 0.70710677, %v4082_v31  ;;  %v3131_v10 = vpop.eup %3130 }
 0x456   :  { %v410_v19 = vand.u32 2147483647, %v4085_v40  ;;  %v424_v13 = vadd.f32 1.0, %v416_v23  ;;  %v3133_v53 = vpop.eup %3132  ;;  %v361_v60 = vmul.f32 %v3131_v10, %v3934_v43  ;;  %v4106_v43 = vadd.f32 %v4065_v27, %v374_v14 }
 0x457   :  { %v4094_v42 = vadd.f32 %v4065_v27, %v373_v24  ;;  %v409_v62 = vand.u32 2147483647, %v4090_v8  ;;  %v362_v44 = vmul.f32 %v3133_v53, %v3931_v46  ;;  %v528_v58 = vmul.f32 %v520_v47, %v408_v9 }
 0x458   :  { %v418_v30 = vmul.f32 0.3275911, %v410_v19  ;;  %3136 = vrcp.f32 %v424_v13  ;;  %v375_v39 = vmul.f32 %v4058_v21, %v361_v60  ;;  %v522_v3 = vsub.f32 0.0, %v410_v19 }
 0x459   :  { %v4100_v49 = vmul.f32 0.70710677, %v4094_v42  ;;  %v417_v18 = vmul.f32 0.3275911, %v409_v62  ;;  %v3135_v36 = vpop.eup %3134  ;;  %v4113_v34 = vmul.f32 0.70710677, %v4106_v43  ;;  %v376_v32 = vmul.f32 %v4058_v21, %v362_v44 }
 0x45a   :  { %v426_v33 = vadd.f32 1.0, %v418_v30  ;;  %v363_v29 = vmul.f32 %v3135_v36, %v3944_v48  ;;  %v4110_v50 = vadd.f32 %v4065_v27, %v375_v39  ;;  %v521_v45 = vsub.f32 0.0, %v409_v62 }
 0x45b   :  { %v411_v5 = vand.u32 2147483647, %v4100_v49  ;;  %v425_v12 = vadd.f32 1.0, %v417_v18  ;;  %v412_v24 = vand.u32 2147483647, %v4113_v34  ;;  %v530_v10 = vmul.f32 %v522_v3, %v410_v19  ;;  %v162_v19 = vld [vmem:[%s4853_s9 + $0x8] sm:$0xff] }
 0x45c   :  { %3138 = vrcp.f32 %v426_v33  ;;  %v4117_v23 = vmul.f32 0.70710677, %v4110_v50  ;;  %v377_v48 = vmul.f32 %v4058_v21, %v363_v29  ;;  %v4123_v30 = vadd.f32 %v4065_v27, %v376_v32  ;;  %s3344_s9 = smov [#allocation3]  }
 0x45d   :  { %v419_v63 = vmul.f32 0.3275911, %v411_v5  ;;  %3140 = vrcp.f32 %v425_v12  ;;  %v420_v53 = vmul.f32 0.3275911, %v412_v24  ;;  %v529_v14 = vmul.f32 %v521_v45, %v409_v62  ;;  %s2766_s1 = sshll.u32 %s3344_s9, 4  ;;  %s2767_s1 = int_to_ptr.vmem [resolvable:$true] %s2766_s1 }
 0x45e   :  { %v413_v13 = vand.u32 2147483647, %v4117_v23  ;;  %v4126_v60 = vadd.f32 %v4065_v27, %v377_v48  ;;  %v536_v9 = vmul.f32 1.442695, %v528_v58  ;;  %v540_v44 = vmul.f32 1.442695, %v530_v10  ;;  %p3322_p1 = scmp.lt.s32.totalorder %s2767_s1, %s2767_s1 }
 0x45f   :  { %v427_v46 = vadd.f32 1.0, %v419_v63  ;;  %v428_v36 = vadd.f32 1.0, %v420_v53  ;;  %v4134_v12 = vmul.f32 0.70710677, %v4123_v30  ;;  %v523_v39 = vsub.f32 0.0, %v411_v5 }
 0x460   :  { %v421_v18 = vmul.f32 0.3275911, %v413_v13  ;;  %v4137_v47 = vmul.f32 0.70710677, %v4126_v60  ;;  %v538_v45 = vmul.f32 1.442695, %v529_v14 }
 0x461   :  { %3142 = vrcp.f32 %v427_v46  ;;  %v414_v63 = vand.u32 2147483647, %v4134_v12  ;;  %v4142_v46 = vpack.c.bf16 %v162_v19, %v162_v19  ;;  %v524_v14 = vsub.f32 0.0, %v412_v24 }
 0x462   :  { %v429_v62 = vadd.f32 1.0, %v421_v18  ;;  %3144 = vrcp.f32 %v428_v36  ;;  %v415_v29 = vand.u32 2147483647, %v4137_v47  ;;  %v531_v18 = vmul.f32 %v523_v39, %v411_v5 }
 0x463   :  { %v422_v10 = vmul.f32 0.3275911, %v414_v63  ;;  %3051 = vmatprep.subr.msk.bf16.mxu1 %vm188_vm1, %v4142_v46  ;;  %v525_v61 = vsub.f32 0.0, %v413_v13  ;;  %vm570_vm11 = vcmp.ge.f32.partialorder %v4085_v40, 0.0  ;;  %vm569_vm12 = vcmp.ge.f32.partialorder %v4090_v8, 0.0 }
 0x464   :  { %3146 = vrcp.f32 %v429_v62  ;;  %v423_v48 = vmul.f32 0.3275911, %v415_v29  ;;  %v542_v56 = vmul.f32 1.442695, %v531_v18  ;;  %v527_v18 = vsub.f32 0.0, %v415_v29 }
 0x465   :  { %v4131_v33 = vpop.eup %3136  ;;  %3148 = vpow2.f32 %v540_v44  ;;  %v430_v62 = vadd.f32 1.0, %v422_v10  ;;  %v532_v10 = vmul.f32 %v524_v14, %v412_v24  ;;  %v533_v15 = vmul.f32 %v525_v61, %v413_v13 }
 0x466   :  { %v448_v3 = vmul.f32 1.0614054, %v4131_v33  ;;  %3150 = vpow2.f32 %v536_v9  ;;  %v431_v11 = vadd.f32 1.0, %v423_v48  ;;  %v526_v48 = vsub.f32 0.0, %v414_v63 }
 0x467   :  { %3152 = vpow2.f32 %v538_v45  ;;  %v4160_v45 = vmul.f32 0.5, %v4068_v7  ;;  %v544_v14 = vmul.f32 1.442695, %v532_v10  ;;  %vm571_vm13 = vcmp.ge.f32.partialorder %v4100_v49, 0.0 }
 0x468   :  { %v2792_v32 = vadd.f32 -1.4531521, %v448_v3  ;;  %3154 = vrcp.f32 %v430_v62  ;;  %vm572_vm14 = vcmp.ge.f32.partialorder %v4113_v34, 0.0  ;;  %vm573_vm15 = vcmp.ge.f32.partialorder %v4117_v23, 0.0 }
 0x469   :  { %v4144_v58 = vpop.eup %3138  ;;  %3156 = vrcp.f32 %v431_v11  ;;  %v396_v34 = vmul.f32 0.5, %v4106_v43  ;;  %vm574_vm2 = vcmp.ge.f32.partialorder %v4134_v12, 0.0  ;;  %vm575_vm3 = vcmp.ge.f32.partialorder %v4137_v47, 0.0 }
 0x46a   :  { %v4148_v53 = vpop.eup %3140  ;;  %v464_v36 = vmul.f32 %v4131_v33, %v2792_v32  ;;  %v450_v19 = vmul.f32 1.0614054, %v4144_v58  ;;  %3158 = vpow2.f32 %v542_v56 }
 0x46b   :  { %v449_v3 = vmul.f32 1.0614054, %v4148_v53  ;;  %3160 = vpow2.f32 %v544_v14 }
 0x46c   :  { %v472_v20 = vadd.f32 1.4214138, %v464_v36  ;;  %v2794_v44 = vadd.f32 -1.4531521, %v450_v19 }
 0x46d   :  { %v2793_v51 = vadd.f32 -1.4531521, %v449_v3 }
 0x46e   :  { %v4153_v41 = vpop.eup %3142  ;;  %v480_v5 = vmul.f32 %v4131_v33, %v472_v20  ;;  %v466_v9 = vmul.f32 %v4144_v58, %v2794_v44  ;;  %v4163_v20 = vmul.f32 0.5, %v4082_v31 }
 0x46f   :  { %v465_v39 = vmul.f32 %v4148_v53, %v2793_v51  ;;  %v451_v32 = vmul.f32 1.0614054, %v4153_v41  ;;  %v4167_v44 = vpop.eup %3144 }
 0x470   :  { %v2800_v36 = vadd.f32 -0.28449672, %v480_v5  ;;  %v474_v19 = vadd.f32 1.4214138, %v466_v9  ;;  %v534_v5 = vmul.f32 %v526_v48, %v414_v63  ;;  %v452_v61 = vmul.f32 1.0614054, %v4167_v44 }
 0x471   :  { %v473_v3 = vadd.f32 1.4214138, %v465_v39  ;;  %v2795_v62 = vadd.f32 -1.4531521, %v451_v32  ;;  %v4172_v56 = vpop.eup %3146  ;;  %v546_v32 = vmul.f32 1.442695, %v533_v15 }
 0x472   :  { %v496_v11 = vmul.f32 %v4131_v33, %v2800_v36  ;;  %v482_v51 = vmul.f32 %v4144_v58, %v474_v19  ;;  %v535_v36 = vmul.f32 %v527_v18, %v415_v29  ;;  %v3149_v19 = vpop.eup %3148  ;;  %v453_v10 = vmul.f32 1.0614054, %v4172_v56 }
 0x473   :  { %v481_v24 = vmul.f32 %v4148_v53, %v473_v3  ;;  %v467_v7 = vmul.f32 %v4153_v41, %v2795_v62  ;;  %v2796_v63 = vadd.f32 -1.4531521, %v452_v61  ;;  %v3151_v48 = vpop.eup %3150  ;;  %3162 = vpow2.f32 %v546_v32 }
 0x474   :  { %v504_v9 = vadd.f32 0.2548296, %v496_v11  ;;  %v2802_v39 = vadd.f32 -0.28449672, %v482_v51  ;;  %v548_v51 = vmul.f32 1.442695, %v534_v5  ;;  %v3153_v29 = vpop.eup %3152 }
 0x475   :  { %v2801_v31 = vadd.f32 -0.28449672, %v481_v24  ;;  %v475_v13 = vadd.f32 1.4214138, %v467_v7  ;;  %v2797_v7 = vadd.f32 -1.4531521, %v453_v10  ;;  %v468_v15 = vmul.f32 %v4167_v44, %v2796_v63 }
 0x476   :  { %v512_v38 = vmul.f32 %v4131_v33, %v504_v9  ;;  %v498_v3 = vmul.f32 %v4144_v58, %v2802_v39  ;;  %v550_v9 = vmul.f32 1.442695, %v535_v36  ;;  %v4182_v39 = vpop.eup %3154  ;;  %3164 = vpow2.f32 %v548_v51 }
 0x477   :  { %v497_v62 = vmul.f32 %v4148_v53, %v2801_v31  ;;  %v483_v11 = vmul.f32 %v4153_v41, %v475_v13  ;;  %v476_v5 = vadd.f32 1.4214138, %v468_v15  ;;  %v4187_v31 = vpop.eup %3156  ;;  %v454_v10 = vmul.f32 1.0614054, %v4182_v39 }
 0x478   :  { %v552_v24 = vmul.f32 %v3151_v48, %v512_v38  ;;  %v506_v59 = vadd.f32 0.2548296, %v498_v3  ;;  %v469_v38 = vmul.f32 %v4172_v56, %v2797_v7  ;;  %3166 = vpow2.f32 %v550_v9 }
 0x479   :  { %v505_v33 = vadd.f32 0.2548296, %v497_v62  ;;  %v2803_v18 = vadd.f32 -0.28449672, %v483_v11  ;;  %v484_v48 = vmul.f32 %v4167_v44, %v476_v5 }
 0x47a   :  { %v560_v61 = vsub.f32 1.0, %v552_v24  ;;  %v514_v14 = vmul.f32 %v4144_v58, %v506_v59  ;;  %v477_v63 = vadd.f32 1.4214138, %v469_v38  ;;  %v455_v59 = vmul.f32 1.0614054, %v4187_v31 }
 0x47b   :  { %v513_v13 = vmul.f32 %v4148_v53, %v505_v33  ;;  %v499_v3 = vmul.f32 %v4153_v41, %v2803_v18  ;;  %v2798_v58 = vadd.f32 -1.4531521, %v454_v10  ;;  %v2804_v15 = vadd.f32 -0.28449672, %v484_v48  ;;  %v3159_v33 = vpop.eup %3158 }
 0x47c   :  { %v576_v32 = vsub.f32 0.0, %v560_v61  ;;  %v554_v36 = vmul.f32 %v3149_v19, %v514_v14  ;;  %v485_v53 = vmul.f32 %v4172_v56, %v477_v63  ;;  %v2799_v19 = vadd.f32 -1.4531521, %v455_v59 }
 0x47d   :  { %v553_v62 = vmul.f32 %v3153_v29, %v513_v13  ;;  %v507_v11 = vadd.f32 0.2548296, %v499_v3  ;;  %v500_v29 = vmul.f32 %v4167_v44, %v2804_v15  ;;  %v470_v5 = vmul.f32 %v4182_v39, %v2798_v58 }
 0x47e   :  { %v584_v24 = vsel %vm568_vm10, %v560_v61, %v576_v32  ;;  %v562_v7 = vsub.f32 1.0, %v554_v36  ;;  %v2805_v38 = vadd.f32 -0.28449672, %v485_v53  ;;  %v471_v61 = vmul.f32 %v4187_v31, %v2799_v19 }
 0x47f   :  { %v561_v18 = vsub.f32 1.0, %v553_v62  ;;  %v515_v51 = vmul.f32 %v4153_v41, %v507_v11  ;;  %v592_v3 = vadd.f32 1.0, %v584_v24  ;;  %v508_v36 = vadd.f32 0.2548296, %v500_v29  ;;  %v3161_v62 = vpop.eup %3160 }
 0x480   :  { %v578_v14 = vsub.f32 0.0, %v562_v7  ;;  %v501_v32 = vmul.f32 %v4172_v56, %v2805_v38  ;;  %v478_v41 = vadd.f32 1.4214138, %v470_v5  ;;  %v479_v48 = vadd.f32 1.4214138, %v471_v61 }
 0x481   :  { %v577_v13 = vsub.f32 0.0, %v561_v18  ;;  %v555_v0 = vmul.f32 %v3159_v33, %v515_v51  ;;  %v516_v58 = vmul.f32 %v4167_v44, %v508_v36  ;;  %v600_v40 = vmul.f32 %v592_v3, %v4160_v45  ;;  %v3163_v33 = vpop.eup %3162 }
 0x482   :  { %v586_v10 = vsel %vm570_vm11, %v562_v7, %v578_v14  ;;  %v509_v59 = vadd.f32 0.2548296, %v501_v32  ;;  %v486_v24 = vmul.f32 %v4182_v39, %v478_v41  ;;  %v487_v15 = vmul.f32 %v4187_v31, %v479_v48 }
 0x483   :  { %v585_v9 = vsel %vm569_vm12, %v561_v18, %v577_v13  ;;  %v563_v63 = vsub.f32 1.0, %v555_v0  ;;  %v594_v53 = vadd.f32 1.0, %v586_v10  ;;  %v556_v18 = vmul.f32 %v3161_v62, %v516_v58  ;;  %v3165_v45 = vpop.eup %3164 }
 0x484   :  { %v593_v11 = vadd.f32 1.0, %v585_v9  ;;  %v517_v8 = vmul.f32 %v4172_v56, %v509_v59  ;;  %v2806_v19 = vadd.f32 -0.28449672, %v486_v24  ;;  %v394_v14 = vmul.f32 0.5, %v4077_v25 }
 0x485   :  { %v579_v7 = vsub.f32 0.0, %v563_v63  ;;  %v395_v38 = vmul.f32 0.5, %v4094_v42  ;;  %v2807_v29 = vadd.f32 -0.28449672, %v487_v15  ;;  %v564_v0 = vsub.f32 1.0, %v556_v18  ;;  %v3167_v41 = vpop.eup %3166 }
 0x486   :  { %v601_v51 = vmul.f32 %v593_v11, %v4163_v20  ;;  %v557_v3 = vmul.f32 %v3163_v33, %v517_v8  ;;  %v502_v61 = vmul.f32 %v4182_v39, %v2806_v19  ;;  %v602_v56 = vmul.f32 %v594_v53, %v394_v14 }
 0x487   :  { %v587_v44 = vsel %vm571_vm13, %v563_v63, %v579_v7  ;;  %v503_v20 = vmul.f32 %v4187_v31, %v2807_v29  ;;  %v580_v32 = vsub.f32 0.0, %v564_v0  ;;  %v1643_v36 = vsel %vm188_vm1, %v4142_v46, 0 }
 0x488   :  { %v608_v5 = vpack.c.bf16 %v601_v51, %v600_v40  ;;  %v595_v13 = vadd.f32 1.0, %v587_v44  ;;  %v565_v25 = vsub.f32 1.0, %v557_v3  ;;  %v510_v42 = vadd.f32 0.2548296, %v502_v61 }
 0x489   :  { %v511_v49 = vadd.f32 0.2548296, %v503_v20  ;;  %v588_v48 = vsel %vm572_vm14, %v564_v0, %v580_v32  ;;  %v2144_v62 = vrot.slane %v4142_v46, 2  ;;  %v397_v40 = vmul.f32 0.5, %v4110_v50 }
 0x48a   :  { %2985 = vmatprep.mubr.msk.bf16.mxu1 %vm175_vm0, %v608_v5  ;;  %v603_v10 = vmul.f32 %v595_v13, %v395_v38  ;;  %v581_v63 = vsub.f32 0.0, %v565_v25  ;;  %v596_v11 = vadd.f32 1.0, %v588_v48  ;;  %v518_v59 = vmul.f32 %v4182_v39, %v510_v42 }
 0x48b   :  { %v519_v58 = vmul.f32 %v4187_v31, %v511_v49  ;;  %v398_v19 = vmul.f32 0.5, %v4123_v30  ;;  %v399_v14 = vmul.f32 0.5, %v4126_v60 }
 0x48c   :  { %v609_v9 = vpack.c.bf16 %v603_v10, %v602_v56  ;;  %v589_v24 = vsel %vm573_vm15, %v565_v25, %v581_v63  ;;  %v558_v53 = vmul.f32 %v3165_v45, %v518_v59  ;;  %v604_v23 = vmul.f32 %v596_v11, %v396_v34 }
 0x48d   :  { %v597_v7 = vadd.f32 1.0, %v589_v24  ;;  %v559_v15 = vmul.f32 %v3167_v41, %v519_v58 }
 0x48e   :  { %2986 = vmatmul.mubr.msk.bf16.vlgmr.msra.gmra.mxu1 %vm175_vm0, %v609_v9  ;;  %v566_v39 = vsub.f32 1.0, %v558_v53 }
 0x48f   :  { %3004 = vmatpush3.bf16.msra.mxu1 %v1643_v36  ;;  %v605_v33 = vmul.f32 %v597_v7, %v397_v40  ;;  %v567_v51 = vsub.f32 1.0, %v559_v15 }
 0x490   :  { %3053 = vmatprep.subr.msk.bf16.mxu1 %vm188_vm1, %v2144_v62  ;;  %v582_v8 = vsub.f32 0.0, %v566_v39 }
 0x491   :  { %v610_v31 = vpack.c.bf16 %v605_v33, %v604_v23  ;;  %v583_v18 = vsub.f32 0.0, %v567_v51 }
 0x492   :  { %v590_v43 = vsel %vm574_vm2, %v566_v39, %v582_v8 }
 0x493   :  { %2989 = vmatprep.mubr.msk.bf16.mxu1 %vm175_vm0, %v610_v31  ;;  %v591_v50 = vsel %vm575_vm3, %v567_v51, %v583_v18  ;;  %v598_v38 = vadd.f32 1.0, %v590_v43 }
 0x494   :  { %v599_v44 = vadd.f32 1.0, %v591_v50 }
 0x495   :  { %v606_v29 = vmul.f32 %v598_v38, %v398_v19 }
 0x496   :  { %v607_v45 = vmul.f32 %v599_v44, %v399_v14 }
 0x498   :  { %v611_v5 = vpack.c.bf16 %v607_v45, %v606_v29 }
 0x49a   :  { %2990 = vmatmul.mubr.msk.bf16.gmra.mxu1 %vm175_vm0, %v611_v5 }
 0x4a8   :  { %v1339_v13 = vpop.xlane.xlu1 %1338 }
 0x4a9   :  { %v1361_v3 = vmul.f32 0.25, %v1339_v13 }
 0x4ab   :  { %v1369_v12 = vadd.f32 1e-06, %v1361_v3 }
 0x4ac   :  { %v1345_v0 = vpop.xlane.xlu1 %1344  ;;  %v1342_v47 = vpop.xlane.xlu0 %1341 }
 0x4ad   :  { %3168 = vrsqrt.f32 %v1369_v12  ;;  %v1363_v61 = vmul.f32 0.25, %v1345_v0  ;;  %v1362_v20 = vmul.f32 0.25, %v1342_v47 }
 0x4af   :  { %v1371_v56 = vadd.f32 1e-06, %v1363_v61  ;;  %v1370_v10 = vadd.f32 1e-06, %v1362_v20 }
 0x4b0   :  { %v1351_v30 = vpop.xlane.xlu1 %1350  ;;  %v1348_v25 = vpop.xlane.xlu0 %1347 }
 0x4b1   :  { %3170 = vrsqrt.f32 %v1371_v56  ;;  %v1364_v60 = vmul.f32 0.25, %v1348_v25  ;;  %v1365_v36 = vmul.f32 0.25, %v1351_v30 }
 0x4b2   :  { %3172 = vrsqrt.f32 %v1370_v10 }
 0x4b3   :  { %v1372_v32 = vadd.f32 1e-06, %v1364_v60  ;;  %v1373_v11 = vadd.f32 1e-06, %v1365_v36 }
 0x4b4   :  { %v1357_v42 = vpop.xlane.xlu1 %1356  ;;  %v1354_v49 = vpop.xlane.xlu0 %1353 }
 0x4b5   :  { %3174 = vrsqrt.f32 %v1372_v32  ;;  %v1366_v41 = vmul.f32 0.25, %v1354_v49  ;;  %v1367_v59 = vmul.f32 0.25, %v1357_v42 }
 0x4b6   :  { %3176 = vrsqrt.f32 %v1373_v11 }
 0x4b7   :  { %v1374_v34 = vadd.f32 1e-06, %v1366_v41  ;;  %v1375_v33 = vadd.f32 1e-06, %v1367_v59 }
 0x4b8   :  { %v1853_v9 = vpop.xlane.xlu1 %1852  ;;  %v1360_v63 = vpop.xlane.xlu0 %1359 }
 0x4b9   :  { %v1875_v24 = vmul.f32 0.25, %v1853_v9  ;;  %v1368_v31 = vmul.f32 0.25, %v1360_v63  ;;  %3178 = vrsqrt.f32 %v1374_v34 }
 0x4ba   :  { %v3169_v48 = vpop.eup %3168 }
 0x4bb   :  { %v1385_v58 = vmul.f32 %v3169_v48, %v3959_v55  ;;  %v1883_v43 = vadd.f32 1e-06, %v1875_v24 }
 0x4bc   :  { %v1859_v40 = vpop.xlane.xlu1 %1858  ;;  %v1856_v7 = vpop.xlane.xlu0 %1855 }
 0x4bd   :  { %v1877_v53 = vmul.f32 0.25, %v1859_v40  ;;  %v1393_v15 = vmul.f32 %v4058_v21, %v1385_v58  ;;  %v1876_v50 = vmul.f32 0.25, %v1856_v7 }
 0x4be   :  { %v3171_v23 = vpop.eup %3170 }
 0x4bf   :  { %v3173_v39 = vpop.eup %3172  ;;  %v1387_v51 = vmul.f32 %v3171_v23, %v3964_v4  ;;  %v1885_v8 = vadd.f32 1e-06, %v1877_v53  ;;  %v4243_v18 = vadd.f32 %v4065_v27, %v1393_v15  ;;  %v1884_v0 = vadd.f32 1e-06, %v1876_v50 }
 0x4c0   :  { %v1386_v55 = vmul.f32 %v3173_v39, %v3967_v6  ;;  %v1865_v19 = vpop.xlane.xlu1 %1864  ;;  %v1862_v14 = vpop.xlane.xlu0 %1861  ;;  %v1376_v6 = vadd.f32 1e-06, %v1368_v31 }
 0x4c1   :  { %v1395_v38 = vmul.f32 %v4058_v21, %v1387_v51  ;;  %3180 = vrsqrt.f32 %v1885_v8  ;;  %v1879_v44 = vmul.f32 0.25, %v1865_v19  ;;  %v1878_v29 = vmul.f32 0.25, %v1862_v14 }
 0x4c2   :  { %v1394_v45 = vmul.f32 %v4058_v21, %v1386_v55  ;;  %v4249_v4 = vmul.f32 0.70710677, %v4243_v18  ;;  %v3175_v5 = vpop.eup %3174  ;;  %3182 = vrsqrt.f32 %v1375_v33 }
 0x4c3   :  { %v4252_v13 = vadd.f32 %v4065_v27, %v1395_v38  ;;  %v1886_v3 = vadd.f32 1e-06, %v1878_v29  ;;  %v1388_v12 = vmul.f32 %v3175_v5, %v3978_v57  ;;  %3184 = vrsqrt.f32 %v1883_v43  ;;  %v3177_v58 = vpop.eup %3176 }
 0x4c4   :  { %v1871_v47 = vpop.xlane.xlu1 %1870  ;;  %v1868_v61 = vpop.xlane.xlu0 %1867  ;;  %v1402_v20 = vadd.f32 %v4065_v27, %v1394_v45  ;;  %v1887_v10 = vadd.f32 1e-06, %v1879_v44  ;;  %v1425_v42 = vand.u32 2147483647, %v4249_v4  ;;  %v1389_v39 = vmul.f32 %v3177_v58, %v3975_v16 }
 0x4c5   :  { %v4257_v56 = vmul.f32 0.70710677, %v4252_v13  ;;  %v1881_v30 = vmul.f32 0.25, %v1871_v47  ;;  %v1880_v25 = vmul.f32 0.25, %v1868_v61  ;;  %v1396_v60 = vmul.f32 %v4058_v21, %v1388_v12 }
 0x4c6   :  { %3186 = vrsqrt.f32 %v1886_v3  ;;  %v4260_v32 = vmul.f32 0.70710677, %v1402_v20  ;;  %v1433_v11 = vmul.f32 0.3275911, %v1425_v42  ;;  %v3179_v15 = vpop.eup %3178  ;;  %v1537_v31 = vsub.f32 0.0, %v1425_v42 }
 0x4c7   :  { %v1427_v57 = vand.u32 2147483647, %v4257_v56  ;;  %3188 = vrsqrt.f32 %v1376_v6  ;;  %v4265_v49 = vadd.f32 %v4065_v27, %v1396_v60  ;;  %v1889_v36 = vadd.f32 1e-06, %v1881_v30 }
 0x4c8   :  { %3190 = vrsqrt.f32 %v1884_v0  ;;  %v1426_v41 = vand.u32 2147483647, %v4260_v32  ;;  %v1888_v63 = vadd.f32 1e-06, %v1880_v25  ;;  %v1874_v7 = vpop.xlane.xlu0 %1873  ;;  %v1441_v53 = vadd.f32 1.0, %v1433_v11 }
 0x4c9   :  { %v1435_v9 = vmul.f32 0.3275911, %v1427_v57  ;;  %v4269_v48 = vmul.f32 0.70710677, %v4265_v49  ;;  %3192 = vrsqrt.f32 %v1887_v10  ;;  %v1539_v24 = vsub.f32 0.0, %v1427_v57 }
 0x4ca   :  { %v1434_v59 = vmul.f32 0.3275911, %v1426_v41  ;;  %3194 = vrsqrt.f32 %v1889_v36  ;;  %v1882_v50 = vmul.f32 0.25, %v1874_v7  ;;  %v1390_v38 = vmul.f32 %v3179_v15, %v3990_v1 }
 0x4cb   :  { %v1443_v34 = vadd.f32 1.0, %v1435_v9  ;;  %v1428_v40 = vand.u32 2147483647, %v4269_v48  ;;  %v1547_v8 = vmul.f32 %v1539_v24, %v1427_v57  ;;  %v1538_v44 = vsub.f32 0.0, %v1426_v41 }
 0x4cc   :  { %v1442_v23 = vadd.f32 1.0, %v1434_v59  ;;  %v1545_v16 = vmul.f32 %v1537_v31, %v1425_v42  ;;  %v1397_v1 = vmul.f32 %v4058_v21, %v1389_v39  ;;  %v1398_v10 = vmul.f32 %v4058_v21, %v1390_v38 }
 0x4cd   :  { %3196 = vrcp.f32 %v1443_v34  ;;  %v1436_v51 = vmul.f32 0.3275911, %v1428_v40  ;;  %v1540_v55 = vsub.f32 0.0, %v1428_v40  ;;  %v1557_v6 = vmul.f32 1.442695, %v1547_v8 }
 0x4ce   :  { %v3181_v33 = vpop.eup %3180  ;;  %3198 = vrsqrt.f32 %v1888_v63  ;;  %v1546_v61 = vmul.f32 %v1538_v44, %v1426_v41  ;;  %v4284_v60 = vmul.f32 0.5, %v4243_v18  ;;  %v4286_v42 = vmul.f32 0.5, %v1402_v20 }
 0x4cf   :  { %v1901_v43 = vmul.f32 %v3181_v33, %v4011_v37  ;;  %v3183_v19 = vpop.eup %3182  ;;  %v1444_v14 = vadd.f32 1.0, %v1436_v51  ;;  %3200 = vrcp.f32 %v1441_v53  ;;  %v1548_v3 = vmul.f32 %v1540_v55, %v1428_v40 }
 0x4d0   :  { %v3185_v29 = vpop.eup %3184  ;;  %3202 = vrcp.f32 %v1442_v23  ;;  %v1890_v37 = vadd.f32 1e-06, %v1882_v50  ;;  %v1391_v25 = vmul.f32 %v3183_v19, %v3987_v52  ;;  %v4291_v57 = vsel %vm188_vm1, %v2144_v62, 0 }
 0x4d1   :  { %v1909_v45 = vmul.f32 %v4058_v21, %v1901_v43  ;;  %3204 = vrcp.f32 %v1444_v14  ;;  %v1553_v36 = vmul.f32 1.442695, %v1545_v16  ;;  %v1405_v41 = vadd.f32 %v4065_v27, %v1397_v1 }
 0x4d2   :  { %v1406_v9 = vadd.f32 %v4065_v27, %v1398_v10  ;;  %v1559_v11 = vmul.f32 1.442695, %v1548_v3  ;;  %v1899_v52 = vmul.f32 %v3185_v29, %v3999_v22  ;;  %3206 = vrsqrt.f32 %v1890_v37 }
 0x4d3   :  { %v3187_v5 = vpop.eup %3186  ;;  %v4277_v12 = vadd.f32 %v4065_v27, %v1909_v45  ;;  %3208 = vpow2.f32 %v1557_v6  ;;  %v1555_v20 = vmul.f32 1.442695, %v1546_v61  ;;  %v4305_v58 = vmul.f32 0.5, %v4252_v13 }
 0x4d4   :  { %v3189_v0 = vpop.eup %3188  ;;  %v1902_v47 = vmul.f32 %v3187_v5, %v4026_v17  ;;  %v4308_v34 = vmul.f32 0.5, %v4265_v49  ;;  %v4310_v24 = vmul.f32 0.70710677, %v1405_v41  ;;  %v1399_v22 = vmul.f32 %v4058_v21, %v1391_v25 }
 0x4d5   :  { %v3191_v30 = vpop.eup %3190  ;;  %v4298_v18 = vmul.f32 0.70710677, %v4277_v12  ;;  %v1392_v46 = vmul.f32 %v3189_v0, %v4002_v2  ;;  %3210 = vpow2.f32 %v1553_v36  ;;  %v4329_v33 = vmul.f32 %v4058_v21, %v1899_v52 }
 0x4d6   :  { %v1910_v17 = vmul.f32 %v4058_v21, %v1902_v47  ;;  %v3193_v63 = vpop.eup %3192  ;;  %v4302_v62 = vmul.f32 %v3191_v30, %v4014_v54  ;;  %v4321_v54 = vmul.f32 0.70710677, %v1406_v9  ;;  %3212 = vpow2.f32 %v1559_v11 }
 0x4d7   :  { %v3195_v59 = vpop.eup %3194  ;;  %v4316_v7 = vmul.f32 %v3193_v63, %v4023_v26  ;;  %v1941_v49 = vand.u32 2147483647, %v4298_v18  ;;  %v1429_v15 = vand.u32 2147483647, %v4310_v24  ;;  %3214 = vpow2.f32 %v1555_v20 }
 0x4d8   :  { %v4319_v2 = vadd.f32 %v4065_v27, %v1910_v17  ;;  %v1430_v23 = vand.u32 2147483647, %v4321_v54  ;;  %v1400_v26 = vmul.f32 %v4058_v21, %v1392_v46  ;;  %v4334_v51 = vmul.f32 %v3195_v59, %v4035_v35 }
 0x4d9   :  { %v1437_v8 = vmul.f32 0.3275911, %v1429_v15  ;;  %v1407_v55 = vadd.f32 %v4065_v27, %v1399_v22  ;;  %v4346_v38 = vmul.f32 0.5, %v1405_v41  ;;  %v1949_v35 = vmul.f32 0.3275911, %v1941_v49 }
 0x4da   :  { %v4313_v40 = vpop.eup %3196  ;;  %v4340_v50 = vmul.f32 0.70710677, %v4319_v2  ;;  %v1438_v16 = vmul.f32 0.3275911, %v1430_v23  ;;  %v2053_v5 = vsub.f32 0.0, %v1941_v49  ;;  %v4353_v37 = vmul.f32 0.5, %v1406_v9 }
 0x4db   :  { %v3199_v13 = vpop.eup %3198  ;;  %v1467_v53 = vmul.f32 1.0614054, %v4313_v40  ;;  %v1445_v47 = vadd.f32 1.0, %v1437_v8  ;;  %v4360_v25 = vadd.f32 %v4065_v27, %v1400_v26  ;;  %v1541_v41 = vsub.f32 0.0, %v1429_v15 }
 0x4dc   :  { %v4331_v39 = vpop.eup %3200  ;;  %v4343_v19 = vmul.f32 %v3199_v13, %v4038_v28  ;;  %v1446_v61 = vadd.f32 1.0, %v1438_v16  ;;  %v4356_v1 = vand.u32 2147483647, %v4340_v50  ;;  %v2061_v63 = vmul.f32 %v2053_v5, %v1941_v49 }
 0x4dd   :  { %v2842_v31 = vadd.f32 -1.4531521, %v1467_v53  ;;  %v4337_v43 = vpop.eup %3202  ;;  %v1465_v14 = vmul.f32 1.0614054, %v4331_v39  ;;  %3216 = vrcp.f32 %v1445_v47  ;;  %v1542_v46 = vsub.f32 0.0, %v1430_v23 }
 0x4de   :  { %v4348_v44 = vpop.eup %3204  ;;  %v1466_v29 = vmul.f32 1.0614054, %v4337_v43  ;;  %v1957_v59 = vadd.f32 1.0, %v1949_v35  ;;  %3218 = vrcp.f32 %v1446_v61  ;;  %v1950_v27 = vmul.f32 0.3275911, %v4356_v1 }
 0x4df   :  { %v1483_v45 = vmul.f32 %v4313_v40, %v2842_v31  ;;  %v2840_v6 = vadd.f32 -1.4531521, %v1465_v14  ;;  %v1468_v3 = vmul.f32 1.0614054, %v4348_v44  ;;  %v4364_v9 = vpop.eup %3206  ;;  %v4369_v31 = vmul.f32 0.5, %v1407_v55 }
 0x4e0   :  { %v2841_v28 = vadd.f32 -1.4531521, %v1466_v29  ;;  %v3209_v20 = vpop.eup %3208  ;;  %v1549_v29 = vmul.f32 %v1541_v41, %v1429_v15  ;;  %v4377_v16 = vmul.f32 1.442695, %v2061_v63  ;;  %3220 = vrcp.f32 %v1957_v59 }
 0x4e1   :  { %v1491_v0 = vadd.f32 1.4214138, %v1483_v45  ;;  %v1481_v10 = vmul.f32 %v4331_v39, %v2840_v6  ;;  %v2843_v30 = vadd.f32 -1.4531521, %v1468_v3  ;;  %v4375_v45 = vmul.f32 %v4058_v21, %v4302_v62 }
 0x4e2   :  { %v1482_v17 = vmul.f32 %v4337_v43, %v2841_v28  ;;  %v3211_v8 = vpop.eup %3210  ;;  %v1550_v3 = vmul.f32 %v1542_v46, %v1430_v23  ;;  %v4380_v61 = vmul.f32 0.70710677, %v1407_v55  ;;  %vm1587_vm1 = vcmp.ge.f32.partialorder %v4257_v56, 0.0 }
 0x4e3   :  { %v1499_v36 = vmul.f32 %v4313_v40, %v1491_v0  ;;  %v1489_v11 = vadd.f32 1.4214138, %v1481_v10  ;;  %v1484_v52 = vmul.f32 %v4348_v44, %v2843_v30  ;;  %v3213_v35 = vpop.eup %3212  ;;  %v1958_v15 = vadd.f32 1.0, %v1950_v27 }
 0x4e4   :  { %v1490_v22 = vadd.f32 1.4214138, %v1482_v17  ;;  %v3215_v28 = vpop.eup %3214  ;;  %v4385_v62 = vmul.f32 0.70710677, %v4360_v25  ;;  %v1561_v23 = vmul.f32 1.442695, %v1549_v29 }
 0x4e5   :  { %v2850_v13 = vadd.f32 -0.28449672, %v1499_v36  ;;  %v1497_v53 = vmul.f32 %v4331_v39, %v1489_v11  ;;  %v1492_v26 = vadd.f32 1.4214138, %v1484_v52  ;;  %v1431_v36 = vand.u32 2147483647, %v4380_v61 }
 0x4e6   :  { %v1498_v14 = vmul.f32 %v4337_v43, %v1490_v22  ;;  %v1563_v63 = vmul.f32 1.442695, %v1550_v3  ;;  %v1432_v11 = vand.u32 2147483647, %v4385_v62  ;;  %v2054_v52 = vsub.f32 0.0, %v4356_v1 }
 0x4e7   :  { %v1515_v49 = vmul.f32 %v4313_v40, %v2850_v13  ;;  %v2848_v5 = vadd.f32 -0.28449672, %v1497_v53  ;;  %v1500_v6 = vmul.f32 %v4348_v44, %v1492_v26  ;;  %vm1585_vm4 = vcmp.ge.f32.partialorder %v4249_v4, 0.0 }
 0x4e8   :  { %v2849_v0 = vadd.f32 -0.28449672, %v1498_v14  ;;  %v1439_v22 = vmul.f32 0.3275911, %v1431_v36  ;;  %3222 = vrcp.f32 %v1958_v15  ;;  %vm1586_vm5 = vcmp.ge.f32.partialorder %v4260_v32, 0.0 }
 0x4e9   :  { %v1523_v47 = vadd.f32 0.2548296, %v1515_v49  ;;  %v1513_v10 = vmul.f32 %v4331_v39, %v2848_v5  ;;  %v2851_v21 = vadd.f32 -0.28449672, %v1500_v6  ;;  %v1440_v27 = vmul.f32 0.3275911, %v1432_v11 }
 0x4ea   :  { %v1514_v30 = vmul.f32 %v4337_v43, %v2849_v0  ;;  %vm1588_vm6 = vcmp.ge.f32.partialorder %v4269_v48, 0.0  ;;  %3224 = vpow2.f32 %v1561_v23  ;;  %v1447_v14 = vadd.f32 1.0, %v1439_v22  ;;  %v4398_v49 = vpop.eup %3216  ;;  %v4411_v23 = vld [vmem:[%s4852_s8] ss:$0 sm:$0xff]  ;;  %s3317_s8 = scalar_lea.vmem %s2767_s1, 128 }
 0x4eb   :  { %v1531_v17 = vmul.f32 %v4313_v40, %v1523_v47  ;;  %v1521_v41 = vadd.f32 0.2548296, %v1513_v10  ;;  %v1516_v55 = vmul.f32 %v4348_v44, %v2851_v21  ;;  %3226 = vpow2.f32 %v1563_v63  ;;  %v4402_v0 = vpop.eup %3218  ;;  %p3318_p0 = scmp.ne.s32.totalorder %s2767_s1, %s3317_s8  ;;  %p3323_p2 = scmp.lt.s32.totalorder %s3317_s8, %s3317_s8 }
 0x4ec   :  { %v1522_v46 = vadd.f32 0.2548296, %v1514_v30  ;;  %v1448_v5 = vadd.f32 1.0, %v1440_v27  ;;  %v1469_v3 = vmul.f32 1.0614054, %v4398_v49  ;;  %3228 = vrcp.f32 %v1447_v14 }
 0x4ed   :  { %v1571_v59 = vmul.f32 %v3209_v20, %v1531_v17  ;;  %v1529_v13 = vmul.f32 %v4331_v39, %v1521_v41  ;;  %v1524_v40 = vadd.f32 0.2548296, %v1516_v55  ;;  %v2062_v47 = vmul.f32 %v2054_v52, %v4356_v1  ;;  %v4418_v63 = vpop.eup %3220  ;;  %p3324_p3 = por %p3323_p2, %p3322_p1 }
 0x4ee   :  { %v1530_v53 = vmul.f32 %v4337_v43, %v1522_v46  ;;  %3230 = vrcp.f32 %v1448_v5  ;;  %v2844_v21 = vadd.f32 -1.4531521, %v1469_v3  ;;  %v1543_v17 = vsub.f32 0.0, %v1431_v36 }
 0x4ef   :  { %v1579_v26 = vsub.f32 1.0, %v1571_v59  ;;  %v1569_v29 = vmul.f32 %v3211_v8, %v1529_v13  ;;  %v1532_v20 = vmul.f32 %v4348_v44, %v1524_v40  ;;  %v1470_v44 = vmul.f32 1.0614054, %v4402_v0  ;;  %p3325_p4 = pnand %p3324_p3, %p3318_p0 }
 0x4f0   :  { %v1570_v6 = vmul.f32 %v3215_v28, %v1530_v53  ;;  %v4415_v1 = vadd.f32 %v4411_v23, %v4329_v33  ;;  %v1485_v56 = vmul.f32 %v4398_v49, %v2844_v21  ;;  %v1544_v55 = vsub.f32 0.0, %v1432_v11 }
 0x4f1   :  { %v1595_v39 = vsub.f32 0.0, %v1579_v26  ;;  %v1577_v43 = vsub.f32 1.0, %v1569_v29  ;;  %v1572_v15 = vmul.f32 %v3213_v35, %v1532_v20  ;;  %v2845_v41 = vadd.f32 -1.4531521, %v1470_v44 }
 0x4f2   :  { %v1578_v10 = vsub.f32 1.0, %v1570_v6  ;;  %v4424_v22 = vadd.f32 %v4411_v23, %v4375_v45  ;;  %v1493_v27 = vadd.f32 1.4214138, %v1485_v56  ;;  %v2073_v53 = vmul.f32 1.442695, %v2062_v47 }
 0x4f3   :  { %v1603_v8 = vsel %vm1587_vm1, %v1579_v26, %v1595_v39  ;;  %v1593_v30 = vsub.f32 0.0, %v1577_v43  ;;  %v1580_v28 = vsub.f32 1.0, %v1572_v15  ;;  %v1486_v40 = vmul.f32 %v4402_v0, %v2845_v41 }
 0x4f4   :  { %v1594_v35 = vsub.f32 0.0, %v1578_v10  ;;  %v1611_v59 = vadd.f32 1.0, %v1603_v8  ;;  %v1551_v4 = vmul.f32 %v1543_v17, %v1431_v36  ;;  %v1501_v5 = vmul.f32 %v4398_v49, %v1493_v27 }
 0x4f5   :  { %v1601_v52 = vsel %vm1585_vm4, %v1577_v43, %v1593_v30  ;;  %v1596_v46 = vsub.f32 0.0, %v1580_v28  ;;  %v1494_v20 = vadd.f32 1.4214138, %v1486_v40  ;;  %v1552_v6 = vmul.f32 %v1544_v55, %v1432_v11  ;;  %v4440_v47 = vpop.eup %3222 }
 0x4f6   :  { %v1602_v33 = vsel %vm1586_vm5, %v1578_v10, %v1594_v35  ;;  %v1609_v13 = vadd.f32 1.0, %v1601_v52  ;;  %v4435_v39 = vmul.f32 0.70710677, %v4415_v1  ;;  %v4438_v3 = vmul.f32 0.70710677, %v4424_v22 }
 0x4f7   :  { %v1610_v26 = vadd.f32 1.0, %v1602_v33  ;;  %v1604_v14 = vsel %vm1588_vm6, %v1580_v28, %v1596_v46  ;;  %v1619_v48 = vmul.f32 %v1611_v59, %v4305_v58  ;;  %v1502_v43 = vmul.f32 %v4402_v0, %v1494_v20  ;;  %v3225_v11 = vpop.eup %3224 }
 0x4f8   :  { %v1612_v29 = vadd.f32 1.0, %v1604_v14  ;;  %v1617_v45 = vmul.f32 %v1609_v13, %v4284_v60  ;;  %v2852_v15 = vadd.f32 -0.28449672, %v1501_v5  ;;  %3232 = vpow2.f32 %v4377_v16  ;;  %v3227_v8 = vpop.eup %3226 }
 0x4f9   :  { %v1618_v32 = vmul.f32 %v1610_v26, %v4286_v42  ;;  %v1939_v42 = vand.u32 2147483647, %v4435_v39  ;;  %v1940_v10 = vand.u32 2147483647, %v4438_v3  ;;  %v2853_v21 = vadd.f32 -0.28449672, %v1502_v43  ;;  %v4449_v58 = vpop.eup %3228 }
 0x4fa   :  { %v1620_v36 = vmul.f32 %v1612_v29, %v4308_v34  ;;  %v1517_v30 = vmul.f32 %v4398_v49, %v2852_v15  ;;  %v1565_v28 = vmul.f32 1.442695, %v1551_v4  ;;  %3234 = vpow2.f32 %v2073_v53 }
 0x4fb   :  { %v1625_v60 = vpack.c.bf16 %v1618_v32, %v1617_v45  ;;  %v1947_v34 = vmul.f32 0.3275911, %v1939_v42  ;;  %v1948_v17 = vmul.f32 0.3275911, %v1940_v10  ;;  %v2051_v35 = vsub.f32 0.0, %v1939_v42  ;;  %v4452_v16 = vpop.eup %3230 }
 0x4fc   :  { %v1626_v44 = vpack.c.bf16 %v1620_v36, %v1619_v48  ;;  %v1518_v41 = vmul.f32 %v4402_v0, %v2853_v21  ;;  %v1525_v56 = vadd.f32 0.2548296, %v1517_v30  ;;  %v1471_v55 = vmul.f32 1.0614054, %v4449_v58 }
 0x4fd   :  { %3005 = vmatprep.mubr.msk.bf16.mxu1 %vm175_vm0, %v1625_v60  ;;  %v1567_v52 = vmul.f32 1.442695, %v1552_v6  ;;  %vm1589_vm7 = vcmp.ge.f32.partialorder %v4310_v24, 0.0  ;;  %v1472_v46 = vmul.f32 1.0614054, %v4452_v16  ;;  %v1955_v59 = vadd.f32 1.0, %v1947_v34 }
 0x4fe   :  { %3006 = vmatmul.mubr.msk.bf16.vlgmr.msra.gmra.mxu1 %vm175_vm0, %v1626_v44  ;;  %v1956_v33 = vadd.f32 1.0, %v1948_v17  ;;  %v2052_v13 = vsub.f32 0.0, %v1940_v10  ;;  %v1526_v40 = vadd.f32 0.2548296, %v1518_v41  ;;  %v1533_v27 = vmul.f32 %v4398_v49, %v1525_v56  ;;  %v4878_v24 = vld [vmem:[#allocation14_spill] sm:$0xff] }
 0x4ff   :  { %3024 = vmatpush3.bf16.msra.mxu1 %v4291_v57  ;;  %v2846_v53 = vadd.f32 -1.4531521, %v1471_v55  ;;  %3236 = vpow2.f32 %v1565_v28  ;;  %vm1590_vm8 = vcmp.ge.f32.partialorder %v4321_v54, 0.0  ;;  %v2847_v26 = vadd.f32 -1.4531521, %v1472_v46 }
 0x500   :  { %3238 = vrcp.f32 %v1955_v59  ;;  %v2059_v14 = vmul.f32 %v2051_v35, %v1939_v42  ;;  %v1981_v4 = vmul.f32 1.0614054, %v4418_v63  ;;  %v1534_v57 = vmul.f32 %v4402_v0, %v1526_v40  ;;  %v4470_v0 = vld [vmem:[%s4851_s7] ss:$0 sm:$0xff] }
 0x501   :  { %v1573_v29 = vmul.f32 %v3225_v11, %v1533_v27  ;;  %v1487_v20 = vmul.f32 %v4449_v58, %v2846_v53  ;;  %3240 = vrcp.f32 %v1956_v33  ;;  %v1488_v5 = vmul.f32 %v4452_v16, %v2847_v26 }
 0x502   :  { %3242 = vpow2.f32 %v1567_v52  ;;  %v2060_v6 = vmul.f32 %v2052_v13, %v1940_v10  ;;  %v1982_v49 = vmul.f32 1.0614054, %v4440_v47  ;;  %v1574_v45 = vmul.f32 %v3227_v8, %v1534_v57 }
 0x503   :  { %v1581_v32 = vsub.f32 1.0, %v1573_v29  ;;  %v1495_v48 = vadd.f32 1.4214138, %v1487_v20  ;;  %v2866_v36 = vadd.f32 -1.4531521, %v1981_v4  ;;  %v1911_v11 = vmul.f32 %v4470_v0, %v4316_v7 }
 0x504   :  { %v1496_v43 = vadd.f32 1.4214138, %v1488_v5  ;;  %v2067_v15 = vmul.f32 1.442695, %v2059_v14  ;;  %v2867_v60 = vadd.f32 -1.4531521, %v1982_v49  ;;  %v1912_v34 = vmul.f32 %v4470_v0, %v4343_v19 }
 0x505   :  { %v1582_v42 = vsub.f32 1.0, %v1574_v45  ;;  %v1597_v44 = vsub.f32 0.0, %v1581_v32  ;;  %v1503_v10 = vmul.f32 %v4449_v58, %v1495_v48  ;;  %v1997_v8 = vmul.f32 %v4418_v63, %v2866_v36  ;;  %v3233_v17 = vpop.eup %3232 }
 0x506   :  { %v1504_v21 = vmul.f32 %v4452_v16, %v1496_v43  ;;  %v2069_v30 = vmul.f32 1.442695, %v2060_v6  ;;  %v1998_v28 = vmul.f32 %v4440_v47, %v2867_v60  ;;  %v4483_v59 = vadd.f32 %v4411_v23, %v1911_v11 }
 0x507   :  { %v1598_v35 = vsub.f32 0.0, %v1582_v42  ;;  %v1605_v41 = vsel %vm1589_vm7, %v1581_v32, %v1597_v44  ;;  %v2854_v7 = vadd.f32 -0.28449672, %v1503_v10  ;;  %v2005_v56 = vadd.f32 1.4214138, %v1997_v8  ;;  %v3235_v33 = vpop.eup %3234 }
 0x508   :  { %v1613_v55 = vadd.f32 1.0, %v1605_v41  ;;  %v2855_v52 = vadd.f32 -0.28449672, %v1504_v21  ;;  %v2006_v46 = vadd.f32 1.4214138, %v1998_v28  ;;  %v4490_v27 = vadd.f32 %v4411_v23, %v1912_v34 }
 0x509   :  { %v1606_v13 = vsel %vm1590_vm8, %v1582_v42, %v1598_v35  ;;  %v1519_v40 = vmul.f32 %v4449_v58, %v2854_v7  ;;  %v2013_v19 = vmul.f32 %v4418_v63, %v2005_v56  ;;  %v4494_v53 = vmul.f32 %v4364_v9, %v4878_v24 }
 0x50a   :  { %v1614_v26 = vadd.f32 1.0, %v1606_v13  ;;  %v1520_v14 = vmul.f32 %v4452_v16, %v2855_v52  ;;  %v2014_v4 = vmul.f32 %v4440_v47, %v2006_v46  ;;  %v1621_v57 = vmul.f32 %v1613_v55, %v4346_v38 }
 0x50b   :  { %v1527_v54 = vadd.f32 0.2548296, %v1519_v40  ;;  %3244 = vpow2.f32 %v2067_v15  ;;  %v2874_v29 = vadd.f32 -0.28449672, %v2013_v19  ;;  %vm1591_vm9 = vcmp.ge.f32.partialorder %v4380_v61, 0.0 }
 0x50c   :  { %v3237_v20 = vpop.eup %3236  ;;  %v1622_v5 = vmul.f32 %v1614_v26, %v4353_v37  ;;  %v1528_v6 = vadd.f32 0.2548296, %v1520_v14  ;;  %v2875_v49 = vadd.f32 -0.28449672, %v2014_v4  ;;  %v4502_v9 = vmul.f32 0.70710677, %v4483_v59 }
 0x50d   :  { %v4504_v45 = vpop.eup %3238  ;;  %v1535_v32 = vmul.f32 %v4449_v58, %v1527_v54  ;;  %3246 = vpow2.f32 %v2069_v30  ;;  %v2029_v38 = vmul.f32 %v4418_v63, %v2874_v29  ;;  %v4509_v48 = vmul.f32 0.70710677, %v4490_v27 }
 0x50e   :  { %v4511_v36 = vpop.eup %3240  ;;  %v1627_v37 = vpack.c.bf16 %v1622_v5, %v1621_v57  ;;  %v1536_v43 = vmul.f32 %v4452_v16, %v1528_v6  ;;  %v1979_v15 = vmul.f32 1.0614054, %v4504_v45  ;;  %v2030_v60 = vmul.f32 %v4440_v47, %v2875_v49 }
 0x50f   :  { %v3243_v11 = vpop.eup %3242  ;;  %v1575_v42 = vmul.f32 %v3237_v20, %v1535_v32  ;;  %v1980_v44 = vmul.f32 1.0614054, %v4511_v36  ;;  %v2037_v58 = vadd.f32 0.2548296, %v2029_v38  ;;  %v1943_v10 = vand.u32 2147483647, %v4502_v9 }
 0x510   :  { %3009 = vmatprep.mubr.msk.bf16.mxu1 %vm175_vm0, %v1627_v37  ;;  %v1576_v8 = vmul.f32 %v3243_v11, %v1536_v43  ;;  %v2864_v21 = vadd.f32 -1.4531521, %v1979_v15  ;;  %v2038_v30 = vadd.f32 0.2548296, %v2030_v60  ;;  %v1944_v28 = vand.u32 2147483647, %v4509_v48 }
 0x511   :  { %v1583_v34 = vsub.f32 1.0, %v1575_v42  ;;  %v2865_v16 = vadd.f32 -1.4531521, %v1980_v44  ;;  %v2045_v35 = vmul.f32 %v4418_v63, %v2037_v58  ;;  %v1951_v41 = vmul.f32 0.3275911, %v1943_v10 }
 0x512   :  { %v1584_v7 = vsub.f32 1.0, %v1576_v8  ;;  %v1995_v56 = vmul.f32 %v4504_v45, %v2864_v21  ;;  %v2046_v55 = vmul.f32 %v4440_v47, %v2038_v30  ;;  %v1952_v52 = vmul.f32 0.3275911, %v1944_v28 }
 0x513   :  { %v1599_v46 = vsub.f32 0.0, %v1583_v34  ;;  %v1996_v13 = vmul.f32 %v4511_v36, %v2865_v16  ;;  %v2085_v40 = vmul.f32 %v3233_v17, %v2045_v35  ;;  %v1959_v19 = vadd.f32 1.0, %v1951_v41 }
 0x514   :  { %v1600_v24 = vsub.f32 0.0, %v1584_v7  ;;  %v2003_v26 = vadd.f32 1.4214138, %v1995_v56  ;;  %v2086_v14 = vmul.f32 %v3235_v33, %v2046_v55  ;;  %v1960_v4 = vadd.f32 1.0, %v1952_v52 }
 0x515   :  { %vm1592_vm10 = vcmp.ge.f32.partialorder %v4385_v62, 0.0  ;;  %v1607_v63 = vsel %vm1591_vm9, %v1583_v34, %v1599_v46  ;;  %v2004_v57 = vadd.f32 1.4214138, %v1996_v13  ;;  %3248 = vrcp.f32 %v1959_v19 }
 0x516   :  { %v1608_v54 = vsel %vm1592_vm10, %v1584_v7, %v1600_v24  ;;  %v1615_v29 = vadd.f32 1.0, %v1607_v63  ;;  %v2011_v47 = vmul.f32 %v4504_v45, %v2003_v26  ;;  %v2094_v20 = vsub.f32 1.0, %v2086_v14 }
 0x517   :  { %v1416_v5 = vmul.f32 0.5, %v4360_v25  ;;  %v1616_v17 = vadd.f32 1.0, %v1608_v54  ;;  %v2012_v6 = vmul.f32 %v4511_v36, %v2004_v57  ;;  %3250 = vrcp.f32 %v1960_v4 }
 0x518   :  { %v3245_v33 = vpop.eup %3244  ;;  %v2872_v49 = vadd.f32 -0.28449672, %v2011_v47  ;;  %v2093_v32 = vsub.f32 1.0, %v2085_v40  ;;  %v1623_v62 = vmul.f32 %v1615_v29, %v4369_v31  ;;  %v2110_v37 = vsub.f32 0.0, %v2094_v20 }
 0x519   :  { %v1624_v61 = vmul.f32 %v1616_v17, %v1416_v5  ;;  %v2873_v38 = vadd.f32 -0.28449672, %v2012_v6  ;;  %v2055_v60 = vsub.f32 0.0, %v1943_v10  ;;  %v1913_v11 = vmul.f32 %v4470_v0, %v4334_v51 }
 0x51a   :  { %v3247_v43 = vpop.eup %3246  ;;  %v2027_v15 = vmul.f32 %v4504_v45, %v2872_v49  ;;  %v1914_v25 = vmul.f32 %v4470_v0, %v4494_v53  ;;  %vm2102_vm11 = vcmp.ge.f32.partialorder %v4340_v50, 0.0  ;;  %v2056_v31 = vsub.f32 0.0, %v1944_v28 }
 0x51b   :  { %v1628_v42 = vpack.c.bf16 %v1624_v61, %v1623_v62  ;;  %v2028_v44 = vmul.f32 %v4511_v36, %v2873_v38  ;;  %v2109_v21 = vsub.f32 0.0, %v2093_v32  ;;  %v2118_v30 = vsel %vm2102_vm11, %v2094_v20, %v2110_v37 }
 0x51c   :  { %v2035_v58 = vadd.f32 0.2548296, %v2027_v15  ;;  %v2063_v16 = vmul.f32 %v2055_v60, %v1943_v10  ;;  %v4541_v51 = vadd.f32 %v4411_v23, %v1913_v11  ;;  %v4544_v0 = vadd.f32 %v4411_v23, %v1914_v25 }
 0x51d   :  { %3010 = vmatmul.mubr.msk.bf16.gmra.mxu1 %vm175_vm0, %v1628_v42  ;;  %v2036_v8 = vadd.f32 0.2548296, %v2028_v44  ;;  %vm2101_vm12 = vcmp.ge.f32.partialorder %v4298_v18, 0.0  ;;  %v1923_v50 = vmul.f32 0.5, %v4415_v1  ;;  %v1925_v35 = vmul.f32 0.5, %v4277_v12 }
 0x51e   :  { %v2043_v34 = vmul.f32 %v4504_v45, %v2035_v58  ;;  %vm2099_vm13 = vcmp.ge.f32.partialorder %v4435_v39, 0.0  ;;  %v2064_v7 = vmul.f32 %v2056_v31, %v1944_v28  ;;  %v4552_v45 = vmul.f32 0.70710677, %v4541_v51 }
 0x51f   :  { %v2044_v53 = vmul.f32 %v4511_v36, %v2036_v8  ;;  %v2117_v56 = vsel %vm2101_vm12, %v2093_v32, %v2109_v21  ;;  %v2126_v55 = vadd.f32 1.0, %v2118_v30  ;;  %v4555_v23 = vmul.f32 0.70710677, %v4544_v0 }
 0x520   :  { %v2083_v41 = vmul.f32 %v3245_v33, %v2043_v34  ;;  %vm2100_vm14 = vcmp.ge.f32.partialorder %v4438_v3, 0.0  ;;  %v2075_v1 = vmul.f32 1.442695, %v2063_v16  ;;  %v1945_v12 = vand.u32 2147483647, %v4552_v45 }
 0x521   :  { %v2084_v10 = vmul.f32 %v3247_v43, %v2044_v53  ;;  %v1926_v46 = vmul.f32 0.5, %v4319_v2  ;;  %v1946_v13 = vand.u32 2147483647, %v4555_v23  ;;  %v2125_v24 = vadd.f32 1.0, %v2117_v56 }
 0x522   :  { %v3249_v18 = vpop.eup %3248  ;;  %v2091_v52 = vsub.f32 1.0, %v2083_v41  ;;  %v2077_v26 = vmul.f32 1.442695, %v2064_v7  ;;  %v1953_v14 = vmul.f32 0.3275911, %v1945_v12  ;;  %3252 = vpow2.f32 %v2075_v1 }
 0x523   :  { %v2092_v36 = vsub.f32 1.0, %v2084_v10  ;;  %v1983_v28 = vmul.f32 1.0614054, %v3249_v18  ;;  %v2134_v63 = vmul.f32 %v2126_v55, %v1926_v46  ;;  %v1954_v47 = vmul.f32 0.3275911, %v1946_v13 }
 0x524   :  { %v3251_v40 = vpop.eup %3250  ;;  %v2107_v19 = vsub.f32 0.0, %v2091_v52  ;;  %v1961_v20 = vadd.f32 1.0, %v1953_v14  ;;  %v1924_v33 = vmul.f32 0.5, %v4424_v22  ;;  %v2133_v62 = vmul.f32 %v2125_v24, %v1925_v35 }
 0x525   :  { %v2108_v4 = vsub.f32 0.0, %v2092_v36  ;;  %v1984_v57 = vmul.f32 1.0614054, %v3251_v40  ;;  %v2868_v54 = vadd.f32 -1.4531521, %v1983_v28  ;;  %v1962_v32 = vadd.f32 1.0, %v1954_v47 }
 0x526   :  { %v2115_v29 = vsel %vm2099_vm13, %v2091_v52, %v2107_v19  ;;  %3254 = vrcp.f32 %v1961_v20  ;;  %v2140_v43 = vpack.c.bf16 %v2134_v63, %v2133_v62  ;;  %v2057_v42 = vsub.f32 0.0, %v1945_v12 }
 0x527   :  { %v2116_v2 = vsel %vm2100_vm14, %v2092_v36, %v2108_v4  ;;  %v2123_v5 = vadd.f32 1.0, %v2115_v29  ;;  %v2869_v17 = vadd.f32 -1.4531521, %v1984_v57  ;;  %v1999_v6 = vmul.f32 %v3249_v18, %v2868_v54 }
 0x528   :  { %v2124_v49 = vadd.f32 1.0, %v2116_v2  ;;  %3256 = vpow2.f32 %v2077_v26  ;;  %v2058_v58 = vsub.f32 0.0, %v1946_v13  ;;  %v2065_v21 = vmul.f32 %v2057_v42, %v1945_v12 }
 0x529   :  { %v2000_v61 = vmul.f32 %v3251_v40, %v2869_v17  ;;  %v2007_v38 = vadd.f32 1.4214138, %v1999_v6  ;;  %v2131_v39 = vmul.f32 %v2123_v5, %v1923_v50  ;;  %3258 = vrcp.f32 %v1962_v32 }
 0x52a   :  { %v2132_v37 = vmul.f32 %v2124_v49, %v1924_v33  ;;  %v2066_v50 = vmul.f32 %v2058_v58, %v1946_v13  ;;  %v2079_v56 = vmul.f32 1.442695, %v2065_v21  ;;  %vm2103_vm15 = vcmp.ge.f32.partialorder %v4502_v9, 0.0 }
 0x52b   :  { %v2008_v15 = vadd.f32 1.4214138, %v2000_v61  ;;  %v2015_v60 = vmul.f32 %v3249_v18, %v2007_v38  ;;  %vm2104_vm2 = vcmp.ge.f32.partialorder %v4509_v48, 0.0  ;;  %v1927_v63 = vmul.f32 0.5, %v4483_v59 }
 0x52c   :  { %v2139_v3 = vpack.c.bf16 %v2132_v37, %v2131_v39  ;;  %v2081_v28 = vmul.f32 1.442695, %v2066_v50  ;;  %3260 = vpow2.f32 %v2079_v56  ;;  %v1928_v54 = vmul.f32 0.5, %v4490_v27 }
 0x52d   :  { %v2016_v11 = vmul.f32 %v3251_v40, %v2008_v15  ;;  %v2876_v25 = vadd.f32 -0.28449672, %v2015_v60  ;;  %vm2105_vm3 = vcmp.ge.f32.partialorder %v4552_v45, 0.0  ;;  %vm2106_vm1 = vcmp.ge.f32.partialorder %v4555_v23, 0.0 }
 0x52e   :  { %3025 = vmatprep.mubr.msk.bf16.mxu1 %vm175_vm0, %v2139_v3  ;;  %3262 = vpow2.f32 %v2081_v28 }
 0x52f   :  { %3026 = vmatmul.mubr.msk.bf16.vlgmr.msra.gmra.mxu1 %vm175_vm0, %v2140_v43  ;;  %v2877_v22 = vadd.f32 -0.28449672, %v2016_v11  ;;  %v2031_v44 = vmul.f32 %v3249_v18, %v2876_v25  ;;  %v3253_v30 = vpop.eup %3252 }
 0x531   :  { %v2032_v31 = vmul.f32 %v3251_v40, %v2877_v22  ;;  %v2039_v8 = vadd.f32 0.2548296, %v2031_v44  ;;  %v1929_v22 = vmul.f32 0.5, %v4541_v51  ;;  %v1930_v44 = vmul.f32 0.5, %v4544_v0 }
 0x533   :  { %v2040_v34 = vadd.f32 0.2548296, %v2032_v31  ;;  %v2047_v16 = vmul.f32 %v3249_v18, %v2039_v8  ;;  %v3255_v53 = vpop.eup %3254 }
 0x534   :  { %v1985_v10 = vmul.f32 1.0614054, %v3255_v53 }
 0x535   :  { %v2048_v35 = vmul.f32 %v3251_v40, %v2040_v34  ;;  %v2087_v41 = vmul.f32 %v3253_v30, %v2047_v16  ;;  %v3257_v7 = vpop.eup %3256 }
 0x536   :  { %v3259_v55 = vpop.eup %3258  ;;  %v2870_v46 = vadd.f32 -1.4531521, %v1985_v10 }
 0x537   :  { %v2088_v52 = vmul.f32 %v3257_v7, %v2048_v35  ;;  %v2095_v1 = vsub.f32 1.0, %v2087_v41  ;;  %v1986_v36 = vmul.f32 1.0614054, %v3259_v55 }
 0x538   :  { %v2001_v26 = vmul.f32 %v3255_v53, %v2870_v46  ;;  %v4880_v46 = vld [vmem:[#allocation7_spill] sm:$0xff] }
 0x539   :  { %v2096_v19 = vsub.f32 1.0, %v2088_v52  ;;  %v2111_v24 = vsub.f32 0.0, %v2095_v1  ;;  %v2871_v12 = vadd.f32 -1.4531521, %v1986_v36  ;;  %v3261_v59 = vpop.eup %3260 }
 0x53a   :  { %v2009_v4 = vadd.f32 1.4214138, %v2001_v26 }
 0x53b   :  { %v2112_v18 = vsub.f32 0.0, %v2096_v19  ;;  %v2119_v13 = vsel %vm2103_vm15, %v2095_v1, %v2111_v24  ;;  %v2002_v14 = vmul.f32 %v3259_v55, %v2871_v12  ;;  %v3263_v27 = vpop.eup %3262  ;;  %v4879_v1 = vld [vmem:[#allocation6_spill] sm:$0xff] }
 0x53c   :  { %v2127_v40 = vadd.f32 1.0, %v2119_v13  ;;  %v2017_v20 = vmul.f32 %v3255_v53, %v2009_v4 }
 0x53d   :  { %v2120_v57 = vsel %vm2104_vm2, %v2096_v19, %v2112_v18  ;;  %v2010_v47 = vadd.f32 1.4214138, %v2002_v14  ;;  %v4881_v18 = vld [vmem:[#allocation8_spill] sm:$0xff] }
 0x53e   :  { %v2128_v29 = vadd.f32 1.0, %v2120_v57  ;;  %v2135_v9 = vmul.f32 %v2127_v40, %v1927_v63  ;;  %v2878_v17 = vadd.f32 -0.28449672, %v2017_v20  ;;  %v4882_v40 = vld [vmem:[#allocation9_spill] sm:$0xff] }
 0x53f   :  { %v2018_v5 = vmul.f32 %v3259_v55, %v2010_v47 }
 0x540   :  { %v2136_v2 = vmul.f32 %v2128_v29, %v1928_v54  ;;  %v2033_v33 = vmul.f32 %v3255_v53, %v2878_v17  ;;  %v2884_v54 = vld [vmem:[%s4854_s10] ss:$0 sm:$0xff] }
 0x541   :  { %v2879_v48 = vadd.f32 -0.28449672, %v2018_v5 }
 0x542   :  { %v2141_v6 = vpack.c.bf16 %v2136_v2, %v2135_v9  ;;  %v2041_v32 = vadd.f32 0.2548296, %v2033_v33 }
 0x543   :  { %v2034_v49 = vmul.f32 %v3259_v55, %v2879_v48 }
 0x544   :  { %3029 = vmatprep.mubr.msk.bf16.mxu1 %vm175_vm0, %v2141_v6  ;;  %v2049_v61 = vmul.f32 %v3255_v53, %v2041_v32 }
 0x545   :  { %v2042_v62 = vadd.f32 0.2548296, %v2034_v49 }
 0x546   :  { %v2089_v39 = vmul.f32 %v3261_v59, %v2049_v61  ;;  %v4883_v61 = vld [vmem:[#allocation10_spill] sm:$0xff] }
 0x547   :  { %v2050_v38 = vmul.f32 %v3259_v55, %v2042_v62 }
 0x548   :  { %v2097_v43 = vsub.f32 1.0, %v2089_v39 }
 0x549   :  { %v2090_v37 = vmul.f32 %v3263_v27, %v2050_v38  ;;  %v4884_v38 = vld [vmem:[#allocation11_spill] sm:$0xff] }
 0x54a   :  { %v2113_v60 = vsub.f32 0.0, %v2097_v43 }
 0x54b   :  { %v2098_v15 = vsub.f32 1.0, %v2090_v37 }
 0x54c   :  { %v2121_v11 = vsel %vm2105_vm3, %v2097_v43, %v2113_v60  ;;  %v4885_v60 = vld [vmem:[#allocation12_spill] sm:$0xff] }
 0x54d   :  { %v2114_v3 = vsub.f32 0.0, %v2098_v15  ;;  %v2129_v25 = vadd.f32 1.0, %v2121_v11  ;;  %v4886_v11 = vld [vmem:[#allocation13_spill] sm:$0xff] }
 0x54e   :  { %v2987_v30 = vpop.f32.mrf.mxu1 }
 0x54f   :  { %v2122_v42 = vsel %vm2106_vm1, %v2098_v15, %v2114_v3  ;;  %v2137_v31 = vmul.f32 %v2129_v25, %v1929_v22  ;;  %v1182_v36 = vadd.f32 %v2987_v30, %v4879_v1  ;;  %vm150_vm1 = vcmask 259072  }
 0x550   :  { %v2130_v58 = vadd.f32 1.0, %v2122_v42  ;;  %v1173_v34 = vpop.f32.mrf.mxu1 }
 0x551   :  { %v1174_v28 = vadd.f32 %v1173_v34, %v4880_v46 }
 0x552   :  { %v2138_v8 = vmul.f32 %v2130_v58, %v1930_v44  ;;  %v2988_v16 = vpop.f32.mrf.mxu1 }
 0x553   :  { %v1185_v13 = vadd.f32 %v2988_v16, %v4881_v18 }
 0x554   :  { %v2142_v21 = vpack.c.bf16 %v2138_v8, %v2137_v31  ;;  %v1176_v45 = vpop.f32.mrf.mxu1 }
 0x555   :  { %v1177_v14 = vadd.f32 %v1176_v45, %v4882_v40 }
 0x556   :  { %3030 = vmatmul.mubr.msk.bf16.gmra.mxu1 %vm175_vm0, %v2142_v21  ;;  %vm2250_vm0 = vcmask 130048  }
 0x55a   :  { %v2991_v50 = vpop.f32.mrf.mxu1 }
 0x55b   :  { %v1198_v59 = vadd.f32 %v2991_v50, %v4883_v61 }
 0x55c   :  { %v1189_v53 = vpop.f32.mrf.mxu1 }
 0x55d   :  { %v1190_v39 = vadd.f32 %v1189_v53, %v4884_v38 }
 0x55e   :  { %v2992_v35 = vpop.f32.mrf.mxu1 }
 0x55f   :  { %v1201_v3 = vadd.f32 %v2992_v35, %v4885_v60 }
 0x560   :  { %v1192_v23 = vpop.f32.mrf.mxu1 }
 0x561   :  { %v1193_v25 = vadd.f32 %v1192_v23, %v4886_v11 }
 0x5be   :  { %v3007_v41 = vpop.f32.mrf.mxu1 }
 0x5bf   :  { %v1712_v24 = vadd.f32 %v3007_v41, %v1182_v36 }
 0x5c0   :  { %v1679_v7 = vpop.f32.mrf.mxu1 }
 0x5c1   :  { %v1710_v12 = vadd.f32 %v1679_v7, %v1174_v28 }
 0x5c2   :  { %v3008_v10 = vpop.f32.mrf.mxu1 }
 0x5c3   :  { %v1713_v29 = vadd.f32 %v3008_v10, %v1185_v13 }
 0x5c4   :  { %v1682_v51 = vpop.f32.mrf.mxu1 }
 0x5c5   :  { %v1711_v47 = vadd.f32 %v1682_v51, %v1177_v14 }
 0x5dd   :  { %v3011_v56 = vpop.f32.mrf.mxu1 }
 0x5de   :  { %v1716_v37 = vadd.f32 %v3011_v56, %v1198_v59 }
 0x5df   :  { %v1695_v0 = vpop.f32.mrf.mxu1 }
 0x5e0   :  { %v1714_v43 = vadd.f32 %v1695_v0, %v1190_v39 }
 0x5e1   :  { %v3012_v55 = vpop.f32.mrf.mxu1 }
 0x5e2   :  { %v1717_v58 = vadd.f32 %v3012_v55, %v1201_v3 }
 0x5e3   :  { %v1698_v52 = vpop.f32.mrf.mxu1 }
 0x5e4   :  { %v1715_v31 = vadd.f32 %v1698_v52, %v1193_v25 }
 0x5ef   :  { %v3027_v19 = vpop.f32.mrf.mxu1 }
 0x5f0   :  { %v2227_v4 = vadd.f32 %v3027_v19, %v1712_v24 }
 0x5f1   :  { %v2194_v26 = vpop.f32.mrf.mxu1 }
 0x5f2   :  { %v2225_v63 = vadd.f32 %v2194_v26, %v1710_v12  ;;  %v2242_v6 = vadd.f32 %v2884_v54, %v2227_v4 }
 0x5f3   :  { %v3028_v57 = vpop.f32.mrf.mxu1 }
 0x5f4   :  { %v2240_v20 = vadd.f32 %v2884_v54, %v2225_v63  ;;  %v2228_v2 = vadd.f32 %v3028_v57, %v1713_v29  ;;  %v2257_v33 = vsel %vm2250_vm0, %v2242_v6, 0.0 }
 0x5f5   :  { %v2197_v9 = vpop.f32.mrf.mxu1 }
 0x5f6   :  { %v2226_v5 = vadd.f32 %v2197_v9, %v1711_v47  ;;  %v2251_v17 = vsel %vm2250_vm0, %v2240_v20, 0.0  ;;  %v2243_v32 = vadd.f32 %v2884_v54, %v2228_v2 }
 0x5f7   :  { %2252 = vadd.xlane.f32.xlu1 %v2251_v17 }
 0x5f8   :  { %v2241_v48 = vadd.f32 %v2884_v54, %v2226_v5  ;;  %v2260_v62 = vsel %vm2250_vm0, %v2243_v32, 0.0 }
 0x5fa   :  { %v2254_v49 = vsel %vm2250_vm0, %v2241_v48, 0.0 }
 0x5fb   :  { %2258 = vadd.xlane.f32.xlu1 %v2257_v33  ;;  %2255 = vadd.xlane.f32.xlu0 %v2254_v49 }
 0x5ff   :  { %2261 = vadd.xlane.f32.xlu0 %v2260_v62 }
 0x616   :  { %v3031_v27 = vpop.f32.mrf.mxu1 }
 0x617   :  { %v2231_v42 = vadd.f32 %v3031_v27, %v1716_v37  ;;  %v2600_v27 = vld [vmem:[%s4857_s13] sm:$0xff]  ;;  %v2601_v37 = vld [vmem:[%s4857_s13 + $0x8] sm:$0xff] }
 0x618   :  { %v2210_v15 = vpop.f32.mrf.mxu1 }
 0x619   :  { %v2229_v22 = vadd.f32 %v2210_v15, %v1714_v43  ;;  %v2246_v45 = vadd.f32 %v2884_v54, %v2231_v42  ;;  %v2606_v43 = vpack.c.bf16 %v2601_v37, %v2600_v27 }
 0x61a   :  { %v3032_v44 = vpop.f32.mrf.mxu1 }
 0x61b   :  { %v2244_v8 = vadd.f32 %v2884_v54, %v2229_v22  ;;  %v2232_v30 = vadd.f32 %v3032_v44, %v1717_v58  ;;  %v2269_v53 = vsel %vm2250_vm0, %v2246_v45, 0.0  ;;  %3033 = vmatprep.subr.bf16.mxu0 %v2606_v43  ;;  %v66_v44 = vld [vmem:[%s4887_s16] sm:$0x3f]  ;;  %v3342_v58 = vmov 0  }
 0x61c   :  { %v2213_v21 = vpop.f32.mrf.mxu1  ;;  %3034 = vmatpush3.bf16.msra.mxu0 %v2606_v43  ;;  %3060 = vset.pattern.permute.xlu1 %v3342_v58  ;;  %vm67_vm4 = vcmp.ne.f32.partialorder %v66_v44, -1.0  ;;  %vm77_vm5 = vcmp.eq.f32.partialorder %v66_v44, -1.0  ;;  %vm94_vm6 = vcmp.eq.f32.partialorder %v66_v44, 0.0  ;;  %vm108_vm7 = vcmp.eq.f32.partialorder %v66_v44, 1.0 }
 0x61d   :  { %v2230_v34 = vadd.f32 %v2213_v21, %v1715_v31  ;;  %v2263_v16 = vsel %vm2250_vm0, %v2244_v8, 0.0  ;;  %v2247_v41 = vadd.f32 %v2884_v54, %v2232_v30  ;;  %v2691_v31 = vld [vmem:[#allocation2] sm:$0x1]  ;;  %3066 = vset.pattern.permute.xlu0 %v3342_v58  ;;  %v3343_v30 = vmov 0.0  }
 0x61e   :  { %2264 = vadd.xlane.f32.xlu1 %v2263_v16  ;;  %v2779_v16 = vsel %vm77_vm5, 1.0, %v3343_v30  ;;  %vm122_vm8 = vcmp.eq.f32.partialorder %v66_v44, 2.0  ;;  %vm136_vm9 = vcmp.eq.f32.partialorder %v66_v44, 3.0 }
 0x61f   :  { %v2245_v50 = vadd.f32 %v2884_v54, %v2230_v34  ;;  %v2272_v23 = vsel %vm2250_vm0, %v2247_v41, 0.0  ;;  %v2778_v34 = vsel %vm67_vm4, 1.0, %v3343_v30 }
 0x621   :  { %v2266_v35 = vsel %vm2250_vm0, %v2245_v50, 0.0 }
 0x622   :  { %2270 = vadd.xlane.f32.xlu1 %v2269_v53  ;;  %2267 = vadd.xlane.f32.xlu0 %v2266_v35  ;;  %v2781_v53 = vsel %vm94_vm6, 1.0, %v3343_v30 }
 0x626   :  { %2273 = vadd.xlane.f32.xlu0 %v2272_v23  ;;  %v2709_v23 = vsub.f32 1.0, %v2691_v31 }
 0x680   :  { %v2253_v7 = vpop.xlane.xlu1 %2252 }
 0x681   :  { %v2276_v10 = vmul.f32 0.0625, %v2253_v7 }
 0x683   :  { %v4597_v51 = vsub.f32 %v2240_v20, %v2276_v10  ;;  %v97_v10 = vlaneseq }
 0x684   :  { %v2259_v56 = vpop.xlane.xlu1 %2258  ;;  %v2256_v0 = vpop.xlane.xlu0 %2255 }
 0x685   :  { %v2278_v55 = vmul.f32 0.0625, %v2259_v56  ;;  %v2277_v52 = vmul.f32 0.0625, %v2256_v0  ;;  %v2292_v1 = vmul.f32 %v4597_v51, %v4597_v51  ;;  %v4646_v0 = vshrl.u32 %v97_v10, 7 }
 0x687   :  { %v4601_v36 = vsub.f32 %v2242_v6, %v2278_v55  ;;  %v4603_v46 = vsub.f32 %v2241_v48, %v2277_v52  ;;  %v2300_v28 = vsel %vm2250_vm0, %v2292_v1, 0.0  ;;  %v4649_v55 = vsub.s32 0, %v4646_v0 }
 0x688   :  { %2301 = vadd.xlane.f32.xlu1 %v2300_v28  ;;  %v2262_v19 = vpop.xlane.xlu0 %2261  ;;  %v2783_v52 = vsel %vm122_vm8, 1.0, %v3343_v30  ;;  %v4654_v28 = vld [vmem:[%s4855_s11] ss:$0 sm:$0xff] }
 0x689   :  { %v2279_v24 = vmul.f32 0.0625, %v2262_v19  ;;  %v2294_v12 = vmul.f32 %v4601_v36, %v4601_v36  ;;  %v2293_v26 = vmul.f32 %v4603_v46, %v4603_v46  ;;  %v2696_v19 = vrot.slane %v2691_v31, %v4649_v55 }
 0x68b   :  { %v4610_v18 = vsub.f32 %v2243_v32, %v2279_v24  ;;  %v2306_v13 = vsel %vm2250_vm0, %v2294_v12, 0.0  ;;  %v2303_v40 = vsel %vm2250_vm0, %v2293_v26, 0.0  ;;  %v4661_v12 = vld [vmem:[%s4856_s12] ss:$0 sm:$0xff] }
 0x68c   :  { %2307 = vadd.xlane.f32.xlu1 %v2306_v13  ;;  %2304 = vadd.xlane.f32.xlu0 %v2303_v40 }
 0x68d   :  { %v2295_v14 = vmul.f32 %v4610_v18, %v4610_v18 }
 0x68f   :  { %v2309_v4 = vsel %vm2250_vm0, %v2295_v14, 0.0 }
 0x690   :  { %2310 = vadd.xlane.f32.xlu0 %v2309_v4 }
 0x6a7   :  { %v2265_v63 = vpop.xlane.xlu1 %2264 }
 0x6a8   :  { %v2280_v57 = vmul.f32 0.0625, %v2265_v63  ;;  %v2784_v63 = vsel %vm136_vm9, 1.0, %v3343_v30 }
 0x6aa   :  { %v4617_v54 = vsub.f32 %v2244_v8, %v2280_v57 }
 0x6ab   :  { %v2271_v29 = vpop.xlane.xlu1 %2270  ;;  %v2268_v47 = vpop.xlane.xlu0 %2267 }
 0x6ac   :  { %v2282_v20 = vmul.f32 0.0625, %v2271_v29  ;;  %v2281_v9 = vmul.f32 0.0625, %v2268_v47  ;;  %v2296_v2 = vmul.f32 %v4617_v54, %v4617_v54 }
 0x6ae   :  { %v4621_v5 = vsub.f32 %v2246_v45, %v2282_v20  ;;  %v4623_v17 = vsub.f32 %v2245_v50, %v2281_v9  ;;  %v2312_v6 = vsel %vm2250_vm0, %v2296_v2, 0.0  ;;  %v3061_v50 = vpack.i.bf16 %v2779_v16, %v2778_v34 }
 0x6af   :  { %2313 = vadd.xlane.f32.xlu1 %v2312_v6  ;;  %v2274_v48 = vpop.xlane.xlu0 %2273 }
 0x6b0   :  { %v2283_v33 = vmul.f32 0.0625, %v2274_v48  ;;  %v2298_v49 = vmul.f32 %v4621_v5, %v4621_v5  ;;  %v2297_v32 = vmul.f32 %v4623_v17, %v4623_v17 }
 0x6b2   :  { %v4630_v62 = vsub.f32 %v2247_v41, %v2283_v33  ;;  %v2318_v61 = vsel %vm2250_vm0, %v2298_v49, 0.0  ;;  %v2315_v59 = vsel %vm2250_vm0, %v2297_v32, 0.0  ;;  %v2782_v41 = vsel %vm108_vm7, 1.0, %v3343_v30 }
 0x6b3   :  { %2319 = vadd.xlane.f32.xlu1 %v2318_v61  ;;  %2316 = vadd.xlane.f32.xlu0 %v2315_v59  ;;  %v3067_v7 = vpack.i.bf16 %v2782_v41, %v2781_v53 }
 0x6b4   :  { %v2299_v38 = vmul.f32 %v4630_v62, %v4630_v62 }
 0x6b6   :  { %v2321_v39 = vsel %vm2250_vm0, %v2299_v38, 0.0 }
 0x6b7   :  { %2322 = vadd.xlane.f32.xlu0 %v2321_v39 }
 0x6c4   :  { %3062 = vperm.xlu1 %3060, %v3061_v50  }
 0x6c8   :  { %2713 = vperm.xlu1 %3060, %v2709_v23  }
 0x6cc   :  { %131 = vperm.xlu1 %3060, %v2783_v52  }
 0x6cd   :  { %3068 = vperm.xlu0 %3066, %v3067_v7  }
 0x6d0   :  { %2698 = vperm.xlu1 %3060, %v2696_v19  }
 0x6d4   :  { %145 = vperm.xlu1 %3060, %v2784_v63  }
 0x711   :  { %v2302_v15 = vpop.xlane.xlu1 %2301 }
 0x712   :  { %v2324_v60 = vmul.f32 0.0625, %v2302_v15 }
 0x714   :  { %v2332_v3 = vadd.f32 1e-06, %v2324_v60 }
 0x715   :  { %v2308_v11 = vpop.xlane.xlu1 %2307  ;;  %v2305_v25 = vpop.xlane.xlu0 %2304 }
 0x716   :  { %3264 = vrsqrt.f32 %v2332_v3  ;;  %v2326_v42 = vmul.f32 0.0625, %v2308_v11  ;;  %v2325_v22 = vmul.f32 0.0625, %v2305_v25 }
 0x718   :  { %v2334_v8 = vadd.f32 1e-06, %v2326_v42  ;;  %v2333_v21 = vadd.f32 1e-06, %v2325_v22 }
 0x719   :  { %v2311_v45 = vpop.xlane.xlu0 %2310 }
 0x71a   :  { %3266 = vrsqrt.f32 %v2334_v8  ;;  %v2327_v35 = vmul.f32 0.0625, %v2311_v45 }
 0x71b   :  { %3268 = vrsqrt.f32 %v2333_v21 }
 0x71c   :  { %v2335_v56 = vadd.f32 1e-06, %v2327_v35 }
 0x71e   :  { %3270 = vrsqrt.f32 %v2335_v56 }
 0x723   :  { %v3265_v1 = vpop.eup %3264 }
 0x724   :  { %v2348_v24 = vmul.f32 %v3265_v1, %v4597_v51 }
 0x726   :  { %v2362_v26 = vmul.f32 %v4654_v28, %v2348_v24 }
 0x727   :  { %v3267_v13 = vpop.eup %3266 }
 0x728   :  { %v3269_v40 = vpop.eup %3268  ;;  %v2350_v14 = vmul.f32 %v3267_v13, %v4601_v36  ;;  %v4666_v4 = vadd.f32 %v4661_v12, %v2362_v26 }
 0x729   :  { %v2349_v57 = vmul.f32 %v3269_v40, %v4603_v46 }
 0x72a   :  { %v2364_v51 = vmul.f32 %v4654_v28, %v2350_v14  ;;  %v4671_v29 = vmul.f32 0.70710677, %v4666_v4 }
 0x72b   :  { %v3271_v47 = vpop.eup %3270  ;;  %v2363_v20 = vmul.f32 %v4654_v28, %v2349_v57 }
 0x72c   :  { %v4675_v9 = vadd.f32 %v4661_v12, %v2364_v51  ;;  %v2351_v36 = vmul.f32 %v3271_v47, %v4610_v18  ;;  %v2400_v2 = vand.u32 2147483647, %v4671_v29  ;;  %vm2560_vm10 = vcmp.ge.f32.partialorder %v4671_v29, 0.0 }
 0x72d   :  { %v4680_v6 = vadd.f32 %v4661_v12, %v2363_v20 }
 0x72e   :  { %v4683_v46 = vmul.f32 0.70710677, %v4675_v9  ;;  %v2365_v48 = vmul.f32 %v4654_v28, %v2351_v36  ;;  %v2408_v33 = vmul.f32 0.3275911, %v2400_v2  ;;  %v2512_v3 = vsub.f32 0.0, %v2400_v2 }
 0x72f   :  { %v4687_v49 = vmul.f32 0.70710677, %v4680_v6 }
 0x730   :  { %v2402_v32 = vand.u32 2147483647, %v4683_v46  ;;  %v4691_v61 = vadd.f32 %v4661_v12, %v2365_v48  ;;  %v2416_v18 = vadd.f32 1.0, %v2408_v33  ;;  %v2520_v22 = vmul.f32 %v2512_v3, %v2400_v2 }
 0x731   :  { %v2401_v59 = vand.u32 2147483647, %v4687_v49  ;;  %vm2562_vm11 = vcmp.ge.f32.partialorder %v4683_v46, 0.0  ;;  %vm2561_vm12 = vcmp.ge.f32.partialorder %v4687_v49, 0.0  ;;  %v2385_v46 = vmul.f32 0.5, %v4680_v6 }
 0x732   :  { %v2410_v38 = vmul.f32 0.3275911, %v2402_v32  ;;  %v4695_v39 = vmul.f32 0.70710677, %v4691_v61  ;;  %3272 = vrcp.f32 %v2416_v18  ;;  %v2514_v44 = vsub.f32 0.0, %v2402_v32 }
 0x733   :  { %v2409_v27 = vmul.f32 0.3275911, %v2401_v59  ;;  %v2513_v21 = vsub.f32 0.0, %v2401_v59  ;;  %v2528_v16 = vmul.f32 1.442695, %v2520_v22 }
 0x734   :  { %v2418_v37 = vadd.f32 1.0, %v2410_v38  ;;  %v2403_v43 = vand.u32 2147483647, %v4695_v39  ;;  %v2522_v50 = vmul.f32 %v2514_v44, %v2402_v32  ;;  %vm2563_vm13 = vcmp.ge.f32.partialorder %v4695_v39, 0.0 }
 0x735   :  { %v2417_v15 = vadd.f32 1.0, %v2409_v27  ;;  %v2521_v10 = vmul.f32 %v2513_v21, %v2401_v59 }
 0x736   :  { %3274 = vrcp.f32 %v2418_v37  ;;  %v2411_v60 = vmul.f32 0.3275911, %v2403_v43  ;;  %v2515_v53 = vsub.f32 0.0, %v2403_v43  ;;  %v2532_v19 = vmul.f32 1.442695, %v2522_v50 }
 0x737   :  { %3276 = vrcp.f32 %v2417_v15  ;;  %v2530_v57 = vmul.f32 1.442695, %v2521_v10 }
 0x738   :  { %v2419_v11 = vadd.f32 1.0, %v2411_v60  ;;  %v2314_v25 = vpop.xlane.xlu1 %2313  ;;  %v2523_v24 = vmul.f32 %v2515_v53, %v2403_v43 }
 0x739   :  { %v2328_v42 = vmul.f32 0.0625, %v2314_v25 }
 0x73a   :  { %3278 = vrcp.f32 %v2419_v11  ;;  %v2534_v36 = vmul.f32 1.442695, %v2523_v24 }
 0x73b   :  { %v2336_v58 = vadd.f32 1e-06, %v2328_v42 }
 0x73c   :  { %v2320_v31 = vpop.xlane.xlu1 %2319  ;;  %v2317_v8 = vpop.xlane.xlu0 %2316 }
 0x73d   :  { %3280 = vrsqrt.f32 %v2336_v58  ;;  %v2330_v30 = vmul.f32 0.0625, %v2320_v31  ;;  %v2329_v34 = vmul.f32 0.0625, %v2317_v8 }
 0x73e   :  { %3282 = vpow2.f32 %v2528_v16 }
 0x73f   :  { %v3273_v45 = vpop.eup %3272  ;;  %v2338_v35 = vadd.f32 1e-06, %v2330_v30  ;;  %v2337_v41 = vadd.f32 1e-06, %v2329_v34 }
 0x740   :  { %v2440_v23 = vmul.f32 1.0614054, %v3273_v45  ;;  %v2323_v7 = vpop.xlane.xlu0 %2322 }
 0x741   :  { %v2331_v56 = vmul.f32 0.0625, %v2323_v7  ;;  %3284 = vrsqrt.f32 %v2337_v41 }
 0x742   :  { %v2887_v52 = vadd.f32 -1.4531521, %v2440_v23  ;;  %3286 = vrsqrt.f32 %v2338_v35 }
 0x743   :  { %v3275_v1 = vpop.eup %3274  ;;  %v2339_v13 = vadd.f32 1e-06, %v2331_v56 }
 0x744   :  { %v3277_v26 = vpop.eup %3276  ;;  %v2456_v40 = vmul.f32 %v3273_v45, %v2887_v52  ;;  %v2442_v14 = vmul.f32 1.0614054, %v3275_v1 }
 0x745   :  { %v2441_v63 = vmul.f32 1.0614054, %v3277_v26  ;;  %3288 = vrsqrt.f32 %v2339_v13 }
 0x746   :  { %v2464_v51 = vadd.f32 1.4214138, %v2456_v40  ;;  %v2889_v47 = vadd.f32 -1.4531521, %v2442_v14  ;;  %3290 = vpow2.f32 %v2532_v19 }
 0x747   :  { %v3279_v20 = vpop.eup %3278  ;;  %v2888_v2 = vadd.f32 -1.4531521, %v2441_v63  ;;  %3292 = vpow2.f32 %v2530_v57 }
 0x748   :  { %v2472_v48 = vmul.f32 %v3273_v45, %v2464_v51  ;;  %v2443_v33 = vmul.f32 1.0614054, %v3279_v20  ;;  %v2458_v32 = vmul.f32 %v3275_v1, %v2889_v47  ;;  %3294 = vpow2.f32 %v2534_v36 }
 0x749   :  { %v2457_v18 = vmul.f32 %v3277_v26, %v2888_v2 }
 0x74a   :  { %v2895_v59 = vadd.f32 -0.28449672, %v2472_v48  ;;  %v2890_v38 = vadd.f32 -1.4531521, %v2443_v33  ;;  %v2466_v27 = vadd.f32 1.4214138, %v2458_v32  ;;  %v3281_v37 = vpop.eup %3280 }
 0x74b   :  { %v2465_v43 = vadd.f32 1.4214138, %v2457_v18  ;;  %v2352_v15 = vmul.f32 %v3281_v37, %v4617_v54  ;;  %v3283_v31 = vpop.eup %3282 }
 0x74c   :  { %v2488_v60 = vmul.f32 %v3273_v45, %v2895_v59  ;;  %v2459_v3 = vmul.f32 %v3279_v20, %v2890_v38  ;;  %v2474_v11 = vmul.f32 %v3275_v1, %v2466_v27 }
 0x74d   :  { %v2473_v25 = vmul.f32 %v3277_v26, %v2465_v43  ;;  %v2366_v58 = vmul.f32 %v4654_v28, %v2352_v15 }
 0x74e   :  { %v2496_v42 = vadd.f32 0.2548296, %v2488_v60  ;;  %v2467_v22 = vadd.f32 1.4214138, %v2459_v3  ;;  %v2897_v44 = vadd.f32 -0.28449672, %v2474_v11  ;;  %v3285_v21 = vpop.eup %3284 }
 0x74f   :  { %v2896_v8 = vadd.f32 -0.28449672, %v2473_v25  ;;  %v3287_v50 = vpop.eup %3286  ;;  %v2353_v53 = vmul.f32 %v3285_v21, %v4623_v17  ;;  %v4702_v54 = vadd.f32 %v4661_v12, %v2366_v58 }
 0x750   :  { %v2504_v30 = vmul.f32 %v3273_v45, %v2496_v42  ;;  %v2475_v34 = vmul.f32 %v3279_v20, %v2467_v22  ;;  %v2490_v16 = vmul.f32 %v3275_v1, %v2897_v44  ;;  %v2354_v45 = vmul.f32 %v3287_v50, %v4621_v5 }
 0x751   :  { %v2489_v35 = vmul.f32 %v3277_v26, %v2896_v8  ;;  %v2367_v56 = vmul.f32 %v4654_v28, %v2353_v53  ;;  %v4706_v52 = vmul.f32 0.70710677, %v4702_v54  ;;  %v2384_v42 = vmul.f32 0.5, %v4666_v4 }
 0x752   :  { %v2544_v41 = vmul.f32 %v3283_v31, %v2504_v30  ;;  %v2898_v23 = vadd.f32 -0.28449672, %v2475_v34  ;;  %v2498_v7 = vadd.f32 0.2548296, %v2490_v16  ;;  %v3289_v19 = vpop.eup %3288  ;;  %v2368_v59 = vmul.f32 %v4654_v28, %v2354_v45 }
 0x753   :  { %v2497_v10 = vadd.f32 0.2548296, %v2489_v35  ;;  %v3291_v17 = vpop.eup %3290  ;;  %v4710_v63 = vadd.f32 %v4661_v12, %v2367_v56  ;;  %v2404_v57 = vand.u32 2147483647, %v4706_v52  ;;  %v2355_v48 = vmul.f32 %v3289_v19, %v4630_v62 }
 0x754   :  { %v2552_v24 = vsub.f32 1.0, %v2544_v41  ;;  %v2491_v13 = vmul.f32 %v3279_v20, %v2898_v23  ;;  %v2506_v40 = vmul.f32 %v3275_v1, %v2498_v7  ;;  %v3293_v51 = vpop.eup %3292  ;;  %v4725_v58 = vadd.f32 %v4661_v12, %v2368_v59 }
 0x755   :  { %v2505_v14 = vmul.f32 %v3277_v26, %v2497_v10  ;;  %v4715_v32 = vmul.f32 0.70710677, %v4710_v63  ;;  %v2412_v5 = vmul.f32 0.3275911, %v2404_v57  ;;  %v3295_v18 = vpop.eup %3294  ;;  %v2369_v11 = vmul.f32 %v4654_v28, %v2355_v48 }
 0x756   :  { %v2568_v47 = vsub.f32 0.0, %v2552_v24  ;;  %v2499_v36 = vadd.f32 0.2548296, %v2491_v13  ;;  %v2546_v2 = vmul.f32 %v3291_v17, %v2506_v40  ;;  %v2386_v8 = vmul.f32 0.5, %v4675_v9 }
 0x757   :  { %v2545_v33 = vmul.f32 %v3293_v51, %v2505_v14  ;;  %v2405_v37 = vand.u32 2147483647, %v4715_v32  ;;  %v2420_v43 = vadd.f32 1.0, %v2412_v5  ;;  %v4731_v49 = vadd.f32 %v4661_v12, %v2369_v11 }
 0x758   :  { %v2507_v1 = vmul.f32 %v3279_v20, %v2499_v36  ;;  %v2554_v26 = vsub.f32 1.0, %v2546_v2  ;;  %v2576_v27 = vsel %vm2560_vm10, %v2552_v24, %v2568_v47  ;;  %v4734_v16 = vmul.f32 0.70710677, %v4725_v58 }
 0x759   :  { %v2553_v38 = vsub.f32 1.0, %v2545_v33  ;;  %v2413_v3 = vmul.f32 0.3275911, %v2405_v37  ;;  %3296 = vrcp.f32 %v2420_v43  ;;  %v2584_v29 = vadd.f32 1.0, %v2576_v27 }
 0x75a   :  { %v2547_v62 = vmul.f32 %v3295_v18, %v2507_v1  ;;  %v2570_v15 = vsub.f32 0.0, %v2554_v26  ;;  %v2387_v50 = vmul.f32 0.5, %v4691_v61  ;;  %v2516_v53 = vsub.f32 0.0, %v2404_v57 }
 0x75b   :  { %v2569_v60 = vsub.f32 0.0, %v2553_v38  ;;  %v2421_v44 = vadd.f32 1.0, %v2413_v3  ;;  %v2592_v30 = vmul.f32 %v2584_v29, %v2384_v42  ;;  %v4738_v9 = vmul.f32 0.70710677, %v4731_v49 }
 0x75c   :  { %v2555_v20 = vsub.f32 1.0, %v2547_v62  ;;  %v2578_v25 = vsel %vm2562_vm11, %v2554_v26, %v2570_v15  ;;  %v2406_v39 = vand.u32 2147483647, %v4734_v16  ;;  %v2517_v56 = vsub.f32 0.0, %v2405_v37 }
 0x75d   :  { %v2577_v22 = vsel %vm2561_vm12, %v2553_v38, %v2569_v60  ;;  %v2586_v28 = vadd.f32 1.0, %v2578_v25  ;;  %3298 = vrcp.f32 %v2421_v44  ;;  %v2407_v12 = vand.u32 2147483647, %v4738_v9 }
 0x75e   :  { %v2585_v31 = vadd.f32 1.0, %v2577_v22  ;;  %v2571_v21 = vsub.f32 0.0, %v2555_v20  ;;  %v2414_v7 = vmul.f32 0.3275911, %v2406_v39  ;;  %v2524_v19 = vmul.f32 %v2516_v53, %v2404_v57 }
 0x75f   :  { %v2594_v41 = vmul.f32 %v2586_v28, %v2386_v8  ;;  %v2415_v45 = vmul.f32 0.3275911, %v2407_v12  ;;  %v2525_v17 = vmul.f32 %v2517_v56, %v2405_v37  ;;  %v2518_v33 = vsub.f32 0.0, %v2406_v39 }
 0x760   :  { %v2593_v4 = vmul.f32 %v2585_v31, %v2385_v46  ;;  %v2579_v34 = vsel %vm2563_vm13, %v2555_v20, %v2571_v21  ;;  %v2422_v61 = vadd.f32 1.0, %v2414_v7  ;;  %v2536_v14 = vmul.f32 1.442695, %v2524_v19 }
 0x761   :  { %v2587_v6 = vadd.f32 1.0, %v2579_v34  ;;  %v2423_v24 = vadd.f32 1.0, %v2415_v45  ;;  %v2538_v48 = vmul.f32 1.442695, %v2525_v17  ;;  %v2519_v5 = vsub.f32 0.0, %v2407_v12 }
 0x762   :  { %v2602_v35 = vpack.c.bf16 %v2593_v4, %v2592_v30  ;;  %3300 = vrcp.f32 %v2422_v61  ;;  %v2526_v59 = vmul.f32 %v2518_v33, %v2406_v39  ;;  %vm2564_vm14 = vcmp.ge.f32.partialorder %v4706_v52, 0.0 }
 0x763   :  { %v2595_v23 = vmul.f32 %v2587_v6, %v2387_v50  ;;  %3302 = vrcp.f32 %v2423_v24  ;;  %v2527_v38 = vmul.f32 %v2519_v5, %v2407_v12  ;;  %vm2565_vm15 = vcmp.ge.f32.partialorder %v4715_v32, 0.0 }
 0x764   :  { %3035 = vmatprep.mubr.msk.bf16.mxu0 %vm2250_vm0, %v2602_v35  ;;  %3304 = vpow2.f32 %v2536_v14  ;;  %v2540_v11 = vmul.f32 1.442695, %v2526_v59  ;;  %vm2566_vm2 = vcmp.ge.f32.partialorder %v4734_v16, 0.0  ;;  %vm2567_vm3 = vcmp.ge.f32.partialorder %v4738_v9, 0.0  ;;  %v2780_v9 = vld [vmem:[%s4888_s28] ss:$0 sm:$0xff] }
 0x765   :  { %v2603_v10 = vpack.c.bf16 %v2595_v23, %v2594_v41  ;;  %3306 = vpow2.f32 %v2538_v48  ;;  %v2542_v29 = vmul.f32 1.442695, %v2527_v38 }
 0x766   :  { %v3297_v13 = vpop.eup %3296  ;;  %3308 = vpow2.f32 %v2540_v11 }
 0x767   :  { %3036 = vmatmul.mubr.msk.bf16.vlgmr.msra.gmra.mxu0 %vm2250_vm0, %v2603_v10  ;;  %v2444_v40 = vmul.f32 1.0614054, %v3297_v13  ;;  %3310 = vpow2.f32 %v2542_v29  ;;  %v3063_v29 = vpop.permute.xlu1 %3062 }
 0x768   :  { %v3064_v16 = vunpack.i.l.bf16 %v3063_v29 }
 0x769   :  { %v2891_v51 = vadd.f32 -1.4531521, %v2444_v40 }
 0x76a   :  { %v3299_v47 = vpop.eup %3298 }
 0x76b   :  { %v2445_v36 = vmul.f32 1.0614054, %v3299_v47  ;;  %v2460_v2 = vmul.f32 %v3297_v13, %v2891_v51  ;;  %v2388_v51 = vmul.f32 0.5, %v4702_v54 }
 0x76d   :  { %v2892_v57 = vadd.f32 -1.4531521, %v2445_v36  ;;  %v2468_v18 = vadd.f32 1.4214138, %v2460_v2 }
 0x76f   :  { %v2461_v1 = vmul.f32 %v3299_v47, %v2892_v57  ;;  %v2476_v26 = vmul.f32 %v3297_v13, %v2468_v18  ;;  %v3301_v37 = vpop.eup %3300 }
 0x770   :  { %v3303_v60 = vpop.eup %3302  ;;  %v2446_v3 = vmul.f32 1.0614054, %v3301_v37 }
 0x771   :  { %v2469_v27 = vadd.f32 1.4214138, %v2461_v1  ;;  %v2899_v43 = vadd.f32 -0.28449672, %v2476_v26  ;;  %v2447_v42 = vmul.f32 1.0614054, %v3303_v60  ;;  %v3305_v8 = vpop.eup %3304 }
 0x772   :  { %v2893_v22 = vadd.f32 -1.4531521, %v2446_v3  ;;  %v3307_v35 = vpop.eup %3306 }
 0x773   :  { %v2477_v62 = vmul.f32 %v3299_v47, %v2469_v27  ;;  %v2492_v15 = vmul.f32 %v3297_v13, %v2899_v43  ;;  %v2894_v31 = vadd.f32 -1.4531521, %v2447_v42  ;;  %v3309_v52 = vpop.eup %3308  ;;  %v3069_v42 = vpop.permute.xlu0 %3068 }
 0x774   :  { %v2462_v21 = vmul.f32 %v3301_v37, %v2893_v22  ;;  %v3311_v33 = vpop.eup %3310  ;;  %v113_v22 = vsub.s32 1, %v4646_v0 }
 0x775   :  { %v2900_v20 = vadd.f32 -0.28449672, %v2477_v62  ;;  %v2500_v25 = vadd.f32 0.2548296, %v2492_v15  ;;  %v2463_v4 = vmul.f32 %v3303_v60, %v2894_v31  ;;  %v2391_v62 = vmul.f32 0.5, %v4731_v49 }
 0x776   :  { %v2470_v34 = vadd.f32 1.4214138, %v2462_v21  ;;  %v93_v49 = vld [vmem:[%s4890_s21] sm:$0xf] }
 0x777   :  { %v2493_v44 = vmul.f32 %v3299_v47, %v2900_v20  ;;  %v2508_v46 = vmul.f32 %v3297_v13, %v2500_v25  ;;  %v2471_v53 = vadd.f32 1.4214138, %v2463_v4  ;;  %v2714_v20 = vpop.permute.xlu1 %2713  ;;  %v3065_v25 = vunpack.i.h.bf16 %v3063_v29 }
 0x778   :  { %v2478_v39 = vmul.f32 %v3301_v37, %v2470_v34  ;;  %v100_v31 = vrot.slane %v93_v49, %v4649_v55  ;;  %v114_v4 = vrot.slane %v93_v49, %v113_v22  ;;  %v3071_v34 = vunpack.i.h.bf16 %v3069_v42 }
 0x779   :  { %v2501_v28 = vadd.f32 0.2548296, %v2493_v44  ;;  %v2548_v30 = vmul.f32 %v3305_v8, %v2508_v46  ;;  %v2479_v12 = vmul.f32 %v3303_v60, %v2471_v53  ;;  %v91_v44 = vmul.f32 %v3065_v25, %v2780_v9 }
 0x77a   :  { %v2901_v7 = vadd.f32 -0.28449672, %v2478_v39  ;;  %v3070_v8 = vunpack.i.l.bf16 %v3069_v42  ;;  %v120_v53 = vmul.f32 %v3071_v34, %v114_v4 }
 0x77b   :  { %v2509_v50 = vmul.f32 %v3299_v47, %v2501_v28  ;;  %v2556_v6 = vsub.f32 1.0, %v2548_v30  ;;  %v2902_v19 = vadd.f32 -0.28449672, %v2479_v12  ;;  %v2389_v47 = vmul.f32 0.5, %v4710_v63  ;;  %v132_v21 = vpop.permute.xlu1 %131 }
 0x77c   :  { %v2494_v45 = vmul.f32 %v3301_v37, %v2901_v7  ;;  %v127_v28 = vsub.s32 2, %v4646_v0 }
 0x77d   :  { %v2549_v41 = vmul.f32 %v3307_v35, %v2509_v50  ;;  %v2572_v23 = vsub.f32 0.0, %v2556_v6  ;;  %v2495_v24 = vmul.f32 %v3303_v60, %v2902_v19  ;;  %v106_v50 = vmul.f32 %v3070_v8, %v100_v31 }
 0x77e   :  { %v2502_v40 = vadd.f32 0.2548296, %v2494_v45  ;;  %v128_v39 = vrot.slane %v93_v49, %v127_v28 }
 0x77f   :  { %v2557_v10 = vsub.f32 1.0, %v2549_v41  ;;  %v2580_v56 = vsel %vm2564_vm14, %v2556_v6, %v2572_v23  ;;  %v2503_v14 = vadd.f32 0.2548296, %v2495_v24  ;;  %v4766_v6 = vpop.permute.xlu1 %2698  ;;  %v141_v41 = vsub.s32 3, %v4646_v0 }
 0x780   :  { %v2588_v13 = vadd.f32 1.0, %v2580_v56  ;;  %v2510_v2 = vmul.f32 %v3301_v37, %v2502_v40  ;;  %v2390_v37 = vmul.f32 0.5, %v4725_v58  ;;  %v65_v58 = vld [vmem:[%s4889_s0] sm:$0x3f]  ;;  %v134_v12 = vmul.f32 %v132_v21, %v128_v39 }
 0x781   :  { %v2573_v61 = vsub.f32 0.0, %v2557_v10  ;;  %v2511_v48 = vmul.f32 %v3303_v60, %v2503_v14  ;;  %v75_v46 = vmul.f32 %v3064_v16, %v65_v58  ;;  %v142_v7 = vrot.slane %v93_v49, %v141_v41 }
 0x782   :  { %v2596_v5 = vmul.f32 %v2588_v13, %v2388_v51  ;;  %v2550_v18 = vmul.f32 %v3309_v52, %v2510_v2 }
 0x783   :  { %v2581_v17 = vsel %vm2565_vm15, %v2557_v10, %v2573_v61  ;;  %v2551_v1 = vmul.f32 %v3311_v33, %v2511_v48  ;;  %v92_v30 = vadd.f32 %v91_v44, %v75_v46  ;;  %v146_v10 = vpop.permute.xlu1 %145 }
 0x784   :  { %v2589_v36 = vadd.f32 1.0, %v2581_v17  ;;  %v2558_v59 = vsub.f32 1.0, %v2550_v18  ;;  %v148_v19 = vmul.f32 %v146_v10, %v142_v7 }
 0x785   :  { %v2559_v32 = vsub.f32 1.0, %v2551_v1  ;;  %v107_v35 = vadd.f32 %v106_v50, %v92_v30 }
 0x786   :  { %v2597_v57 = vmul.f32 %v2589_v36, %v2389_v47  ;;  %v2574_v38 = vsub.f32 0.0, %v2558_v59 }
 0x787   :  { %v2575_v54 = vsub.f32 0.0, %v2559_v32  ;;  %v121_v23 = vadd.f32 %v120_v53, %v107_v35 }
 0x788   :  { %v2604_v26 = vpack.c.bf16 %v2597_v57, %v2596_v5  ;;  %v2582_v63 = vsel %vm2566_vm2, %v2558_v59, %v2574_v38 }
 0x789   :  { %v2583_v27 = vsel %vm2567_vm3, %v2559_v32, %v2575_v54  ;;  %v2590_v43 = vadd.f32 1.0, %v2582_v63  ;;  %v135_v56 = vadd.f32 %v134_v12, %v121_v23 }
 0x78a   :  { %3039 = vmatprep.mubr.msk.bf16.mxu0 %vm2250_vm0, %v2604_v26  ;;  %v2591_v15 = vadd.f32 1.0, %v2583_v27 }
 0x78b   :  { %v2598_v60 = vmul.f32 %v2590_v43, %v2390_v37  ;;  %v149_v45 = vadd.f32 %v148_v19, %v135_v56 }
 0x78c   :  { %v2599_v3 = vmul.f32 %v2591_v15, %v2391_v62 }
 0x78d   :  { %151 = vst.msk [vmem:[#allocation3] sm:$0x3f] %vm150_vm1, %v149_v45 }
 0x78e   :  { %v2605_v11 = vpack.c.bf16 %v2599_v3, %v2598_v60 }
 0x790   :  { %3040 = vmatmul.mubr.msk.bf16.gmra.mxu0 %vm2250_vm0, %v2605_v11 }
 0x791   :  { %3328 = shalt.err (!%p3325_p4)
}
 0x792   :  { %2769 = dma.vmem_to_hbm [thread:$0]  %s2767_s1, 128, %s4862_s18, [#allocation4]   ;;  %v2719_v0 = vrot.slane %v2714_v20, %v4649_v55  ;;  %v2710_v61 = vld [vmem:[%s4859_s15] sm:$0x1]  ;;  %v2737_v2 = vld [vmem:[%s4861_s17 + $0x10] sm:$0xff]  ;;  %vm2751_vm0 = vcmask 261120  }
 0x793   :  { %v2903_v13 = vld [vmem:[%s4858_s14] ss:$0 sm:$0xff]  ;;  %v2738_v32 = vld [vmem:[%s4861_s17 + $0x18] sm:$0xff]  ;;  %v2736_v27 = vld [vmem:[%s4861_s17 + $0x8] sm:$0xff] }
 0x794   :  { %v2720_v24 = vmul.f32 %v2719_v0, %v2710_v61  ;;  %v2735_v57 = vld [vmem:[%s4861_s17] sm:$0xff]  ;;  %v2741_v20 = vld [vmem:[%s4861_s17 + $0x30] sm:$0xff]  ;;  %v2742_v8 = vld [vmem:[%s4861_s17 + $0x38] sm:$0xff] }
 0x795   :  { %v2739_v49 = vld [vmem:[%s4861_s17 + $0x20] sm:$0xff]  ;;  %v2740_v4 = vld [vmem:[%s4861_s17 + $0x28] sm:$0xff] }
 0x796   :  { %v2725_v17 = vrot.slane %v2720_v24, %v4649_v55 }
 0x827   :  { %v3037_v40 = vpop.f32.mrf.mxu0 }
 0x828   :  { %v2669_v14 = vadd.f32 %v3037_v40, %v2903_v13 }
 0x829   :  { %v2660_v51 = vpop.f32.mrf.mxu0 }
 0x82a   :  { %v2703_v47 = vmul.f32 %v4766_v6, %v2669_v14  ;;  %v2661_v36 = vadd.f32 %v2903_v13, %v2660_v51 }
 0x82b   :  { %v3038_v52 = vpop.f32.mrf.mxu0 }
 0x82c   :  { %v2729_v48 = vadd.f32 %v2725_v17, %v2703_v47  ;;  %v2701_v33 = vmul.f32 %v4766_v6, %v2661_v36  ;;  %v2672_v5 = vadd.f32 %v3038_v52, %v2903_v13 }
 0x82d   :  { %v2663_v55 = vpop.f32.mrf.mxu0 }
 0x82e   :  { %v2745_v18 = vadd.f32 %v2737_v2, %v2729_v48  ;;  %v2727_v1 = vadd.f32 %v2725_v17, %v2701_v33  ;;  %v2704_v26 = vmul.f32 %v4766_v6, %v2672_v5  ;;  %v2664_v59 = vadd.f32 %v2903_v13, %v2663_v55 }
 0x830   :  { %2754 = vst.msk [vmem:[%s4863_s19 + $0x10] sm:$0xff] %vm2751_vm0, %v2745_v18  ;;  %v2743_v38 = vadd.f32 %v2735_v57, %v2727_v1  ;;  %v2730_v54 = vadd.f32 %v2725_v17, %v2704_v26  ;;  %v2702_v63 = vmul.f32 %v4766_v6, %v2664_v59 }
 0x832   :  { %2752 = vst.msk [vmem:[%s4863_s19] sm:$0xff] %vm2751_vm0, %v2743_v38  ;;  %v2746_v43 = vadd.f32 %v2738_v32, %v2730_v54  ;;  %v2728_v37 = vadd.f32 %v2725_v17, %v2702_v63 }
 0x834   :  { %2755 = vst.msk [vmem:[%s4863_s19 + $0x18] sm:$0xff] %vm2751_vm0, %v2746_v43  ;;  %v2744_v62 = vadd.f32 %v2736_v27, %v2728_v37 }
 0x836   :  { %2753 = vst.msk [vmem:[%s4863_s19 + $0x8] sm:$0xff] %vm2751_vm0, %v2744_v62 }
 0x850   :  { %v3041_v15 = vpop.f32.mrf.mxu0 }
 0x851   :  { %v2685_v60 = vadd.f32 %v3041_v15, %v2903_v13 }
 0x852   :  { %v2676_v3 = vpop.f32.mrf.mxu0 }
 0x853   :  { %v2707_v11 = vmul.f32 %v4766_v6, %v2685_v60  ;;  %v2677_v29 = vadd.f32 %v2903_v13, %v2676_v3 }
 0x854   :  { %v3042_v25 = vpop.f32.mrf.mxu0 }
 0x855   :  { %v2733_v16 = vadd.f32 %v2725_v17, %v2707_v11  ;;  %v2705_v9 = vmul.f32 %v4766_v6, %v2677_v29  ;;  %v2688_v58 = vadd.f32 %v3042_v25, %v2903_v13 }
 0x856   :  { %v2679_v42 = vpop.f32.mrf.mxu0 }
 0x857   :  { %v2749_v22 = vadd.f32 %v2741_v20, %v2733_v16  ;;  %v2731_v44 = vadd.f32 %v2725_v17, %v2705_v9  ;;  %v2708_v46 = vmul.f32 %v4766_v6, %v2688_v58  ;;  %v2680_v31 = vadd.f32 %v2903_v13, %v2679_v42 }
 0x859   :  { %2758 = vst.msk [vmem:[%s4863_s19 + $0x30] sm:$0xff] %vm2751_vm0, %v2749_v22  ;;  %v2747_v21 = vadd.f32 %v2739_v49, %v2731_v44  ;;  %v2734_v28 = vadd.f32 %v2725_v17, %v2708_v46  ;;  %v2706_v30 = vmul.f32 %v4766_v6, %v2680_v31 }
 0x85b   :  { %2756 = vst.msk [vmem:[%s4863_s19 + $0x20] sm:$0xff] %vm2751_vm0, %v2747_v21  ;;  %v2750_v34 = vadd.f32 %v2742_v8, %v2734_v28  ;;  %v2732_v50 = vadd.f32 %v2725_v17, %v2706_v30 }
 0x85d   :  { %2759 = vst.msk [vmem:[%s4863_s19 + $0x38] sm:$0xff] %vm2751_vm0, %v2750_v34  ;;  %v2748_v53 = vadd.f32 %v2740_v4, %v2732_v50 }
 0x85f   :  { %2757 = vst.msk [vmem:[%s4863_s19 + $0x28] sm:$0xff] %vm2751_vm0, %v2748_v53 }
 0x860   :  { %3337 = dma.done.wait [#allocation4], 128  }
 0x861   :  { %3338 = vsyncadd [#allocation4], 4294967168 }
 0x862   :  { %2777 = vsyncpa [#allocation4], 1 }

</bundles_post_ra>
